<compile_context>
chip_gen: v5e
topology: v5e:2x2
jax: 0.10.0
libtpu: 0.0.40
codegen_flags: <defaults>
</compile_context>

<pallas_src>
import functools

import jax
import jax.numpy as jnp
from jax import lax
from jax.experimental import pallas as pl
from jax.experimental.pallas import tpu as pltpu


HEAD_PAD = 128   # fused actor+critic head padded to one full lane group


def _round_up(n, m):
    return ((n + m - 1) // m) * m


def _choose_tile_b(B):
    """Batch-tile selection: large MXU-filling tiles, >=2 grid steps when the
    batch allows (engages both TensorCores on v7x), always a multiple of 8."""
    if B <= 16:
        return _round_up(max(B, 8), 8)
    return min(512, _round_up(pl.cdiv(B, 2), 8))


def _policy_kernel(x_ref,
                   w1_ref, b1_ref,
                   w2_ref, b2_ref,
                   w3_ref, b3_ref,
                   wh_ref, bh_ref,
                   out_ref, *, action_dim):
    # fc1..fc3: bf16 operands on the MXU, f32 accumulation; bias + ReLU
    # epilogue in bf16 (bf16 VPU on v6e/v7x; still correct on v5e).
    h = jnp.dot(x_ref[...], w1_ref[...], preferred_element_type=jnp.float32)
    h = jnp.maximum(h.astype(jnp.bfloat16) + b1_ref[...], 0)
    h = jnp.dot(h, w2_ref[...], preferred_element_type=jnp.float32)
    h = jnp.maximum(h.astype(jnp.bfloat16) + b2_ref[...], 0)
    h = jnp.dot(h, w3_ref[...], preferred_element_type=jnp.float32)
    h = jnp.maximum(h.astype(jnp.bfloat16) + b3_ref[...], 0)

    # Fused actor+critic head: cols [0, action_dim) are logits, col action_dim
    # is the critic value, remaining cols are zero padding. f32 epilogue (only
    # 128 lanes of work).
    head = jnp.dot(h, wh_ref[...], preferred_element_type=jnp.float32) + bh_ref[...]

    col = lax.broadcasted_iota(jnp.int32, head.shape, 1)
    is_logit = col < action_dim

    masked = jnp.where(is_logit, head, jnp.float32(-1e30))
    m = jnp.max(masked, axis=-1, keepdims=True)
    e = jnp.where(is_logit, jnp.exp(masked - m), 0.0)
    denom = jnp.sum(e, axis=-1, keepdims=True)
    probs = e / denom   # exact divide: denom is one column, approx buys nothing

    # Single lane-dense store: probs in [0, action_dim), value at col action_dim.
    out_ref[...] = jnp.where(col == action_dim, head, probs)


def discrete_policy_network(x, params):
    """x: (B, state_dim) float32. Returns (action_probs (B, A), state_value (B, 1))."""
    B, state_dim = x.shape
    action_dim = params["action_dim"]

    tile_b = _choose_tile_b(B)
    grid = (pl.cdiv(B, tile_b),)

    x_bf16 = x.astype(jnp.bfloat16)

    in_arrays = [
        x_bf16,
        params["w1"], params["b1"],
        params["w2"], params["b2"],
        params["w3"], params["b3"],
        params["wh"], params["bh"],
    ]

    def const_spec(shape, single_buffer):
        idx = lambda i: (0,) * len(shape)
        if single_buffer:
            return pl.BlockSpec(shape, idx, pipeline_mode=pl.Buffered(1))
        return pl.BlockSpec(shape, idx)

    def run(single_buffer):
        in_specs = [pl.BlockSpec((tile_b, state_dim), lambda i: (i, 0))]
        in_specs += [const_spec(a.shape, single_buffer) for a in in_arrays[1:]]
        return pl.pallas_call(
            functools.partial(_policy_kernel, action_dim=action_dim),
            grid=grid,
            in_specs=in_specs,
            out_specs=pl.BlockSpec((tile_b, HEAD_PAD), lambda i: (i, 0)),
            out_shape=jax.ShapeDtypeStruct((B, HEAD_PAD), jnp.float32),
            compiler_params=pltpu.CompilerParams(
                dimension_semantics=("parallel",)),
        )(*in_arrays)

    try:
        out = run(single_buffer=True)
    except Exception:
        # pipeline_mode=pl.Buffered(1) not supported by this JAX build; the
        # constant index_map still keeps weights VMEM-resident, just with the
        # default (unused) second buffer.
        out = run(single_buffer=False)

    probs = out[:, :action_dim]
    value = out[:, action_dim:action_dim + 1]
    return probs, value


def init_params(key, state_dim, action_dim):
    """PyTorch-default-like uniform init; weights & hidden biases bf16, head bias f32."""
    def linear(key, fan_in, fan_out):
        kw, kb = jax.random.split(key)
        bound = 1.0 / jnp.sqrt(fan_in)
        w = jax.random.uniform(kw, (fan_in, fan_out), jnp.float32, -bound, bound)
        b = jax.random.uniform(kb, (1, fan_out), jnp.float32, -bound, bound)
        return w, b

    k1, k2, k3, k4, k5 = jax.random.split(key, 5)
    w1, b1 = linear(k1, state_dim, 512)
    w2, b2 = linear(k2, 512, 512)
    w3, b3 = linear(k3, 512, 256)
    wa, ba = linear(k4, 256, action_dim)
    wc, bc = linear(k5, 256, 1)

    # Fuse actor + critic into one head, zero-padded to HEAD_PAD lanes.
    wh = jnp.concatenate([wa, wc], axis=1)
    wh = jnp.pad(wh, ((0, 0), (0, HEAD_PAD - wh.shape[1])))
    bh = jnp.concatenate([ba, bc], axis=1)
    bh = jnp.pad(bh, ((0, 0), (0, HEAD_PAD - bh.shape[1])))

    return dict(
        w1=w1.astype(jnp.bfloat16), b1=b1.astype(jnp.bfloat16),
        w2=w2.astype(jnp.bfloat16), b2=b2.astype(jnp.bfloat16),
        w3=w3.astype(jnp.bfloat16), b3=b3.astype(jnp.bfloat16),
        wh=wh.astype(jnp.bfloat16), bh=bh,
        action_dim=action_dim,
    )


def reference_forward(x, p):
    """Pure-JAX reference with the same bf16-operand / f32-accumulate numerics."""
    action_dim = p["action_dim"]
    h = jnp.dot(x.astype(jnp.bfloat16), p["w1"], preferred_element_type=jnp.float32)
    h = jnp.maximum(h.astype(jnp.bfloat16) + p["b1"], 0)
    h = jnp.dot(h, p["w2"], preferred_element_type=jnp.float32)
    h = jnp.maximum(h.astype(jnp.bfloat16) + p["b2"], 0)
    h = jnp.dot(h, p["w3"], preferred_element_type=jnp.float32)
    h = jnp.maximum(h.astype(jnp.bfloat16) + p["b3"], 0)
    head = jnp.dot(h, p["wh"], preferred_element_type=jnp.float32) + p["bh"]
    logits = head[:, :action_dim]
    probs = jax.nn.softmax(logits, axis=-1)
    value = head[:, action_dim:action_dim + 1]
    return probs, value


if __name__ == "__main__":
    key = jax.random.PRNGKey(0)
    kx, kp = jax.random.split(key)

    batch = 20         # not a tile multiple -> exercises ragged final block + 2-step grid
    state_dim = 24     # flattened env state vector length (synthetic)
    action_dim = 11    # discrete market-purchase levels 0..10

    x = jax.random.normal(kx, (batch, state_dim), jnp.float32)
    params = init_params(kp, state_dim, action_dim)

    probs, value = discrete_policy_network(x, params)
    jax.block_until_ready((probs, value))

    ref_probs, ref_value = reference_forward(x, params)

    assert probs.shape == (batch, action_dim)
    assert value.shape == (batch, 1)
    assert bool(jnp.all(jnp.isfinite(probs))) and bool(jnp.all(jnp.isfinite(value)))
    assert jnp.allclose(probs, ref_probs, atol=1e-2, rtol=1e-2)
    assert jnp.allclose(value, ref_value, atol=1e-2, rtol=1e-2)
    assert jnp.allclose(jnp.sum(probs, axis=-1), 1.0, atol=1e-3)

    print("KERNEL_OK")
</pallas_src>

<mosaic_0001>
module attributes {stable_mosaic.version = 11 : i64} {
  func.func @_policy_kernel(%arg0: i32, %arg1: memref<16x24xbf16, #tpu.memory_space<vmem>>, %arg2: memref<24x512xbf16, #tpu.memory_space<vmem>>, %arg3: memref<1x512xbf16, #tpu.memory_space<vmem>>, %arg4: memref<512x512xbf16, #tpu.memory_space<vmem>>, %arg5: memref<1x512xbf16, #tpu.memory_space<vmem>>, %arg6: memref<512x256xbf16, #tpu.memory_space<vmem>>, %arg7: memref<1x256xbf16, #tpu.memory_space<vmem>>, %arg8: memref<256x128xbf16, #tpu.memory_space<vmem>>, %arg9: memref<1x128xf32, #tpu.memory_space<vmem>>, %arg10: memref<16x128xf32, #tpu.memory_space<vmem>>) attributes {dimension_semantics = [#tpu.dimension_semantics<parallel>], iteration_bounds = array<i64: 2>, scalar_prefetch = 0 : i64, scratch_operands = 0 : i64, tpu.core_type = #tpu.core_type<tc>, window_params = [{transform_indices = @transform_0, window_bounds = array<i64: 16, 24>}, {pipeline_mode = #tpu.pipeline_mode<synchronous>, transform_indices = @transform_1, window_bounds = array<i64: 24, 512>}, {pipeline_mode = #tpu.pipeline_mode<synchronous>, transform_indices = @transform_2, window_bounds = array<i64: 1, 512>}, {pipeline_mode = #tpu.pipeline_mode<synchronous>, transform_indices = @transform_3, window_bounds = array<i64: 512, 512>}, {pipeline_mode = #tpu.pipeline_mode<synchronous>, transform_indices = @transform_4, window_bounds = array<i64: 1, 512>}, {pipeline_mode = #tpu.pipeline_mode<synchronous>, transform_indices = @transform_5, window_bounds = array<i64: 512, 256>}, {pipeline_mode = #tpu.pipeline_mode<synchronous>, transform_indices = @transform_6, window_bounds = array<i64: 1, 256>}, {pipeline_mode = #tpu.pipeline_mode<synchronous>, transform_indices = @transform_7, window_bounds = array<i64: 256, 128>}, {pipeline_mode = #tpu.pipeline_mode<synchronous>, transform_indices = @transform_8, window_bounds = array<i64: 1, 128>}, {transform_indices = @transform_9, window_bounds = array<i64: 16, 128>}]} {
    %c0 = arith.constant 0 : index
    %c0_0 = arith.constant 0 : index
    %0 = vector.load %arg1[%c0, %c0_0] : memref<16x24xbf16, #tpu.memory_space<vmem>>, vector<16x24xbf16>
    %c0_1 = arith.constant 0 : index
    %c0_2 = arith.constant 0 : index
    %1 = vector.load %arg2[%c0_1, %c0_2] : memref<24x512xbf16, #tpu.memory_space<vmem>>, vector<24x512xbf16>
    %cst = arith.constant dense<0.000000e+00> : vector<16x512xf32>
    %2 = tpu.matmul %0, %1, %cst {dimension_numbers = #tpu.dot_dimension_numbers<[1], [0], [0], [1], [0, 0, 1, 1], [], []>} : vector<16x24xbf16>, vector<24x512xbf16>, vector<16x512xf32> -> vector<16x512xf32>
    %3 = arith.truncf %2 : vector<16x512xf32> to vector<16x512xbf16>
    %c0_3 = arith.constant 0 : index
    %c0_4 = arith.constant 0 : index
    %4 = vector.load %arg3[%c0_3, %c0_4] : memref<1x512xbf16, #tpu.memory_space<vmem>>, vector<1x512xbf16>
    %5 = vector.broadcast %4 : vector<1x512xbf16> to vector<16x512xbf16>
    %6 = arith.addf %3, %5 : vector<16x512xbf16>
    %cst_5 = arith.constant 0.000000e+00 : bf16
    %7 = vector.broadcast %cst_5 : bf16 to vector<16x512xbf16>
    %8 = arith.maximumf %6, %7 : vector<16x512xbf16>
    %c0_6 = arith.constant 0 : index
    %c0_7 = arith.constant 0 : index
    %9 = vector.load %arg4[%c0_6, %c0_7] : memref<512x512xbf16, #tpu.memory_space<vmem>>, vector<512x512xbf16>
    %cst_8 = arith.constant dense<0.000000e+00> : vector<16x512xf32>
    %10 = tpu.matmul %8, %9, %cst_8 {dimension_numbers = #tpu.dot_dimension_numbers<[1], [0], [0], [1], [0, 0, 1, 1], [], []>} : vector<16x512xbf16>, vector<512x512xbf16>, vector<16x512xf32> -> vector<16x512xf32>
    %11 = arith.truncf %10 : vector<16x512xf32> to vector<16x512xbf16>
    %c0_9 = arith.constant 0 : index
    %c0_10 = arith.constant 0 : index
    %12 = vector.load %arg5[%c0_9, %c0_10] : memref<1x512xbf16, #tpu.memory_space<vmem>>, vector<1x512xbf16>
    %13 = vector.broadcast %12 : vector<1x512xbf16> to vector<16x512xbf16>
    %14 = arith.addf %11, %13 : vector<16x512xbf16>
    %cst_11 = arith.constant 0.000000e+00 : bf16
    %15 = vector.broadcast %cst_11 : bf16 to vector<16x512xbf16>
    %16 = arith.maximumf %14, %15 : vector<16x512xbf16>
    %c0_12 = arith.constant 0 : index
    %c0_13 = arith.constant 0 : index
    %17 = vector.load %arg6[%c0_12, %c0_13] : memref<512x256xbf16, #tpu.memory_space<vmem>>, vector<512x256xbf16>
    %cst_14 = arith.constant dense<0.000000e+00> : vector<16x256xf32>
    %18 = tpu.matmul %16, %17, %cst_14 {dimension_numbers = #tpu.dot_dimension_numbers<[1], [0], [0], [1], [0, 0, 1, 1], [], []>} : vector<16x512xbf16>, vector<512x256xbf16>, vector<16x256xf32> -> vector<16x256xf32>
    %19 = arith.truncf %18 : vector<16x256xf32> to vector<16x256xbf16>
    %c0_15 = arith.constant 0 : index
    %c0_16 = arith.constant 0 : index
    %20 = vector.load %arg7[%c0_15, %c0_16] : memref<1x256xbf16, #tpu.memory_space<vmem>>, vector<1x256xbf16>
    %21 = vector.broadcast %20 : vector<1x256xbf16> to vector<16x256xbf16>
    %22 = arith.addf %19, %21 : vector<16x256xbf16>
    %cst_17 = arith.constant 0.000000e+00 : bf16
    %23 = vector.broadcast %cst_17 : bf16 to vector<16x256xbf16>
    %24 = arith.maximumf %22, %23 : vector<16x256xbf16>
    %c0_18 = arith.constant 0 : index
    %c0_19 = arith.constant 0 : index
    %25 = vector.load %arg8[%c0_18, %c0_19] : memref<256x128xbf16, #tpu.memory_space<vmem>>, vector<256x128xbf16>
    %cst_20 = arith.constant dense<0.000000e+00> : vector<16x128xf32>
    %26 = tpu.matmul %24, %25, %cst_20 {dimension_numbers = #tpu.dot_dimension_numbers<[1], [0], [0], [1], [0, 0, 1, 1], [], []>} : vector<16x256xbf16>, vector<256x128xbf16>, vector<16x128xf32> -> vector<16x128xf32>
    %c0_21 = arith.constant 0 : index
    %c0_22 = arith.constant 0 : index
    %27 = vector.load %arg9[%c0_21, %c0_22] : memref<1x128xf32, #tpu.memory_space<vmem>>, vector<1x128xf32>
    %28 = vector.broadcast %27 : vector<1x128xf32> to vector<16x128xf32>
    %29 = arith.addf %26, %28 : vector<16x128xf32>
    %30 = tpu.iota {dimensions = array<i32: 1>} : vector<16x128xi32>
    %c11_i32 = arith.constant 11 : i32
    %31 = vector.broadcast %c11_i32 : i32 to vector<16x128xi32>
    %32 = arith.cmpi slt, %30, %31 : vector<16x128xi32>
    %cst_23 = arith.constant -1.000000e+30 : f32
    %33 = vector.broadcast %cst_23 : f32 to vector<16x128xf32>
    %34 = arith.select %32, %29, %33 : vector<16x128xi1>, vector<16x128xf32>
    %cst_24 = arith.constant dense<0xFF800000> : vector<16xf32>
    %35 = vector.multi_reduction <maximumf>, %34, %cst_24 [1] : vector<16x128xf32> to vector<16xf32>
    %36 = vector.shape_cast %35 : vector<16xf32> to vector<16x1xf32>
    %37 = vector.broadcast %36 : vector<16x1xf32> to vector<16x128xf32>
    %38 = arith.subf %34, %37 : vector<16x128xf32>
    %39 = math.exp %38 : vector<16x128xf32>
    %cst_25 = arith.constant 0.000000e+00 : f32
    %40 = vector.broadcast %cst_25 : f32 to vector<16x128xf32>
    %41 = arith.select %32, %39, %40 : vector<16x128xi1>, vector<16x128xf32>
    %cst_26 = arith.constant dense<0.000000e+00> : vector<16xf32>
    %42 = vector.multi_reduction <add>, %41, %cst_26 [1] : vector<16x128xf32> to vector<16xf32>
    %43 = vector.shape_cast %42 : vector<16xf32> to vector<16x1xf32>
    %44 = vector.broadcast %43 : vector<16x1xf32> to vector<16x128xf32>
    %45 = arith.divf %41, %44 : vector<16x128xf32>
    %c11_i32_27 = arith.constant 11 : i32
    %46 = vector.broadcast %c11_i32_27 : i32 to vector<16x128xi32>
    %47 = arith.cmpi eq, %30, %46 : vector<16x128xi32>
    %48 = arith.select %47, %29, %45 : vector<16x128xi1>, vector<16x128xf32>
    %c0_28 = arith.constant 0 : index
    %c0_29 = arith.constant 0 : index
    %49 = vector.load %arg10[%c0_28, %c0_29] : memref<16x128xf32, #tpu.memory_space<vmem>>, vector<16x128xf32>
    tpu.vector_store %arg10[%c0_28, %c0_29], %48 {strides = array<i32>} : memref<16x128xf32, #tpu.memory_space<vmem>>, vector<16x128xf32>,
    return
  }
  func.func @transform_0(%arg0: i32) -> (i32, i32) {
    %c0_i32 = arith.constant 0 : i32
    %c0_i32_0 = arith.constant 0 : i32
    return %arg0, %c0_i32 : i32, i32
  }
  func.func @transform_1(%arg0: i32) -> (i32, i32) {
    %c0_i32 = arith.constant 0 : i32
    %c0_i32_0 = arith.constant 0 : i32
    %c0_i32_1 = arith.constant 0 : i32
    return %c0_i32, %c0_i32_0 : i32, i32
  }
  func.func @transform_2(%arg0: i32) -> (i32, i32) {
    %c0_i32 = arith.constant 0 : i32
    %c0_i32_0 = arith.constant 0 : i32
    %c0_i32_1 = arith.constant 0 : i32
    return %c0_i32, %c0_i32_0 : i32, i32
  }
  func.func @transform_3(%arg0: i32) -> (i32, i32) {
    %c0_i32 = arith.constant 0 : i32
    %c0_i32_0 = arith.constant 0 : i32
    %c0_i32_1 = arith.constant 0 : i32
    return %c0_i32, %c0_i32_0 : i32, i32
  }
  func.func @transform_4(%arg0: i32) -> (i32, i32) {
    %c0_i32 = arith.constant 0 : i32
    %c0_i32_0 = arith.constant 0 : i32
    %c0_i32_1 = arith.constant 0 : i32
    return %c0_i32, %c0_i32_0 : i32, i32
  }
  func.func @transform_5(%arg0: i32) -> (i32, i32) {
    %c0_i32 = arith.constant 0 : i32
    %c0_i32_0 = arith.constant 0 : i32
    %c0_i32_1 = arith.constant 0 : i32
    return %c0_i32, %c0_i32_0 : i32, i32
  }
  func.func @transform_6(%arg0: i32) -> (i32, i32) {
    %c0_i32 = arith.constant 0 : i32
    %c0_i32_0 = arith.constant 0 : i32
    %c0_i32_1 = arith.constant 0 : i32
    return %c0_i32, %c0_i32_0 : i32, i32
  }
  func.func @transform_7(%arg0: i32) -> (i32, i32) {
    %c0_i32 = arith.constant 0 : i32
    %c0_i32_0 = arith.constant 0 : i32
    %c0_i32_1 = arith.constant 0 : i32
    return %c0_i32, %c0_i32_0 : i32, i32
  }
  func.func @transform_8(%arg0: i32) -> (i32, i32) {
    %c0_i32 = arith.constant 0 : i32
    %c0_i32_0 = arith.constant 0 : i32
    %c0_i32_1 = arith.constant 0 : i32
    return %c0_i32, %c0_i32_0 : i32, i32
  }
  func.func @transform_9(%arg0: i32) -> (i32, i32) {
    %c0_i32 = arith.constant 0 : i32
    %c0_i32_0 = arith.constant 0 : i32
    return %arg0, %c0_i32 : i32, i32
  }
}

module attributes {stable_mosaic.version = 11 : i64} {
  func.func @_policy_kernel(%arg0: i32, %arg1: memref<16x24xbf16, #tpu.memory_space<vmem>>, %arg2: memref<24x512xbf16, #tpu.memory_space<vmem>>, %arg3: memref<1x512xbf16, #tpu.memory_space<vmem>>, %arg4: memref<512x512xbf16, #tpu.memory_space<vmem>>, %arg5: memref<1x512xbf16, #tpu.memory_space<vmem>>, %arg6: memref<512x256xbf16, #tpu.memory_space<vmem>>, %arg7: memref<1x256xbf16, #tpu.memory_space<vmem>>, %arg8: memref<256x128xbf16, #tpu.memory_space<vmem>>, %arg9: memref<1x128xf32, #tpu.memory_space<vmem>>, %arg10: memref<16x128xf32, #tpu.memory_space<vmem>>) attributes {dimension_semantics = [#tpu.dimension_semantics<parallel>], iteration_bounds = array<i64: 2>, scalar_prefetch = 0 : i64, scratch_operands = 0 : i64, tpu.core_type = #tpu.core_type<tc>, window_params = [{transform_indices = @transform_0, window_bounds = array<i64: 16, 24>}, {pipeline_mode = #tpu.pipeline_mode<synchronous>, transform_indices = @transform_1, window_bounds = array<i64: 24, 512>}, {pipeline_mode = #tpu.pipeline_mode<synchronous>, transform_indices = @transform_2, window_bounds = array<i64: 1, 512>}, {pipeline_mode = #tpu.pipeline_mode<synchronous>, transform_indices = @transform_3, window_bounds = array<i64: 512, 512>}, {pipeline_mode = #tpu.pipeline_mode<synchronous>, transform_indices = @transform_4, window_bounds = array<i64: 1, 512>}, {pipeline_mode = #tpu.pipeline_mode<synchronous>, transform_indices = @transform_5, window_bounds = array<i64: 512, 256>}, {pipeline_mode = #tpu.pipeline_mode<synchronous>, transform_indices = @transform_6, window_bounds = array<i64: 1, 256>}, {pipeline_mode = #tpu.pipeline_mode<synchronous>, transform_indices = @transform_7, window_bounds = array<i64: 256, 128>}, {pipeline_mode = #tpu.pipeline_mode<synchronous>, transform_indices = @transform_8, window_bounds = array<i64: 1, 128>}, {transform_indices = @transform_9, window_bounds = array<i64: 16, 128>}]} {
    %c0 = arith.constant 0 : index
    %c0_0 = arith.constant 0 : index
    %0 = vector.load %arg1[%c0, %c0_0] : memref<16x24xbf16, #tpu.memory_space<vmem>>, vector<16x24xbf16>
    %c0_1 = arith.constant 0 : index
    %c0_2 = arith.constant 0 : index
    %1 = vector.load %arg2[%c0_1, %c0_2] : memref<24x512xbf16, #tpu.memory_space<vmem>>, vector<24x512xbf16>
    %cst = arith.constant dense<0.000000e+00> : vector<16x512xf32>
    %2 = tpu.matmul %0, %1, %cst {dimension_numbers = #tpu.dot_dimension_numbers<[1], [0], [0], [1], [0, 0, 1, 1], [], []>} : vector<16x24xbf16>, vector<24x512xbf16>, vector<16x512xf32> -> vector<16x512xf32>
    %3 = arith.truncf %2 : vector<16x512xf32> to vector<16x512xbf16>
    %c0_3 = arith.constant 0 : index
    %c0_4 = arith.constant 0 : index
    %4 = vector.load %arg3[%c0_3, %c0_4] : memref<1x512xbf16, #tpu.memory_space<vmem>>, vector<1x512xbf16>
    %5 = vector.broadcast %4 : vector<1x512xbf16> to vector<16x512xbf16>
    %6 = arith.addf %3, %5 : vector<16x512xbf16>
    %cst_5 = arith.constant 0.000000e+00 : bf16
    %7 = vector.broadcast %cst_5 : bf16 to vector<16x512xbf16>
    %8 = arith.maximumf %6, %7 : vector<16x512xbf16>
    %c0_6 = arith.constant 0 : index
    %c0_7 = arith.constant 0 : index
    %9 = vector.load %arg4[%c0_6, %c0_7] : memref<512x512xbf16, #tpu.memory_space<vmem>>, vector<512x512xbf16>
    %cst_8 = arith.constant dense<0.000000e+00> : vector<16x512xf32>
    %10 = tpu.matmul %8, %9, %cst_8 {dimension_numbers = #tpu.dot_dimension_numbers<[1], [0], [0], [1], [0, 0, 1, 1], [], []>} : vector<16x512xbf16>, vector<512x512xbf16>, vector<16x512xf32> -> vector<16x512xf32>
    %11 = arith.truncf %10 : vector<16x512xf32> to vector<16x512xbf16>
    %c0_9 = arith.constant 0 : index
    %c0_10 = arith.constant 0 : index
    %12 = vector.load %arg5[%c0_9, %c0_10] : memref<1x512xbf16, #tpu.memory_space<vmem>>, vector<1x512xbf16>
    %13 = vector.broadcast %12 : vector<1x512xbf16> to vector<16x512xbf16>
    %14 = arith.addf %11, %13 : vector<16x512xbf16>
    %cst_11 = arith.constant 0.000000e+00 : bf16
    %15 = vector.broadcast %cst_11 : bf16 to vector<16x512xbf16>
    %16 = arith.maximumf %14, %15 : vector<16x512xbf16>
    %c0_12 = arith.constant 0 : index
    %c0_13 = arith.constant 0 : index
    %17 = vector.load %arg6[%c0_12, %c0_13] : memref<512x256xbf16, #tpu.memory_space<vmem>>, vector<512x256xbf16>
    %cst_14 = arith.constant dense<0.000000e+00> : vector<16x256xf32>
    %18 = tpu.matmul %16, %17, %cst_14 {dimension_numbers = #tpu.dot_dimension_numbers<[1], [0], [0], [1], [0, 0, 1, 1], [], []>} : vector<16x512xbf16>, vector<512x256xbf16>, vector<16x256xf32> -> vector<16x256xf32>
    %19 = arith.truncf %18 : vector<16x256xf32> to vector<16x256xbf16>
    %c0_15 = arith.constant 0 : index
    %c0_16 = arith.constant 0 : index
    %20 = vector.load %arg7[%c0_15, %c0_16] : memref<1x256xbf16, #tpu.memory_space<vmem>>, vector<1x256xbf16>
    %21 = vector.broadcast %20 : vector<1x256xbf16> to vector<16x256xbf16>
    %22 = arith.addf %19, %21 : vector<16x256xbf16>
    %cst_17 = arith.constant 0.000000e+00 : bf16
    %23 = vector.broadcast %cst_17 : bf16 to vector<16x256xbf16>
    %24 = arith.maximumf %22, %23 : vector<16x256xbf16>
    %c0_18 = arith.constant 0 : index
    %c0_19 = arith.constant 0 : index
    %25 = vector.load %arg8[%c0_18, %c0_19] : memref<256x128xbf16, #tpu.memory_space<vmem>>, vector<256x128xbf16>
    %cst_20 = arith.constant dense<0.000000e+00> : vector<16x128xf32>
    %26 = tpu.matmul %24, %25, %cst_20 {dimension_numbers = #tpu.dot_dimension_numbers<[1], [0], [0], [1], [0, 0, 1, 1], [], []>} : vector<16x256xbf16>, vector<256x128xbf16>, vector<16x128xf32> -> vector<16x128xf32>
    %c0_21 = arith.constant 0 : index
    %c0_22 = arith.constant 0 : index
    %27 = vector.load %arg9[%c0_21, %c0_22] : memref<1x128xf32, #tpu.memory_space<vmem>>, vector<1x128xf32>
    %28 = vector.broadcast %27 : vector<1x128xf32> to vector<16x128xf32>
    %29 = arith.addf %26, %28 : vector<16x128xf32>
    %30 = tpu.iota {dimensions = array<i32: 1>} : vector<16x128xi32>
    %c11_i32 = arith.constant 11 : i32
    %31 = vector.broadcast %c11_i32 : i32 to vector<16x128xi32>
    %32 = arith.cmpi slt, %30, %31 : vector<16x128xi32>
    %cst_23 = arith.constant -1.000000e+30 : f32
    %33 = vector.broadcast %cst_23 : f32 to vector<16x128xf32>
    %34 = arith.select %32, %29, %33 : vector<16x128xi1>, vector<16x128xf32>
    %cst_24 = arith.constant dense<0xFF800000> : vector<16xf32>
    %35 = vector.multi_reduction <maximumf>, %34, %cst_24 [1] : vector<16x128xf32> to vector<16xf32>
    %36 = vector.shape_cast %35 : vector<16xf32> to vector<16x1xf32>
    %37 = vector.broadcast %36 : vector<16x1xf32> to vector<16x128xf32>
    %38 = arith.subf %34, %37 : vector<16x128xf32>
    %39 = math.exp %38 : vector<16x128xf32>
    %cst_25 = arith.constant 0.000000e+00 : f32
    %40 = vector.broadcast %cst_25 : f32 to vector<16x128xf32>
    %41 = arith.select %32, %39, %40 : vector<16x128xi1>, vector<16x128xf32>
    %cst_26 = arith.constant dense<0.000000e+00> : vector<16xf32>
    %42 = vector.multi_reduction <add>, %41, %cst_26 [1] : vector<16x128xf32> to vector<16xf32>
    %43 = vector.shape_cast %42 : vector<16xf32> to vector<16x1xf32>
    %44 = vector.broadcast %43 : vector<16x1xf32> to vector<16x128xf32>
    %45 = arith.divf %41, %44 : vector<16x128xf32>
    %c11_i32_27 = arith.constant 11 : i32
    %46 = vector.broadcast %c11_i32_27 : i32 to vector<16x128xi32>
    %47 = arith.cmpi eq, %30, %46 : vector<16x128xi32>
    %48 = arith.select %47, %29, %45 : vector<16x128xi1>, vector<16x128xf32>
    %c0_28 = arith.constant 0 : index
    %c0_29 = arith.constant 0 : index
    %49 = vector.load %arg10[%c0_28, %c0_29] : memref<16x128xf32, #tpu.memory_space<vmem>>, vector<16x128xf32>
    tpu.vector_store %arg10[%c0_28, %c0_29], %48 {strides = array<i32>} : memref<16x128xf32, #tpu.memory_space<vmem>>, vector<16x128xf32>,
    return
  }
  func.func @transform_0(%arg0: i32) -> (i32, i32) {
    %c0_i32 = arith.constant 0 : i32
    %c0_i32_0 = arith.constant 0 : i32
    return %arg0, %c0_i32 : i32, i32
  }
  func.func @transform_1(%arg0: i32) -> (i32, i32) {
    %c0_i32 = arith.constant 0 : i32
    %c0_i32_0 = arith.constant 0 : i32
    %c0_i32_1 = arith.constant 0 : i32
    return %c0_i32, %c0_i32_0 : i32, i32
  }
  func.func @transform_2(%arg0: i32) -> (i32, i32) {
    %c0_i32 = arith.constant 0 : i32
    %c0_i32_0 = arith.constant 0 : i32
    %c0_i32_1 = arith.constant 0 : i32
    return %c0_i32, %c0_i32_0 : i32, i32
  }
  func.func @transform_3(%arg0: i32) -> (i32, i32) {
    %c0_i32 = arith.constant 0 : i32
    %c0_i32_0 = arith.constant 0 : i32
    %c0_i32_1 = arith.constant 0 : i32
    return %c0_i32, %c0_i32_0 : i32, i32
  }
  func.func @transform_4(%arg0: i32) -> (i32, i32) {
    %c0_i32 = arith.constant 0 : i32
    %c0_i32_0 = arith.constant 0 : i32
    %c0_i32_1 = arith.constant 0 : i32
    return %c0_i32, %c0_i32_0 : i32, i32
  }
  func.func @transform_5(%arg0: i32) -> (i32, i32) {
    %c0_i32 = arith.constant 0 : i32
    %c0_i32_0 = arith.constant 0 : i32
    %c0_i32_1 = arith.constant 0 : i32
    return %c0_i32, %c0_i32_0 : i32, i32
  }
  func.func @transform_6(%arg0: i32) -> (i32, i32) {
    %c0_i32 = arith.constant 0 : i32
    %c0_i32_0 = arith.constant 0 : i32
    %c0_i32_1 = arith.constant 0 : i32
    return %c0_i32, %c0_i32_0 : i32, i32
  }
  func.func @transform_7(%arg0: i32) -> (i32, i32) {
    %c0_i32 = arith.constant 0 : i32
    %c0_i32_0 = arith.constant 0 : i32
    %c0_i32_1 = arith.constant 0 : i32
    return %c0_i32, %c0_i32_0 : i32, i32
  }
  func.func @transform_8(%arg0: i32) -> (i32, i32) {
    %c0_i32 = arith.constant 0 : i32
    %c0_i32_0 = arith.constant 0 : i32
    %c0_i32_1 = arith.constant 0 : i32
    return %c0_i32, %c0_i32_0 : i32, i32
  }
  func.func @transform_9(%arg0: i32) -> (i32, i32) {
    %c0_i32 = arith.constant 0 : i32
    %c0_i32_0 = arith.constant 0 : i32
    return %arg0, %c0_i32 : i32, i32
  }
}

</mosaic_0001>

<bundles_post_ra>
// kernel: tpu_custom_call.1
= control target key start
LH: loop header
LB: loop body
LE: loop exit
PB: predicated region body
PF: predicated region fallthrough
CT: control target
= control target key end

     0   :  { %s4560_s0 = inlined_call_operand.hbm [shape: bf16[20,24], index: 0, kind: input, shape index: {}]   ;;  %s4561_s1 = inlined_call_operand.hbm [shape: bf16[24,512], index: 1, kind: input, shape index: {}]   ;;  %s4562_s2 = inlined_call_operand.hbm [shape: bf16[1,512], index: 2, kind: input, shape index: {}]   ;;  %s4563_s3 = inlined_call_operand.hbm [shape: bf16[512,512], index: 3, kind: input, shape index: {}]   ;;  %s4564_s4 = inlined_call_operand.hbm [shape: bf16[1,512], index: 4, kind: input, shape index: {}]   ;;  %s4565_s5 = inlined_call_operand.hbm [shape: bf16[512,256], index: 5, kind: input, shape index: {}]   ;;  %s4566_s6 = inlined_call_operand.vmem [shape: bf16[1,256], index: 6, kind: input, shape index: {}]   ;;  %s4567_s7 = inlined_call_operand.hbm [shape: bf16[256,128], index: 7, kind: input, shape index: {}]   ;;  %s4568_s8 = inlined_call_operand.vmem [shape: f32[1,128], index: 8, kind: input, shape index: {}]   ;;  %s4569_s9 = inlined_call_operand.hbm [shape: f32[20,128], index: 9, kind: output, shape index: {}]  }
   0x1   :  { %4577 = sst [smem:[#allocation24_spill]] %s4561_s1 }
   0x2   :  { %4578 = sst [smem:[#allocation25_spill]] %s4563_s3 }
   0x3   :  { %4579 = sst [smem:[#allocation26_spill]] %s4565_s5 }
   0x4   :  { %4580 = sst [smem:[#allocation27_spill]] %s4569_s9 }
   0x5   :  { %14 = vsyncpa [#allocation3], 0 }
   0x6   :  { %16 = vsyncpa [#allocation3 + $0x1], 0 }
   0x7   :  { %17 = vsyncpa [#allocation6], 0 }
   0x8   :  { %18 = vsyncpa [#allocation9], 0 }
   0x9   :  { %19 = vsyncpa [#allocation12], 0 }
   0xa   :  { %20 = vsyncpa [#allocation4], 0 }
   0xb   :  { %22 = vsyncpa [#allocation4 + $0x1], 0  ;;  %s4210_s30 = smov 0   ;;  %s4212_s10 = smov 0  }
   0xc   :  { %s4214_s11 = smov 0   ;;  %s4216_s12 = smov 0  }
   0xd LB: > { %4581 = sst [smem:[#allocation20_spill]] %s4128_s30  ;;  %s4231_s13 = sadd.s32 4294967295, %s4140_s12   ;;  %s4140_s12 = sphi %s4216_s12, %s4607_s12   ;;  %s4136_s11 = sphi %s4214_s11, %s4611_s11   ;;  %s4132_s10 = sphi %s4212_s10, %s4610_s10   ;;  %s4128_s30 = sphi %s4210_s30, %s4609_s30  }
   0xe   : > { %s2608_s14 = sadd.s32 4294967294, %s4140_s12   ;;  %s4235_s15 = sadd.s32 1, %s4140_s12  }
   0xf   : > { %4582 = sst [smem:[#allocation21_spill]] %s4235_s15  ;;  %s35_s16 = sadd.s32 1, %s4136_s11 }
  0x10   : > { %s32_s17 = ssub.s32 %s4140_s12, %s4235_s15  ;;  %p42_p0 = scmp.ne.s32.totalorder %s4136_s11, %s4132_s10 }
  0x11   : > { %p33_p1 = scmp.eq.s32.totalorder %s32_s17, 0  ;;  %p43_p2 = scmp.eq.s32.totalorder %s4140_s12, 0 }
  0x12   : > { %p48_p3 = scmp.ne.s32.totalorder %s4132_s10, %s4128_s30  ;;  %p4576_p4 = scmp.eq.s32.totalorder %s4231_s13, 0 }
  0x13   : > { %s4247_s18 = scalar_select %p33_p1, %s4136_s11, %s35_s16  }
  0x14   : > { %p4249_p5 = por %p43_p2, %p42_p0  ;;  %p4255_p6 = por %p4576_p4, %p48_p3 }
  0x15   : > { %4583 = sst [smem:[#allocation22_spill]] %s4247_s18  ;;  %p240_p7 = scmp.eq.s32.totalorder %s4231_s13, 1 }
  0x16   : > { %p246_p8 = scmp.eq.s32.totalorder %s2608_s14, 1  ;;  %p2609_p9 = scmp.ge.s32.totalorder %s4140_s12, 1 }
  0x17   : > { %p253_p10 = scmp.lt.s32.totalorder %s4140_s12, 3  ;;  %p4262_p11 = por %p240_p7, %p42_p0 }
  0x18   : > { %p4266_p12 = por %p246_p8, %p48_p3  ;;  %s4590_s1 = sld [smem:[#allocation24_spill]] }
  0x19   : > { %p4270_p13 = pnand %p2609_p9, %p253_p10  ;;  %s4142_s27 = smov [#allocation5]  }
  0x1a   : > { %s4587_s22 = scalar_select %p4266_p12, 1, 0 }
  0x1b   : > { %p3739_p1 = pneg %p4270_p13  ;;  %s266_s28 = sshll.u32 %s4142_s27, 4  ;;  %s267_s28 = int_to_ptr.vmem [resolvable:$true] %s266_s28 }
  0x1c   : > { %4588 = sst [smem:[#allocation23_spill]] %s4587_s22  ;;  %s4143_s24 = smov 256  }
  0x1d   : > { %p4281_p0 = pnand %p3739_p1, %p4576_p4  ;;  %s4592_s3 = sld [smem:[#allocation25_spill]] }
  0x1e   : > { %s264_s26 = sshll.u32 %s4590_s1, 4  ;;  %s4144_s25 = smov 16   ;;  %s265_s26 = int_to_ptr.hbm [resolvable:$true] %s264_s26 }
  0x1f   : > { %3742 = dma.hbm_to_vmem [thread:$0]  (!%p4281_p0), %s265_s26, 768, %s267_s28, [#allocation6], %s4143_s24, %s4143_s24, %s4144_s25  }
  0x20   : > { %s4593_s5 = sld [smem:[#allocation26_spill]]  ;;  %s4145_s15 = smov [#allocation8]  }
  0x21   : > { %s292_s22 = sshll.u32 %s4145_s15, 4  ;;  %s4146_s14 = smov [#allocation11]   ;;  %s293_s22 = int_to_ptr.vmem [resolvable:$true] %s292_s22 }
  0x22   : > { %s318_s16 = sshll.u32 %s4146_s14, 4  ;;  %s4148_s30 = smov 8   ;;  %s319_s16 = int_to_ptr.vmem [resolvable:$true] %s318_s16 }
  0x23   : > { %s290_s17 = sshll.u32 %s4592_s3, 4  ;;  %s4147_s3 = smov 128   ;;  %s291_s17 = int_to_ptr.hbm [resolvable:$true] %s290_s17 }
  0x24   : > { %3748 = dma.hbm_to_vmem [thread:$0]  (!%p4281_p0), %s291_s17, 16384, %s293_s22, [#allocation9], %s4143_s24, %s4143_s24, %s4144_s25  }
  0x25   : > { %s279_s1 = sshll.u32 %s4562_s2, 4  ;;  %s4149_s27 = smov [#allocation7]   ;;  %s280_s1 = int_to_ptr.hbm [resolvable:$true] %s279_s1 }
  0x26   : > { %s316_s18 = sshll.u32 %s4593_s5, 4  ;;  %s281_s15 = sshll.u32 %s4149_s27, 4  ;;  %s317_s18 = int_to_ptr.hbm [resolvable:$true] %s316_s18  ;;  %s282_s15 = int_to_ptr.vmem [resolvable:$true] %s281_s15 }
  0x27   : > { %3754 = dma.hbm_to_vmem [thread:$0]  (!%p4281_p0), %s317_s18, 8192, %s319_s16, [#allocation12], %s4147_s3, %s4147_s3, %s4148_s30  }
  0x28   : > { %s305_s22 = sshll.u32 %s4564_s4, 4  ;;  %s4150_s17 = smov [#allocation10]   ;;  %s306_s22 = int_to_ptr.hbm [resolvable:$true] %s305_s22 }
  0x29   : > { %3745 = dma.hbm_to_vmem [thread:$0]  (!%p4281_p0), %s280_s1, 64, %s282_s15, [#allocation6]  }
  0x2a   : > { %s307_s24 = sshll.u32 %s4150_s17, 4  ;;  %s333_s30 = sshll.u32 %s4567_s7, 4  ;;  %s308_s24 = int_to_ptr.vmem [resolvable:$true] %s307_s24  ;;  %s334_s30 = int_to_ptr.hbm [resolvable:$true] %s333_s30 }
  0x2b   : > { %3751 = dma.hbm_to_vmem [thread:$0]  (!%p4281_p0), %s306_s22, 64, %s308_s24, [#allocation9]  }
  0x2c   : > { %s4151_s18 = smov [#allocation13]   ;;  %s4152_s16 = smov 64  }
  0x2d   : > { %s335_s14 = sshll.u32 %s4151_s18, 4  ;;  %s4153_s26 = smov 4   ;;  %s336_s14 = int_to_ptr.vmem [resolvable:$true] %s335_s14 }
  0x2e   : > { %3757 = dma.hbm_to_vmem [thread:$0]  (!%p4281_p0), %s334_s30, 2048, %s336_s14, [#allocation12], %s4152_s16, %s4152_s16, %s4153_s26  }
  0x2f   : > { %p4575_p2 = scmp.ge.s32.totalorder %s4140_s12, 2 }
  0x31   : > { %348 = sbr.rel (%p4575_p2) target bundleno = 90 (0x5a), region = 48 }
  0x36   : > { %351 = sbr.rel (!%p4249_p5) target bundleno = 90 (0x5a), region = 52  ;;  %s352_s5 = sand.u32 (%p4249_p5), 1, %s4136_s11  }
  0x37   : > { %s2618_s9 = sshll.u32 (%p4249_p5), %s4140_s12, 1  ;;  %s2617_s28 = sshll.u32 (%p4249_p5), %s352_s5, 3 }
  0x38   : > { %s358_s1 = ssub.s32 (%p4249_p5), 3, %s2618_s9  ;;  %s4322_s22 = scalar_lea.sflag (%p4249_p5), [#allocation3], %s352_s5 }
  0x39   : > { %p359_p3 = scmp.lt.s32.totalorder (%p4249_p5), %s358_s1, 2  ;;  %s356_s17 = scalar_lea.vmem (%p4249_p5), [#allocation2], %s2617_s28 }
  0x3b   : > { %s4613_s1 = smov (!%p359_p3, %s358_s1), 2 }
  0x3c   : > { %s2619_s29 = sshll.u32 %s4613_s1, 2 }
  0x3d   : > { %s362_s27 = ssub.s32 8, %s2619_s29 }
  0x3e   : > { %s363_s15 = sshll.u32 %s362_s27, 4 }
  0x3f   : > { %364 = vsyncadd %s4322_s22, %s363_s15  ;;  %p4325_p5 = scmp.ne.s32.totalorder %s2619_s29, 0  ;;  %s3498_s24 = sshll.u32 %s4140_s12, 3 }
  0x40   : > { %s367_s30 = scalar_lea.hbm %s4560_s0, %s3498_s24  ;;  %s4333_s18 = sshll.u32 %s356_s17, 4  ;;  %s372_s18 = int_to_ptr.vmem [resolvable:$true] %s4333_s18 }
  0x41   : > { %s369_s14 = sshll.u32 %s367_s30, 4  ;;  %s2623_s16 = sshll.u32 %s4613_s1, 6  ;;  %s4336_s14 = int_to_ptr.hbm [resolvable:$true] %s369_s14 }
  0x42   : > { %s4012_s26 = sshra.s32 %s4336_s14, 4  ;;  %s4014_s5 = sshrl.u32 %s2623_s16, 4  ;;  %s4013_s26 = int_to_ptr.hbm [resolvable:$true] %s4012_s26 }
  0x43   : > { %s4019_s9 = scalar_lea.hbm %s4013_s26, %s4014_s5  ;;  %s4023_s27 = scalar_lea.hbm %s4560_s0, 12 }
  0x44   : > { %p4020_p7 = scmp.ne.s32.totalorder %s4013_s26, %s4019_s9  ;;  %p4024_p10 = scmp.lt.s32.totalorder %s4013_s26, %s4560_s0 }
  0x45   : > { %p4025_p1 = scmp.lt.s32.totalorder %s4023_s27, %s4019_s9 }
  0x46   : > { %p4021_p8 = pnand %p4020_p7, %p4325_p5 }
  0x47   : > { %p4026_p0 = por %p4025_p1, %p4024_p10 }
  0x48   : > { %p4022_p9 = pneg %p4021_p8 }
  0x4a   : > { %p4027_p3 = pnand %p4026_p0, %p4022_p9 }
  0x4c   : > { %4030 = shalt.err (!%p4027_p3)
}
  0x4d   : > { %s4031_s24 = sshra.s32 %s372_s18, 4  ;;  %s4154_s3 = smov [#allocation2]   ;;  %s4032_s24 = int_to_ptr.vmem [resolvable:$true] %s4031_s24 }
  0x4e   : > { %s4038_s25 = scalar_lea.vmem %s4032_s24, %s4014_s5  ;;  %s4042_s30 = scalar_lea.vmem %s4154_s3, 16 }
  0x4f   : > { %p4039_p7 = scmp.ne.s32.totalorder %s4032_s24, %s4038_s25  ;;  %p4044_p4 = scmp.lt.s32.totalorder %s4042_s30, %s4038_s25 }
  0x51   : > { %p4040_p8 = pnand %p4039_p7, %p4325_p5 }
  0x53   : > { %p4041_p2 = pneg %p4040_p8 }
  0x55   : > { %p4046_p12 = pnand %p4044_p4, %p4041_p2 }
  0x57   : > { %4049 = shalt.err (!%p4046_p12)
}
  0x58   : > { %s4155_s26 = smov 64   ;;  %s4156_s9 = smov 4  }
  0x59   : > { %377 = dma.hbm_to_vmem [thread:$0]  (%p4325_p5), %s4336_s14, %s2623_s16, %s372_s18, %s4322_s22, %s4155_s26, %s4155_s26, %s4156_s9  }
  0x5a PF: > { %383 = sbr.rel (%p4270_p13) target bundleno = 1110 (0x456), region = 56  ;;  %s4365_s5 = sand.u32 (!%p4270_p13), 1, %s4132_s10  }
  0x5b   : > { %s2625_s28 = sshll.u32 (!%p4270_p13), %s4365_s5, 3  ;;  %s386_s29 = scalar_lea.sflag (!%p4270_p13), [#allocation3], %s4365_s5 }
  0x5c   : > { %s4369_s27 = scalar_lea.vmem (!%p4270_p13), [#allocation2], %s2625_s28 }
  0x5f   : > { %4107 = dma.done.wait (%p4255_p6), %s386_s29, 128  }
  0x60   : > { %4109 = vsyncadd (%p4255_p6), %s386_s29, 4294967168  ;;  %p4595_p4 = scmp.eq.s32.totalorder %s4231_s13, 0 }
  0x62   : > { %4111 = dma.done.wait (%p4595_p4), [#allocation6], 832   ;;  %p4596_p12 = pmov %p4595_p4 }
  0x63   : > { %p4597_p13 = pmov %p4595_p4 }
  0x64   : > { %4113 = vsyncadd (%p4596_p12), [#allocation6], 4294966464 }
  0x65   : > { %4115 = dma.done.wait (%p4597_p13), [#allocation9], 16448   ;;  %p4598_p2 = pmov %p4595_p4 }
  0x67   : > { %4117 = vsyncadd (%p4598_p2), [#allocation9], 4294950848  ;;  %p4599_p5 = pmov %p4598_p2 }
  0x68   : > { %p4600_p9 = pmov %p4598_p2 }
  0x69   : > { %4119 = dma.done.wait (%p4599_p5), [#allocation12], 10240  }
  0x6a   : > { %4121 = vsyncadd (%p4600_p9), [#allocation12], 4294957056  ;;  %v472_v0 = vld [vmem:[#allocation5 + $0x20] sm:$0xff]  ;;  %v3502_v4 = vld [vmem:[#allocation5 + $0xc] sm:$0xf0]  ;;  %vm513_vm0 = vcmask 1043456  }
  0x6b   : > { %v493_v1 = vunpack.c.l.b16 %v472_v0  ;;  %v494_v2 = vunpack.c.h.b16 %v472_v0  ;;  %v2639_v3 = vld [vmem:[#allocation5] sm:$0xf]  ;;  %v473_v5 = vld [vmem:[#allocation5 + $0x28] sm:$0xff]  ;;  %v3500_v8 = vld [vmem:[#allocation5 + $0x4] sm:$0xf]  ;;  %vm509_vm1 = vcmask 195584  }
  0x6c   : > { %v2641_v9 = vld [vmem:[#allocation5 + $0x10] sm:$0xf0]  ;;  %v495_v10 = vunpack.c.l.b16 %v473_v5  ;;  %v496_v11 = vunpack.c.h.b16 %v473_v5  ;;  %v2640_v13 = vor.u32 %v3502_v4, %v2639_v3  ;;  %v3534_v14 = vld [vmem:[#allocation8 + $0xec] sm:$0xf0]  ;;  %v2647_v29 = vld [vmem:[#allocation5 + $0x8] sm:$0xf] }
  0x6d   : > { %v501_v6 = vpack.c.b16 %v493_v1, %v493_v1  ;;  %v502_v7 = vpack.c.b16 %v494_v2, %v494_v2  ;;  %v2771_v12 = vld [vmem:[#allocation8 + $0xe0] sm:$0xf]  ;;  %v3566_v16 = vld [vmem:[#allocation8 + $0x1ec] sm:$0xf0]  ;;  %v2644_v23 = vor.u32 %v3500_v8, %v2641_v9  ;;  %v3503_v30 = vld [vmem:[#allocation5 + $0x14] sm:$0xf0] }
  0x6e   : > { %v2899_v15 = vld [vmem:[#allocation8 + $0x1e0] sm:$0xf]  ;;  %v503_v19 = vpack.c.b16 %v495_v10, %v495_v10  ;;  %v504_v20 = vpack.c.b16 %v496_v11, %v496_v11  ;;  %v3530_v22 = vld [vmem:[#allocation8 + $0xcc] sm:$0xf0]  ;;  %v2772_v24 = vor.u32 %v3534_v14, %v2771_v12  ;;  %v3501_v31 = vld [vmem:[#allocation5 + $0xc] sm:$0xf]  ;;  %v2648_v41 = vor.u32 %v3503_v30, %v2647_v29 }
  0x6f   : > { %v515_v17 = vsel %vm513_vm0, %v501_v6, 0  ;;  %v518_v18 = vsel %vm513_vm0, %v502_v7, 0  ;;  %v2755_v21 = vld [vmem:[#allocation8 + $0xc0] sm:$0xf]  ;;  %v2900_v25 = vor.u32 %v3566_v16, %v2899_v15  ;;  %v3562_v27 = vld [vmem:[#allocation8 + $0x1cc] sm:$0xf0] }
  0x70   : > { %532 = vmatpush.bf16.msra.mxu2 %v515_v17  ;;  %546 = vmatpush.bf16.msra.mxu3 %v518_v18  ;;  %v2883_v26 = vld [vmem:[#allocation8 + $0x1c0] sm:$0xf]  ;;  %v521_v32 = vsel %vm513_vm0, %v503_v19, 0  ;;  %v524_v33 = vsel %vm513_vm0, %v504_v20, 0  ;;  %v2649_v34 = vld [vmem:[#allocation5 + $0x18] sm:$0xf0]  ;;  %v2756_v35 = vor.u32 %v3530_v22, %v2755_v21 }
  0x71   : > { %v4390_v28 = vld [vmem:[%s4369_s27] sm:$0xff]  ;;  %1417 = vmatpush.bf16.msra.mxu0 %v2772_v24  ;;  %1431 = vmatpush.bf16.msra.mxu1 %v2900_v25  ;;  %v2884_v36 = vor.u32 %v3562_v27, %v2883_v26  ;;  %v3526_v38 = vld [vmem:[#allocation8 + $0xac] sm:$0xf0]  ;;  %v2652_v42 = vor.u32 %v3501_v31, %v2649_v34  ;;  %s2632_s19 = sshll.u32 %s4365_s5, 4  ;;  %s2456_s14 = scalar_lea.sflag [#allocation4], %s4365_s5 }
  0x72   : > { %v2739_v37 = vld [vmem:[#allocation8 + $0xa0] sm:$0xf]  ;;  %v3558_v40 = vld [vmem:[#allocation8 + $0x1ac] sm:$0xf0]  ;;  %s454_s18 = scalar_lea.vmem [#allocation14], %s2632_s19  ;;  %s3490_s16 = sshll.u32 (%p4262_p11), %s4231_s13, 1 }
  0x73   : > { %v2867_v39 = vld [vmem:[#allocation8 + $0x1a0] sm:$0xf]  ;;  %v3598_v44 = vld [vmem:[#allocation8 + $0x2ec] sm:$0xf0]  ;;  %v2740_v46 = vor.u32 %v3526_v38, %v2739_v37  ;;  %v3532_v38 = vld [vmem:[#allocation8 + $0xe4] sm:$0xf] }
  0x74   : > { %533 = vmatpush.bf16.msra.mxu2 %v2640_v13  ;;  %547 = vmatpush.bf16.msra.mxu3 %v2644_v23  ;;  %v3027_v43 = vld [vmem:[#allocation8 + $0x2e0] sm:$0xf]  ;;  %v2868_v47 = vor.u32 %v3558_v40, %v2867_v39  ;;  %v3522_v49 = vld [vmem:[#allocation8 + $0x8c] sm:$0xf0]  ;;  %v2773_v39 = vld [vmem:[#allocation8 + $0xf0] sm:$0xf0] }
  0x75   : > { %v3155_v45 = vld [vmem:[#allocation8 + $0x3e0] sm:$0xf]  ;;  %1418 = vmatpush.bf16.msra.mxu0 %v2756_v35  ;;  %1432 = vmatpush.bf16.msra.mxu1 %v2884_v36  ;;  %v3630_v50 = vld [vmem:[#allocation8 + $0x3ec] sm:$0xf0]  ;;  %v3028_v53 = vor.u32 %v3598_v44, %v3027_v43  ;;  %v3564_v40 = vld [vmem:[#allocation8 + $0x1e4] sm:$0xf] }
  0x76   : > { %v2723_v48 = vld [vmem:[#allocation8 + $0x80] sm:$0xf]  ;;  %v3554_v52 = vld [vmem:[#allocation8 + $0x18c] sm:$0xf0]  ;;  %v3156_v54 = vor.u32 %v3630_v50, %v3155_v45  ;;  %v2776_v50 = vor.u32 %v3532_v38, %v2773_v39  ;;  %v3592_v38 = vld [vmem:[#allocation8 + $0x2c4] sm:$0xf] }
  0x77   : > { %2653 = vmatmul.msk.bf16.vlgmr.msra.gmra.mxu2 %vm509_vm1, %v4390_v28  ;;  %2654 = vmatmul.msk.bf16.vlgmr.msra.gmra.mxu3 %vm509_vm1, %v4390_v28  ;;  %v2851_v51 = vld [vmem:[#allocation8 + $0x180] sm:$0xf]  ;;  %v3594_v56 = vld [vmem:[#allocation8 + $0x2cc] sm:$0xf0]  ;;  %v2724_v59 = vor.u32 %v3522_v49, %v2723_v48  ;;  %v3013_v39 = vld [vmem:[#allocation8 + $0x2d0] sm:$0xf0] }
  0x78   : > { %560 = vmatpush.bf16.msrb.mxu2 %v521_v32  ;;  %574 = vmatpush.bf16.msrb.mxu3 %v524_v33  ;;  %v3011_v55 = vld [vmem:[#allocation8 + $0x2c0] sm:$0xf]  ;;  %v3626_v58 = vld [vmem:[#allocation8 + $0x3cc] sm:$0xf0]  ;;  %v2852_v60 = vor.u32 %v3554_v52, %v2851_v51  ;;  %v2757_v52 = vld [vmem:[#allocation8 + $0xd0] sm:$0xf0] }
  0x79   : > { %v3139_v57 = vld [vmem:[#allocation8 + $0x3c0] sm:$0xf]  ;;  %1419 = vmatpush.bf16.msra.mxu0 %v2740_v46  ;;  %1433 = vmatpush.bf16.msra.mxu1 %v2868_v47  ;;  %v3518_v62 = vld [vmem:[#allocation8 + $0x6c] sm:$0xf0]  ;;  %v3012_v1 = vor.u32 %v3594_v56, %v3011_v55  ;;  %s2464_s15 = ssub.s32 (%p4262_p11), 3, %s3490_s16 }
  0x7a   : > { %v2707_v61 = vld [vmem:[#allocation8 + $0x60] sm:$0xf]  ;;  %v3550_v0 = vld [vmem:[#allocation8 + $0x16c] sm:$0xf0]  ;;  %v3140_v2 = vor.u32 %v3626_v58, %v3139_v57  ;;  %p2465_p6 = scmp.lt.s32.totalorder (%p4262_p11), %s2464_s15, 2 }
  0x7b   : > { %v2835_v63 = vld [vmem:[#allocation8 + $0x160] sm:$0xf]  ;;  %v3590_v4 = vld [vmem:[#allocation8 + $0x2ac] sm:$0xf0]  ;;  %v2708_v7 = vor.u32 %v3518_v62, %v2707_v61  ;;  %v3556_v61 = vld [vmem:[#allocation8 + $0x1a4] sm:$0xf] }
  0x7c   : > { %561 = vmatpush.bf16.msrb.mxu2 %v2648_v41  ;;  %575 = vmatpush.bf16.msrb.mxu3 %v2652_v42  ;;  %v2995_v3 = vld [vmem:[#allocation8 + $0x2a0] sm:$0xf]  ;;  %v3622_v6 = vld [vmem:[#allocation8 + $0x3ac] sm:$0xf0]  ;;  %v2836_v8 = vor.u32 %v3550_v0, %v2835_v63  ;;  %v2901_v41 = vld [vmem:[#allocation8 + $0x1f0] sm:$0xf0] }
  0x7d   : > { %v3123_v5 = vld [vmem:[#allocation8 + $0x3a0] sm:$0xf]  ;;  %1420 = vmatpush.bf16.msra.mxu0 %v2724_v59  ;;  %1434 = vmatpush.bf16.msra.mxu1 %v2852_v60  ;;  %v3514_v10 = vld [vmem:[#allocation8 + $0x4c] sm:$0xf0]  ;;  %v2996_v13 = vor.u32 %v3590_v4, %v2995_v3  ;;  %v2904_v51 = vor.u32 %v3564_v40, %v2901_v41  ;;  %v3524_v59 = vld [vmem:[#allocation8 + $0xa4] sm:$0xf]  ;;  %v3016_v41 = vor.u32 %v3592_v38, %v3013_v39 }
  0x7e   : > { %v2691_v9 = vld [vmem:[#allocation8 + $0x40] sm:$0xf]  ;;  %v3546_v12 = vld [vmem:[#allocation8 + $0x14c] sm:$0xf0]  ;;  %v3124_v14 = vor.u32 %v3622_v6, %v3123_v5  ;;  %v2741_v60 = vld [vmem:[#allocation8 + $0xb0] sm:$0xf0] }
  0x7f   : > { %v2819_v11 = vld [vmem:[#allocation8 + $0x140] sm:$0xf]  ;;  %v3586_v16 = vld [vmem:[#allocation8 + $0x28c] sm:$0xf0]  ;;  %v2692_v19 = vor.u32 %v3514_v10, %v2691_v9  ;;  %v2869_v62 = vld [vmem:[#allocation8 + $0x1b0] sm:$0xf0]  ;;  %v2744_v63 = vor.u32 %v3524_v59, %v2741_v60 }
  0x80   : > { %1445 = vmatpush.bf16.msra.mxu2 %v3028_v53  ;;  %1459 = vmatpush.bf16.msra.mxu3 %v3156_v54  ;;  %v2979_v15 = vld [vmem:[#allocation8 + $0x280] sm:$0xf]  ;;  %v3618_v18 = vld [vmem:[#allocation8 + $0x38c] sm:$0xf0]  ;;  %v2820_v20 = vor.u32 %v3546_v12, %v2819_v11  ;;  %v3560_v53 = vld [vmem:[#allocation8 + $0x1c4] sm:$0xf]  ;;  %v2872_v0 = vor.u32 %v3556_v61, %v2869_v62 }
  0x81   : > { %v3107_v17 = vld [vmem:[#allocation8 + $0x380] sm:$0xf]  ;;  %1421 = vmatpush.bf16.msra.mxu0 %v2708_v7  ;;  %1435 = vmatpush.bf16.msra.mxu1 %v2836_v8  ;;  %v3510_v22 = vld [vmem:[#allocation8 + $0x2c] sm:$0xf0]  ;;  %v2980_v25 = vor.u32 %v3586_v16, %v2979_v15  ;;  %v2885_v54 = vld [vmem:[#allocation8 + $0x1d0] sm:$0xf0] }
  0x82   : > { %v2675_v21 = vld [vmem:[#allocation8 + $0x20] sm:$0xf]  ;;  %v3542_v24 = vld [vmem:[#allocation8 + $0x12c] sm:$0xf0]  ;;  %v3108_v26 = vor.u32 %v3618_v18, %v3107_v17  ;;  %v2888_v58 = vor.u32 %v3560_v53, %v2885_v54  ;;  %v3520_v8 = vld [vmem:[#allocation8 + $0x84] sm:$0xf] }
  0x83   : > { %v2803_v23 = vld [vmem:[#allocation8 + $0x120] sm:$0xf]  ;;  %v3582_v29 = vld [vmem:[#allocation8 + $0x26c] sm:$0xf0]  ;;  %v2676_v32 = vor.u32 %v3510_v22, %v2675_v21  ;;  %v2725_v9 = vld [vmem:[#allocation8 + $0x90] sm:$0xf0] }
  0x84   : > { %1446 = vmatpush.bf16.msra.mxu2 %v3012_v1  ;;  %1460 = vmatpush.bf16.msra.mxu3 %v3140_v2  ;;  %v2963_v27 = vld [vmem:[#allocation8 + $0x260] sm:$0xf]  ;;  %v3614_v31 = vld [vmem:[#allocation8 + $0x36c] sm:$0xf0]  ;;  %v2804_v33 = vor.u32 %v3542_v24, %v2803_v23  ;;  %v586_v1 = vld [vmem:[#allocation7] sm:$0xf]  ;;  %v2728_v11 = vor.u32 %v3520_v8, %v2725_v9 }
  0x85   : > { %v3091_v30 = vld [vmem:[#allocation8 + $0x360] sm:$0xf]  ;;  %1422 = vmatpush.bf16.msra.mxu0 %v2692_v19  ;;  %1436 = vmatpush.bf16.msra.mxu1 %v2820_v20  ;;  %v3506_v35 = vld [vmem:[#allocation8 + $0xc] sm:$0xf0]  ;;  %v2964_v42 = vor.u32 %v3582_v29, %v2963_v27  ;;  %588 = vst [vmem:[#allocation1] ss:$9 sm:$0xff] %v586_v1 }
  0x86   : > { %v2659_v34 = vld [vmem:[#allocation8] sm:$0xf]  ;;  %v3538_v37 = vld [vmem:[#allocation8 + $0x10c] sm:$0xf0]  ;;  %v3092_v43 = vor.u32 %v3614_v31, %v3091_v30  ;;  %v3552_v10 = vld [vmem:[#allocation8 + $0x184] sm:$0xf] }
  0x87   : > { %v2787_v36 = vld [vmem:[#allocation8 + $0x100] sm:$0xf]  ;;  %2655 = vmatmul.msk.bf16.vlgmr.msrb.gmra.mxu2 %vm509_vm1, %v4390_v28  ;;  %2656 = vmatmul.msk.bf16.vlgmr.msrb.gmra.mxu3 %vm509_vm1, %v4390_v28  ;;  %v3578_v45 = vld [vmem:[#allocation8 + $0x24c] sm:$0xf0]  ;;  %v2660_v48 = vor.u32 %v3506_v35, %v2659_v34  ;;  %v3528_v28 = vld [vmem:[#allocation8 + $0xc4] sm:$0xf] }
  0x88   : > { %1447 = vmatpush.bf16.msra.mxu2 %v2996_v13  ;;  %1461 = vmatpush.bf16.msra.mxu3 %v3124_v14  ;;  %v2947_v44 = vld [vmem:[#allocation8 + $0x240] sm:$0xf]  ;;  %v3610_v47 = vld [vmem:[#allocation8 + $0x34c] sm:$0xf0]  ;;  %v2788_v49 = vor.u32 %v3538_v37, %v2787_v36  ;;  %v2760_v57 = vor.u32 %v3528_v28, %v2757_v52  ;;  %v2853_v12 = vld [vmem:[#allocation8 + $0x190] sm:$0xf0] }
  0x89   : > { %v3075_v46 = vld [vmem:[#allocation8 + $0x340] sm:$0xf]  ;;  %1423 = vmatpush.bf16.msra.mxu0 %v2676_v32  ;;  %1437 = vmatpush.bf16.msra.mxu1 %v2804_v33  ;;  %v2948_v55 = vor.u32 %v3578_v45, %v2947_v44  ;;  %v3574_v3 = vld [vmem:[#allocation8 + $0x22c] sm:$0xf0]  ;;  %v2856_v13 = vor.u32 %v3552_v10, %v2853_v12  ;;  %v3516_v19 = vld [vmem:[#allocation8 + $0x64] sm:$0xf] }
  0x8a   : > { %v3076_v56 = vor.u32 %v3610_v47, %v3075_v46  ;;  %v2931_v2 = vld [vmem:[#allocation8 + $0x220] sm:$0xf]  ;;  %v3606_v5 = vld [vmem:[#allocation8 + $0x32c] sm:$0xf0]  ;;  %v2709_v20 = vld [vmem:[#allocation8 + $0x70] sm:$0xf0] }
  0x8b   : > { %v3059_v4 = vld [vmem:[#allocation8 + $0x320] sm:$0xf]  ;;  %v2932_v6 = vor.u32 %v3574_v3, %v2931_v2  ;;  %v3570_v15 = vld [vmem:[#allocation8 + $0x20c] sm:$0xf0]  ;;  %v2712_v22 = vor.u32 %v3516_v19, %v2709_v20  ;;  %v3548_v23 = vld [vmem:[#allocation8 + $0x164] sm:$0xf] }
  0x8c   : > { %1448 = vmatpush.bf16.msra.mxu2 %v2980_v25  ;;  %1462 = vmatpush.bf16.msra.mxu3 %v3108_v26  ;;  %v3060_v7 = vor.u32 %v3606_v5, %v3059_v4  ;;  %v2915_v14 = vld [vmem:[#allocation8 + $0x200] sm:$0xf]  ;;  %v3602_v18 = vld [vmem:[#allocation8 + $0x30c] sm:$0xf0]  ;;  %v2837_v24 = vld [vmem:[#allocation8 + $0x170] sm:$0xf0] }
  0x8d   : > { %1424 = vmatpush.bf16.msra.mxu0 %v2660_v48  ;;  %1438 = vmatpush.bf16.msra.mxu1 %v2788_v49  ;;  %v3043_v16 = vld [vmem:[#allocation8 + $0x300] sm:$0xf]  ;;  %v2916_v17 = vor.u32 %v3570_v15, %v2915_v14  ;;  %v3596_v25 = vld [vmem:[#allocation8 + $0x2e4] sm:$0xf]  ;;  %v2840_v26 = vor.u32 %v3548_v23, %v2837_v24  ;;  %v3029_v27 = vld [vmem:[#allocation8 + $0x2f0] sm:$0xf0] }
  0x8e   : > { %v3044_v21 = vor.u32 %v3602_v18, %v3043_v16  ;;  %v3628_v29 = vld [vmem:[#allocation8 + $0x3e4] sm:$0xf]  ;;  %v3157_v30 = vld [vmem:[#allocation8 + $0x3f0] sm:$0xf0]  ;;  %v3032_v31 = vor.u32 %v3596_v25, %v3029_v27  ;;  %v1645_v14 = vld [vmem:[#allocation10] sm:$0xf] }
  0x8f   : > { %v3160_v32 = vor.u32 %v3628_v29, %v3157_v30  ;;  %v3512_v33 = vld [vmem:[#allocation8 + $0x44] sm:$0xf]  ;;  %v2693_v34 = vld [vmem:[#allocation8 + $0x50] sm:$0xf0] }
  0x90   : > { %1449 = vmatpush.bf16.msra.mxu2 %v2964_v42  ;;  %1463 = vmatpush.bf16.msra.mxu3 %v3092_v43  ;;  %v3544_v35 = vld [vmem:[#allocation8 + $0x144] sm:$0xf]  ;;  %v2696_v36 = vor.u32 %v3512_v33, %v2693_v34  ;;  %v2821_v37 = vld [vmem:[#allocation8 + $0x150] sm:$0xf0] }
  0x91   : > { %1473 = vmatpush.bf16.msrb.mxu0 %v2776_v50  ;;  %1487 = vmatpush.bf16.msrb.mxu1 %v2904_v51  ;;  %v2824_v40 = vor.u32 %v3544_v35, %v2821_v37  ;;  %v3624_v42 = vld [vmem:[#allocation8 + $0x3c4] sm:$0xf]  ;;  %v3141_v43 = vld [vmem:[#allocation8 + $0x3d0] sm:$0xf0] }
  0x92   : > { %v3144_v44 = vor.u32 %v3624_v42, %v3141_v43  ;;  %v3508_v45 = vld [vmem:[#allocation8 + $0x24] sm:$0xf]  ;;  %v2677_v46 = vld [vmem:[#allocation8 + $0x30] sm:$0xf0] }
  0x93   : > { %v3540_v47 = vld [vmem:[#allocation8 + $0x124] sm:$0xf]  ;;  %v2680_v48 = vor.u32 %v3508_v45, %v2677_v46  ;;  %v2805_v49 = vld [vmem:[#allocation8 + $0x130] sm:$0xf0] }
  0x94   : > { %1450 = vmatpush.bf16.msra.mxu2 %v2948_v55  ;;  %1464 = vmatpush.bf16.msra.mxu3 %v3076_v56  ;;  %v3588_v50 = vld [vmem:[#allocation8 + $0x2a4] sm:$0xf]  ;;  %v2997_v51 = vld [vmem:[#allocation8 + $0x2b0] sm:$0xf0]  ;;  %v2808_v28 = vor.u32 %v3540_v47, %v2805_v49 }
  0x95   : > { %1474 = vmatpush.bf16.msrb.mxu0 %v2760_v57  ;;  %1488 = vmatpush.bf16.msrb.mxu1 %v2888_v58  ;;  %v3000_v52 = vor.u32 %v3588_v50, %v2997_v51  ;;  %v3620_v53 = vld [vmem:[#allocation8 + $0x3a4] sm:$0xf]  ;;  %v3125_v54 = vld [vmem:[#allocation8 + $0x3b0] sm:$0xf0] }
  0x96   : > { %v3128_v55 = vor.u32 %v3620_v53, %v3125_v54  ;;  %v3504_v56 = vld [vmem:[#allocation8 + $0x4] sm:$0xf]  ;;  %v2661_v57 = vld [vmem:[#allocation8 + $0x10] sm:$0xf0]  ;;  %v3535_v54 = vld [vmem:[#allocation8 + $0xf4] sm:$0xf0] }
  0x97   : > { %v3536_v58 = vld [vmem:[#allocation8 + $0x104] sm:$0xf]  ;;  %v2664_v59 = vor.u32 %v3504_v56, %v2661_v57  ;;  %v2789_v60 = vld [vmem:[#allocation8 + $0x110] sm:$0xf0]  ;;  %v3567_v56 = vld [vmem:[#allocation8 + $0x1f4] sm:$0xf0] }
  0x98   : > { %1451 = vmatpush.bf16.msra.mxu2 %v2932_v6  ;;  %1465 = vmatpush.bf16.msra.mxu3 %v3060_v7  ;;  %v3584_v61 = vld [vmem:[#allocation8 + $0x284] sm:$0xf]  ;;  %v2981_v62 = vld [vmem:[#allocation8 + $0x290] sm:$0xf0] }
  0x99   : > { %1475 = vmatpush.bf16.msrb.mxu0 %v2744_v63  ;;  %1489 = vmatpush.bf16.msrb.mxu1 %v2872_v0  ;;  %v2792_v63 = vor.u32 %v3536_v58, %v2789_v60  ;;  %v2984_v0 = vor.u32 %v3584_v61, %v2981_v62  ;;  %v3616_v1 = vld [vmem:[#allocation8 + $0x384] sm:$0xf]  ;;  %v3109_v2 = vld [vmem:[#allocation8 + $0x390] sm:$0xf0] }
  0x9a   : > { %v3112_v3 = vor.u32 %v3616_v1, %v3109_v2  ;;  %v3580_v4 = vld [vmem:[#allocation8 + $0x264] sm:$0xf]  ;;  %v2965_v5 = vld [vmem:[#allocation8 + $0x270] sm:$0xf0] }
  0x9b   : > { %v3612_v6 = vld [vmem:[#allocation8 + $0x364] sm:$0xf]  ;;  %v2968_v7 = vor.u32 %v3580_v4, %v2965_v5  ;;  %v3093_v8 = vld [vmem:[#allocation8 + $0x370] sm:$0xf0] }
  0x9c   : > { %1452 = vmatpush.bf16.msra.mxu2 %v2916_v17  ;;  %1466 = vmatpush.bf16.msra.mxu3 %v3044_v21  ;;  %v589_v9 = vld [vmem:[#allocation1] sm:$0xff]  ;;  %v590_v10 = vld [vmem:[#allocation1 + $0x9] sm:$0xff]  ;;  %v4402_v12 = vld [vmem:[#allocation1 + $0x12] sm:$0xff] }
  0x9d   : > { %1476 = vmatpush.bf16.msrb.mxu0 %v2728_v11  ;;  %1490 = vmatpush.bf16.msrb.mxu1 %v2856_v13  ;;  %v3096_v11 = vor.u32 %v3612_v6, %v3093_v8  ;;  %v4404_v13 = vld [vmem:[#allocation1 + $0x1b] sm:$0xff]  ;;  %v3576_v15 = vld [vmem:[#allocation8 + $0x244] sm:$0xf]  ;;  %v593_v27 = vpack.i.b16 %v589_v9, %v589_v9  ;;  %v596_v29 = vpack.i.b16 %v590_v10, %v590_v10  ;;  %v3531_v6 = vld [vmem:[#allocation8 + $0xd4] sm:$0xf0] }
  0x9e   : > { %1647 = vst [vmem:[#allocation1] ss:$9 sm:$0xff] %v1645_v14  ;;  %v2949_v16 = vld [vmem:[#allocation8 + $0x250] sm:$0xf0]  ;;  %v3608_v18 = vld [vmem:[#allocation8 + $0x344] sm:$0xf]  ;;  %v599_v57 = vpack.i.b16 %v4402_v12, %v4402_v12  ;;  %v602_v58 = vpack.i.b16 %v4404_v13, %v4404_v13 }
  0x9f   : > { %v2952_v17 = vor.u32 %v3576_v15, %v2949_v16  ;;  %v3077_v19 = vld [vmem:[#allocation8 + $0x350] sm:$0xf0]  ;;  %v3572_v21 = vld [vmem:[#allocation8 + $0x224] sm:$0xf]  ;;  %v595_v39 = vperm.slane %v593_v27, 0 }
  0xa0   : > { %1501 = vmatpush.bf16.msrb.mxu2 %v3032_v31  ;;  %1515 = vmatpush.bf16.msrb.mxu3 %v3160_v32  ;;  %v3080_v20 = vor.u32 %v3608_v18, %v3077_v19  ;;  %v3604_v23 = vld [vmem:[#allocation8 + $0x324] sm:$0xf]  ;;  %v3061_v25 = vld [vmem:[#allocation8 + $0x330] sm:$0xf0]  ;;  %v3563_v8 = vld [vmem:[#allocation8 + $0x1d4] sm:$0xf0] }
  0xa1   : > { %1477 = vmatpush.bf16.msrb.mxu0 %v2712_v22  ;;  %1491 = vmatpush.bf16.msrb.mxu1 %v2840_v26  ;;  %v2933_v22 = vld [vmem:[#allocation8 + $0x230] sm:$0xf0]  ;;  %v3064_v26 = vor.u32 %v3604_v23, %v3061_v25  ;;  %v3568_v32 = vld [vmem:[#allocation8 + $0x204] sm:$0xf]  ;;  %v613_v43 = vunpack.c.l.bf16 %v595_v39  ;;  %v601_v10 = vperm.slane %v599_v57, 0 }
  0xa2   : > { %v2936_v24 = vor.u32 %v3572_v21, %v2933_v22  ;;  %v2917_v33 = vld [vmem:[#allocation8 + $0x210] sm:$0xf0]  ;;  %v3600_v34 = vld [vmem:[#allocation8 + $0x304] sm:$0xf]  ;;  %v2747_v14 = vld [vmem:[#allocation8 + $0xa8] sm:$0xf] }
  0xa3   : > { %v2920_v35 = vor.u32 %v3568_v32, %v2917_v33  ;;  %v3527_v15 = vld [vmem:[#allocation8 + $0xb4] sm:$0xf0]  ;;  %v2875_v16 = vld [vmem:[#allocation8 + $0x1a8] sm:$0xf] }
  0xa4   : > { %1502 = vmatpush.bf16.msrb.mxu2 %v3016_v41  ;;  %1516 = vmatpush.bf16.msrb.mxu3 %v3144_v44 }
  0xa5   : > { %1478 = vmatpush.bf16.msrb.mxu0 %v2696_v36  ;;  %1492 = vmatpush.bf16.msrb.mxu1 %v2824_v40  ;;  %v3045_v36 = vld [vmem:[#allocation8 + $0x310] sm:$0xf0]  ;;  %v598_v40 = vperm.slane %v596_v29, 0  ;;  %v3523_v29 = vld [vmem:[#allocation8 + $0x94] sm:$0xf0] }
  0xa6   : > { %v3048_v37 = vor.u32 %v3600_v34, %v3045_v36 }
  0xa7   : > { %v614_v44 = vunpack.c.l.bf16 %v598_v40 }
  0xa8   : > { %1503 = vmatpush.bf16.msrb.mxu2 %v3000_v52  ;;  %1517 = vmatpush.bf16.msrb.mxu3 %v3128_v55  ;;  %v2907_v55 = vld [vmem:[#allocation8 + $0x1e8] sm:$0xf] }
  0xa9   : > { %1479 = vmatpush.bf16.msrb.mxu0 %v2680_v48  ;;  %1493 = vmatpush.bf16.msrb.mxu1 %v2808_v28  ;;  %v2779_v28 = vld [vmem:[#allocation8 + $0xe8] sm:$0xf]  ;;  %v2908_v2 = vor.u32 %v3567_v56, %v2907_v55  ;;  %v3515_v56 = vld [vmem:[#allocation8 + $0x54] sm:$0xf0] }
  0xaa   : > { %v2780_v1 = vor.u32 %v3535_v54, %v2779_v28  ;;  %v2699_v55 = vld [vmem:[#allocation8 + $0x48] sm:$0xf] }
  0xac   : > { %1504 = vmatpush.bf16.msrb.mxu2 %v2984_v0  ;;  %1518 = vmatpush.bf16.msrb.mxu3 %v3112_v3  ;;  %v2763_v3 = vld [vmem:[#allocation8 + $0xc8] sm:$0xf] }
  0xad   : > { %1480 = vmatpush.bf16.msrb.mxu0 %v2664_v59  ;;  %1494 = vmatpush.bf16.msrb.mxu1 %v2792_v63  ;;  %v2764_v12 = vor.u32 %v3531_v6, %v2763_v3  ;;  %v2683_v3 = vld [vmem:[#allocation8 + $0x28] sm:$0xf]  ;;  %v3511_v6 = vld [vmem:[#allocation8 + $0x34] sm:$0xf0] }
  0xb0   : > { %1505 = vmatpush.bf16.msrb.mxu2 %v2968_v7  ;;  %1519 = vmatpush.bf16.msrb.mxu3 %v3096_v11  ;;  %v2891_v7 = vld [vmem:[#allocation8 + $0x1c8] sm:$0xf]  ;;  %v604_v11 = vperm.slane %v602_v58, 0 }
  0xb1   : > { %v2892_v13 = vor.u32 %v3563_v8, %v2891_v7 }
  0xb2   : > { %v616_v21 = vunpack.c.l.bf16 %v604_v11  ;;  %v3003_v11 = vld [vmem:[#allocation8 + $0x2a8] sm:$0xf] }
  0xb4   : > { %1506 = vmatpush.bf16.msrb.mxu2 %v2952_v17  ;;  %1520 = vmatpush.bf16.msrb.mxu3 %v3080_v20  ;;  %v3559_v17 = vld [vmem:[#allocation8 + $0x1b4] sm:$0xf0]  ;;  %v615_v20 = vunpack.c.l.bf16 %v601_v10 }
  0xb5   : > { %v2876_v25 = vor.u32 %v3559_v17, %v2875_v16  ;;  %v3543_v10 = vld [vmem:[#allocation8 + $0x134] sm:$0xf0]  ;;  %v2667_v17 = vld [vmem:[#allocation8 + $0x8] sm:$0xf] }
  0xb8   : > { %1507 = vmatpush.bf16.msrb.mxu2 %v2936_v24  ;;  %1521 = vmatpush.bf16.msrb.mxu3 %v3064_v26  ;;  %v2748_v24 = vor.u32 %v3527_v15, %v2747_v14  ;;  %v2731_v26 = vld [vmem:[#allocation8 + $0x88] sm:$0xf]  ;;  %v3623_v14 = vld [vmem:[#allocation8 + $0x3b4] sm:$0xf0]  ;;  %v2684_v15 = vor.u32 %v3511_v6, %v2683_v3  ;;  %v3521_v3 = vld [vmem:[#allocation8 + $0x8c] sm:$0xf] }
  0xb9   : > { %v2732_v36 = vor.u32 %v3523_v29, %v2731_v26  ;;  %v3619_v26 = vld [vmem:[#allocation8 + $0x394] sm:$0xf0]  ;;  %v2781_v29 = vld [vmem:[#allocation8 + $0xf8] sm:$0xf0] }
  0xba   : > { %v2733_v6 = vld [vmem:[#allocation8 + $0x98] sm:$0xf0] }
  0xbc   : > { %1508 = vmatpush.bf16.msrb.mxu2 %v2920_v35  ;;  %1522 = vmatpush.bf16.msrb.mxu3 %v3048_v37 }
  0xfa   : > { %v535_v30 = vpop.f32.mrf.mxu2  ;;  %v549_v31 = vpop.f32.mrf.mxu3 }
  0xfb   : > { %v582_v38 = vpack.c.bf16 %v549_v31, %v535_v30  ;;  %v2859_v30 = vld [vmem:[#allocation8 + $0x188] sm:$0xf]  ;;  %v3555_v31 = vld [vmem:[#allocation8 + $0x194] sm:$0xf0] }
  0xfc   : > { %v2860_v37 = vor.u32 %v3555_v31, %v2859_v30  ;;  %v3565_v30 = vld [vmem:[#allocation8 + $0x1ec] sm:$0xf]  ;;  %v2909_v31 = vld [vmem:[#allocation8 + $0x1f8] sm:$0xf0] }
  0xfd   : > { %v605_v41 = vunpack.c.l.bf16 %v582_v38  ;;  %v606_v42 = vunpack.c.h.bf16 %v582_v38  ;;  %v2715_v38 = vld [vmem:[#allocation8 + $0x68] sm:$0xf] }
  0xff   : > { %v617_v48 = vadd.f32 %v613_v43, %v605_v41  ;;  %v618_v49 = vadd.f32 %v614_v44, %v606_v42  ;;  %v3519_v41 = vld [vmem:[#allocation8 + $0x74] sm:$0xf0]  ;;  %v2843_v42 = vld [vmem:[#allocation8 + $0x168] sm:$0xf] }
 0x101   : > { %v637_v59 = vmax.f32 %v617_v48, 0.0  ;;  %v638_v60 = vmax.f32 %v618_v49, 0.0 }
 0x102   : > { %v537_v45 = vpop.f32.mrf.mxu2  ;;  %v551_v46 = vpop.f32.mrf.mxu3 }
 0x103   : > { %v584_v47 = vpack.c.bf16 %v551_v46, %v537_v45  ;;  %v3599_v45 = vld [vmem:[#allocation8 + $0x2f4] sm:$0xf0]  ;;  %v3163_v46 = vld [vmem:[#allocation8 + $0x3e8] sm:$0xf] }
 0x105   : > { %v609_v50 = vunpack.c.l.bf16 %v584_v47  ;;  %v610_v51 = vunpack.c.h.bf16 %v584_v47 }
 0x107   : > { %v621_v52 = vadd.f32 %v613_v43, %v609_v50  ;;  %v622_v53 = vadd.f32 %v614_v44, %v610_v51  ;;  %v3551_v43 = vld [vmem:[#allocation8 + $0x174] sm:$0xf0]  ;;  %v3035_v44 = vld [vmem:[#allocation8 + $0x2e8] sm:$0xf] }
 0x108   : > { %v3631_v51 = vld [vmem:[#allocation8 + $0x3f4] sm:$0xf0]  ;;  %v2844_v54 = vor.u32 %v3551_v43, %v2843_v42  ;;  %v3036_v57 = vor.u32 %v3599_v45, %v3035_v44  ;;  %v3529_v42 = vld [vmem:[#allocation8 + $0xcc] sm:$0xf]  ;;  %v2765_v43 = vld [vmem:[#allocation8 + $0xd8] sm:$0xf0] }
 0x109   : > { %v641_v61 = vmax.f32 %v621_v52, 0.0  ;;  %v642_v62 = vmax.f32 %v622_v53, 0.0  ;;  %v2716_v53 = vor.u32 %v3519_v41, %v2715_v38  ;;  %v3164_v58 = vor.u32 %v3631_v51, %v3163_v46  ;;  %v3615_v41 = vld [vmem:[#allocation8 + $0x374] sm:$0xf0]  ;;  %v3561_v44 = vld [vmem:[#allocation8 + $0x1cc] sm:$0xf] }
 0x10a   : > { %v563_v63 = vpop.f32.mrf.mxu2  ;;  %v577_v0 = vpop.f32.mrf.mxu3  ;;  %v2893_v45 = vld [vmem:[#allocation8 + $0x1d8] sm:$0xf0] }
 0x10b   : > { %v4410_v4 = vpack.c.bf16 %v641_v61, %v637_v59  ;;  %v4412_v5 = vpack.c.bf16 %v642_v62, %v638_v60  ;;  %v583_v9 = vpack.c.bf16 %v577_v0, %v563_v63  ;;  %v2827_v59 = vld [vmem:[#allocation8 + $0x148] sm:$0xf]  ;;  %v3547_v60 = vld [vmem:[#allocation8 + $0x154] sm:$0xf0]  ;;  %v2896_v51 = vor.u32 %v3561_v44, %v2893_v45 }
 0x10c   : > { %v3019_v61 = vld [vmem:[#allocation8 + $0x2c8] sm:$0xf]  ;;  %v3595_v62 = vld [vmem:[#allocation8 + $0x2d4] sm:$0xf0] }
 0x10d   : > { %1425 = vmatmul.bf16.vlgmr.msra.gmra.mxu0 %v4410_v4  ;;  %1439 = vmatmul.bf16.vlgmr.msra.gmra.mxu1 %v4412_v5  ;;  %v607_v18 = vunpack.c.l.bf16 %v583_v9  ;;  %v608_v19 = vunpack.c.h.bf16 %v583_v9  ;;  %v3147_v63 = vld [vmem:[#allocation8 + $0x3c8] sm:$0xf]  ;;  %v3627_v0 = vld [vmem:[#allocation8 + $0x3d4] sm:$0xf0]  ;;  %v3020_v7 = vor.u32 %v3595_v62, %v3019_v61 }
 0x10e   : > { %1529 = vmatpush.bf16.msra.mxu0 %v2780_v1  ;;  %1543 = vmatpush.bf16.msra.mxu1 %v2908_v2  ;;  %v2700_v1 = vor.u32 %v3515_v56, %v2699_v55  ;;  %v2828_v2 = vor.u32 %v3547_v60, %v2827_v59  ;;  %v3148_v8 = vor.u32 %v3627_v0, %v3147_v63  ;;  %v2811_v9 = vld [vmem:[#allocation8 + $0x128] sm:$0xf]  ;;  %v3525_v55 = vld [vmem:[#allocation8 + $0xac] sm:$0xf]  ;;  %v2749_v56 = vld [vmem:[#allocation8 + $0xb8] sm:$0xf0] }
 0x10f   : > { %v619_v32 = vadd.f32 %v615_v20, %v607_v18  ;;  %v620_v33 = vadd.f32 %v616_v21, %v608_v19  ;;  %v2812_v16 = vor.u32 %v3543_v10, %v2811_v9  ;;  %v3507_v18 = vld [vmem:[#allocation8 + $0x14] sm:$0xf0]  ;;  %v2795_v19 = vld [vmem:[#allocation8 + $0x108] sm:$0xf]  ;;  %v2752_v63 = vor.u32 %v3525_v55, %v2749_v56  ;;  %v3505_v55 = vld [vmem:[#allocation8 + $0xc] sm:$0xf] }
 0x110   : > { %v2939_v61 = vld [vmem:[#allocation8 + $0x228] sm:$0xf]  ;;  %v3575_v62 = vld [vmem:[#allocation8 + $0x234] sm:$0xf0]  ;;  %v2669_v56 = vld [vmem:[#allocation8 + $0x18] sm:$0xf0] }
 0x111   : > { %v639_v47 = vmax.f32 %v619_v32, 0.0  ;;  %v640_v48 = vmax.f32 %v620_v33, 0.0  ;;  %v2668_v32 = vor.u32 %v3507_v18, %v2667_v17  ;;  %v2940_v9 = vor.u32 %v3575_v62, %v2939_v61  ;;  %v3517_v17 = vld [vmem:[#allocation8 + $0x6c] sm:$0xf]  ;;  %v2717_v18 = vld [vmem:[#allocation8 + $0x78] sm:$0xf0] }
 0x112   : > { %1530 = vmatpush.bf16.msra.mxu0 %v2764_v12  ;;  %1544 = vmatpush.bf16.msra.mxu1 %v2892_v13  ;;  %v565_v22 = vpop.f32.mrf.mxu2  ;;  %v579_v23 = vpop.f32.mrf.mxu3  ;;  %v3591_v12 = vld [vmem:[#allocation8 + $0x2b4] sm:$0xf0]  ;;  %v3131_v13 = vld [vmem:[#allocation8 + $0x3a8] sm:$0xf]  ;;  %v3585_v61 = vld [vmem:[#allocation8 + $0x28c] sm:$0xf] }
 0x113   : > { %v585_v27 = vpack.c.bf16 %v579_v23, %v565_v22  ;;  %v3539_v22 = vld [vmem:[#allocation8 + $0x114] sm:$0xf0]  ;;  %v2987_v23 = vld [vmem:[#allocation8 + $0x288] sm:$0xf]  ;;  %v2989_v62 = vld [vmem:[#allocation8 + $0x298] sm:$0xf0] }
 0x114   : > { %v2796_v33 = vor.u32 %v3539_v22, %v2795_v19  ;;  %v3549_v19 = vld [vmem:[#allocation8 + $0x16c] sm:$0xf]  ;;  %v3037_v22 = vld [vmem:[#allocation8 + $0x2f8] sm:$0xf0] }
 0x115   : > { %v611_v34 = vunpack.c.l.bf16 %v585_v27  ;;  %v612_v35 = vunpack.c.h.bf16 %v585_v27  ;;  %v3533_v27 = vld [vmem:[#allocation8 + $0xec] sm:$0xf] }
 0x116   : > { %1531 = vmatpush.bf16.msra.mxu0 %v2748_v24  ;;  %1545 = vmatpush.bf16.msra.mxu1 %v2876_v25  ;;  %v3587_v24 = vld [vmem:[#allocation8 + $0x294] sm:$0xf0]  ;;  %v3115_v25 = vld [vmem:[#allocation8 + $0x388] sm:$0xf]  ;;  %v2784_v38 = vor.u32 %v3533_v27, %v2781_v29  ;;  %v2720_v27 = vor.u32 %v3517_v17, %v2717_v18 }
 0x117   : > { %v623_v39 = vadd.f32 %v615_v20, %v611_v34  ;;  %v624_v40 = vadd.f32 %v616_v21, %v612_v35  ;;  %v3004_v20 = vor.u32 %v3591_v12, %v3003_v11  ;;  %v3132_v21 = vor.u32 %v3623_v14, %v3131_v13  ;;  %v2923_v11 = vld [vmem:[#allocation8 + $0x208] sm:$0xf]  ;;  %v3571_v12 = vld [vmem:[#allocation8 + $0x214] sm:$0xf0] }
 0x118   : > { %v2988_v34 = vor.u32 %v3587_v24, %v2987_v23  ;;  %v3116_v35 = vor.u32 %v3619_v26, %v3115_v25  ;;  %v3051_v13 = vld [vmem:[#allocation8 + $0x308] sm:$0xf]  ;;  %v2736_v14 = vor.u32 %v3521_v3, %v2733_v6  ;;  %v3629_v23 = vld [vmem:[#allocation8 + $0x3ec] sm:$0xf]  ;;  %v3165_v24 = vld [vmem:[#allocation8 + $0x3f8] sm:$0xf0]  ;;  %v2924_v25 = vor.u32 %v3571_v12, %v2923_v11 }
 0x119   : > { %v643_v49 = vmax.f32 %v623_v39, 0.0  ;;  %v644_v50 = vmax.f32 %v624_v40, 0.0  ;;  %v2912_v39 = vor.u32 %v3565_v30, %v2909_v31  ;;  %v3099_v40 = vld [vmem:[#allocation8 + $0x368] sm:$0xf]  ;;  %v3513_v30 = vld [vmem:[#allocation8 + $0x4c] sm:$0xf]  ;;  %v2992_v3 = vor.u32 %v3585_v61, %v2989_v62 }
 0x11a   : > { %1532 = vmatpush.bf16.msra.mxu0 %v2732_v36  ;;  %1546 = vmatpush.bf16.msra.mxu1 %v2860_v37  ;;  %v2971_v36 = vld [vmem:[#allocation8 + $0x268] sm:$0xf]  ;;  %v3583_v37 = vld [vmem:[#allocation8 + $0x274] sm:$0xf0]  ;;  %v2701_v31 = vld [vmem:[#allocation8 + $0x58] sm:$0xf0] }
 0x11b   : > { %v4416_v28 = vpack.c.bf16 %v643_v49, %v639_v47  ;;  %v4418_v52 = vpack.c.bf16 %v644_v50, %v640_v48  ;;  %v2972_v46 = vor.u32 %v3583_v37, %v2971_v36  ;;  %v3100_v47 = vor.u32 %v3615_v41, %v3099_v40  ;;  %v2955_v48 = vld [vmem:[#allocation8 + $0x248] sm:$0xf]  ;;  %v3579_v49 = vld [vmem:[#allocation8 + $0x254] sm:$0xf0]  ;;  %v3593_v36 = vld [vmem:[#allocation8 + $0x2cc] sm:$0xf] }
 0x11c   : > { %v2768_v50 = vor.u32 %v3529_v42, %v2765_v43  ;;  %v2956_v59 = vor.u32 %v3579_v49, %v2955_v48  ;;  %v3021_v37 = vld [vmem:[#allocation8 + $0x2d8] sm:$0xf0]  ;;  %v2704_v40 = vor.u32 %v3513_v30, %v2701_v31  ;;  %v3509_v42 = vld [vmem:[#allocation8 + $0x2c] sm:$0xf]  ;;  %v3227_v30 = vld [vmem:[#allocation11 + $0x70] sm:$0xf] }
 0x11d   : > { %1453 = vmatmul.bf16.vlgmr.msra.gmra.mxu2 %v4416_v28  ;;  %1467 = vmatmul.bf16.vlgmr.msra.gmra.mxu3 %v4418_v52  ;;  %v2685_v43 = vld [vmem:[#allocation8 + $0x38] sm:$0xf0]  ;;  %v3024_v44 = vor.u32 %v3593_v36, %v3021_v37  ;;  %v3589_v48 = vld [vmem:[#allocation8 + $0x2ac] sm:$0xf]  ;;  %v3251_v61 = vld [vmem:[#allocation11 + $0xa0] sm:$0xf] }
 0x11e   : > { %1481 = vmatmul.bf16.vlgmr.msrb.gmra.mxu0 %v4410_v4  ;;  %1495 = vmatmul.bf16.vlgmr.msrb.gmra.mxu1 %v4412_v5  ;;  %v3005_v49 = vld [vmem:[#allocation8 + $0x2b8] sm:$0xf0]  ;;  %v3645_v36 = vld [vmem:[#allocation11 + $0x64] sm:$0xf0] }
 0x11f   : > { %1533 = vmatpush.bf16.msra.mxu0 %v2716_v53  ;;  %1547 = vmatpush.bf16.msra.mxu1 %v2844_v54  ;;  %v3083_v53 = vld [vmem:[#allocation8 + $0x348] sm:$0xf]  ;;  %v3611_v54 = vld [vmem:[#allocation8 + $0x354] sm:$0xf0]  ;;  %v3647_v31 = vld [vmem:[#allocation11 + $0x74] sm:$0xf0] }
 0x120   : > { %1557 = vmatpush.bf16.msra.mxu2 %v3036_v57  ;;  %1571 = vmatpush.bf16.msra.mxu3 %v3164_v58  ;;  %v3557_v57 = vld [vmem:[#allocation8 + $0x1ac] sm:$0xf]  ;;  %v2877_v58 = vld [vmem:[#allocation8 + $0x1b8] sm:$0xf0]  ;;  %v3084_v60 = vor.u32 %v3611_v54, %v3083_v53  ;;  %v2688_v53 = vor.u32 %v3509_v42, %v2685_v43  ;;  %v3211_v42 = vld [vmem:[#allocation11 + $0x50] sm:$0xf] }
 0x121   : > { %v2880_v0 = vor.u32 %v3557_v57, %v2877_v58  ;;  %v3008_v57 = vor.u32 %v3589_v48, %v3005_v49  ;;  %v3275_v43 = vld [vmem:[#allocation11 + $0xd0] sm:$0xf]  ;;  %v3267_v48 = vld [vmem:[#allocation11 + $0xc0] sm:$0xf]  ;;  %v3657_v49 = vld [vmem:[#allocation11 + $0xc4] sm:$0xf0] }
 0x122   : > { %v3653_v62 = vld [vmem:[#allocation11 + $0xa4] sm:$0xf0] }
 0x123   : > { %1534 = vmatpush.bf16.msra.mxu0 %v2700_v1  ;;  %1548 = vmatpush.bf16.msra.mxu1 %v2828_v2  ;;  %v3067_v1 = vld [vmem:[#allocation8 + $0x328] sm:$0xf]  ;;  %v3607_v2 = vld [vmem:[#allocation8 + $0x334] sm:$0xf0] }
 0x124   : > { %1558 = vmatpush.bf16.msra.mxu2 %v3020_v7  ;;  %1572 = vmatpush.bf16.msra.mxu3 %v3148_v8  ;;  %v3553_v7 = vld [vmem:[#allocation8 + $0x18c] sm:$0xf]  ;;  %v2861_v8 = vld [vmem:[#allocation8 + $0x198] sm:$0xf0]  ;;  %v3068_v10 = vor.u32 %v3607_v2, %v3067_v1  ;;  %v2672_v1 = vor.u32 %v3505_v55, %v2669_v56  ;;  %v3259_v55 = vld [vmem:[#allocation11 + $0xb0] sm:$0xf] }
 0x127   : > { %1535 = vmatpush.bf16.msra.mxu0 %v2684_v15  ;;  %1549 = vmatpush.bf16.msra.mxu1 %v2812_v16  ;;  %v2864_v15 = vor.u32 %v3553_v7, %v2861_v8  ;;  %v3603_v16 = vld [vmem:[#allocation8 + $0x314] sm:$0xf0]  ;;  %v3581_v7 = vld [vmem:[#allocation8 + $0x26c] sm:$0xf]  ;;  %v2973_v8 = vld [vmem:[#allocation8 + $0x278] sm:$0xf0] }
 0x128   : > { %1559 = vmatpush.bf16.msra.mxu2 %v3004_v20  ;;  %1573 = vmatpush.bf16.msra.mxu3 %v3132_v21  ;;  %v2845_v20 = vld [vmem:[#allocation8 + $0x178] sm:$0xf0]  ;;  %v3597_v21 = vld [vmem:[#allocation8 + $0x2ec] sm:$0xf]  ;;  %v3052_v26 = vor.u32 %v3603_v16, %v3051_v13  ;;  %v2976_v11 = vor.u32 %v3581_v7, %v2973_v8 }
 0x129   : > { %v2848_v29 = vor.u32 %v3549_v19, %v2845_v20  ;;  %v3577_v13 = vld [vmem:[#allocation8 + $0x24c] sm:$0xf]  ;;  %v3085_v16 = vld [vmem:[#allocation8 + $0x358] sm:$0xf0] }
 0x12a   : > { %v3573_v19 = vld [vmem:[#allocation8 + $0x22c] sm:$0xf]  ;;  %v2941_v20 = vld [vmem:[#allocation8 + $0x238] sm:$0xf0] }
 0x12b   : > { %1536 = vmatpush.bf16.msra.mxu0 %v2668_v32  ;;  %1550 = vmatpush.bf16.msra.mxu1 %v2796_v33  ;;  %v3040_v32 = vor.u32 %v3597_v21, %v3037_v22  ;;  %v3168_v33 = vor.u32 %v3629_v23, %v3165_v24  ;;  %v3605_v21 = vld [vmem:[#allocation8 + $0x32c] sm:$0xf]  ;;  %v3069_v22 = vld [vmem:[#allocation8 + $0x338] sm:$0xf0]  ;;  %v2944_v23 = vor.u32 %v3573_v19, %v2941_v20  ;;  %v3662_v19 = vld [vmem:[#allocation11 + $0xf4] sm:$0xf] }
 0x12c   : > { %1560 = vmatpush.bf16.msra.mxu2 %v2988_v34  ;;  %1574 = vmatpush.bf16.msra.mxu3 %v3116_v35  ;;  %v3545_v34 = vld [vmem:[#allocation8 + $0x14c] sm:$0xf]  ;;  %v2829_v35 = vld [vmem:[#allocation8 + $0x158] sm:$0xf0]  ;;  %v3072_v24 = vor.u32 %v3605_v21, %v3069_v22  ;;  %v3293_v20 = vld [vmem:[#allocation11 + $0xf8] sm:$0xf0] }
 0x12d   : > { %1509 = vmatmul.bf16.vlgmr.msrb.gmra.mxu2 %v4416_v28  ;;  %1523 = vmatmul.bf16.vlgmr.msrb.gmra.mxu3 %v4418_v52  ;;  %v2832_v41 = vor.u32 %v3545_v34, %v2829_v35  ;;  %v3663_v34 = vld [vmem:[#allocation11 + $0xf4] sm:$0xf0]  ;;  %v3219_v35 = vld [vmem:[#allocation11 + $0x60] sm:$0xf]  ;;  %v3296_v22 = vor.u32 %v3662_v19, %v3293_v20 }
 0x12e   : > { %1537 = vmatmul.bf16.vlgmr.msra.gmra.mxu0 %v4410_v4  ;;  %1551 = vmatmul.bf16.vlgmr.msra.gmra.mxu1 %v4412_v5  ;;  %v3651_v7 = vld [vmem:[#allocation11 + $0x94] sm:$0xf0] }
 0x12f   : > { %1585 = vmatpush.bf16.msrb.mxu0 %v2784_v38  ;;  %1599 = vmatpush.bf16.msrb.mxu1 %v2912_v39  ;;  %v3625_v38 = vld [vmem:[#allocation8 + $0x3cc] sm:$0xf]  ;;  %v3149_v39 = vld [vmem:[#allocation8 + $0x3d8] sm:$0xf0] }
 0x130   : > { %1561 = vmatpush.bf16.msra.mxu2 %v2972_v46  ;;  %1575 = vmatpush.bf16.msra.mxu3 %v3100_v47  ;;  %v3152_v45 = vor.u32 %v3625_v38, %v3149_v39  ;;  %v3541_v46 = vld [vmem:[#allocation8 + $0x12c] sm:$0xf]  ;;  %v2813_v47 = vld [vmem:[#allocation8 + $0x138] sm:$0xf0]  ;;  %v3283_v38 = vld [vmem:[#allocation11 + $0xe0] sm:$0xf] }
 0x131   : > { %v2816_v54 = vor.u32 %v3541_v46, %v2813_v47  ;;  %v3661_v39 = vld [vmem:[#allocation11 + $0xe4] sm:$0xf0] }
 0x132   : > { %v3641_v46 = vld [vmem:[#allocation11 + $0x44] sm:$0xf0] }
 0x133   : > { %1586 = vmatpush.bf16.msrb.mxu0 %v2768_v50  ;;  %1600 = vmatpush.bf16.msrb.mxu1 %v2896_v51  ;;  %v3621_v50 = vld [vmem:[#allocation8 + $0x3ac] sm:$0xf]  ;;  %v3133_v51 = vld [vmem:[#allocation8 + $0x3b8] sm:$0xf0] }
 0x134   : > { %1562 = vmatpush.bf16.msra.mxu2 %v2956_v59  ;;  %1576 = vmatpush.bf16.msra.mxu3 %v3084_v60  ;;  %v3136_v58 = vor.u32 %v3621_v50, %v3133_v51  ;;  %v3537_v59 = vld [vmem:[#allocation8 + $0x10c] sm:$0xf]  ;;  %v2797_v60 = vld [vmem:[#allocation8 + $0x118] sm:$0xf0]  ;;  %v3268_v51 = vor.u32 %v3657_v49, %v3267_v48  ;;  %v3638_v49 = vld [vmem:[#allocation11 + $0x34] sm:$0xf] }
 0x135   : > { %v2800_v2 = vor.u32 %v3537_v59, %v2797_v60  ;;  %v3637_v59 = vld [vmem:[#allocation11 + $0x24] sm:$0xf0]  ;;  %v3695_v48 = vld [vmem:[#allocation11 + $0x1f4] sm:$0xf0] }
 0x137   : > { %1587 = vmatpush.bf16.msrb.mxu0 %v2752_v63  ;;  %1601 = vmatpush.bf16.msrb.mxu1 %v2880_v0  ;;  %v3617_v63 = vld [vmem:[#allocation8 + $0x38c] sm:$0xf]  ;;  %v3117_v0 = vld [vmem:[#allocation8 + $0x398] sm:$0xf0] }
 0x138   : > { %1563 = vmatpush.bf16.msra.mxu2 %v2940_v9  ;;  %1577 = vmatpush.bf16.msra.mxu3 %v3068_v10  ;;  %v3120_v6 = vor.u32 %v3617_v63, %v3117_v0  ;;  %v3613_v9 = vld [vmem:[#allocation8 + $0x36c] sm:$0xf]  ;;  %v3101_v10 = vld [vmem:[#allocation8 + $0x378] sm:$0xf0]  ;;  %v3252_v0 = vor.u32 %v3653_v62, %v3251_v61  ;;  %v3411_v61 = vld [vmem:[#allocation11 + $0x1e0] sm:$0xf] }
 0x139   : > { %v3104_v12 = vor.u32 %v3613_v9, %v3101_v10 }
 0x13b   : > { %1588 = vmatpush.bf16.msrb.mxu0 %v2736_v14  ;;  %1602 = vmatpush.bf16.msrb.mxu1 %v2864_v15  ;;  %v2957_v14 = vld [vmem:[#allocation8 + $0x258] sm:$0xf0]  ;;  %v3609_v15 = vld [vmem:[#allocation8 + $0x34c] sm:$0xf] }
 0x13c   : > { %1564 = vmatpush.bf16.msra.mxu2 %v2924_v25  ;;  %1578 = vmatpush.bf16.msra.mxu3 %v3052_v26  ;;  %v2960_v17 = vor.u32 %v3577_v13, %v2957_v14  ;;  %v3088_v18 = vor.u32 %v3609_v15, %v3085_v16  ;;  %v3569_v25 = vld [vmem:[#allocation8 + $0x20c] sm:$0xf]  ;;  %v2925_v26 = vld [vmem:[#allocation8 + $0x218] sm:$0xf0]  ;;  %v3235_v13 = vld [vmem:[#allocation11 + $0x80] sm:$0xf] }
 0x13d   : > { %v3649_v15 = vld [vmem:[#allocation11 + $0x84] sm:$0xf0]  ;;  %v3646_v16 = vld [vmem:[#allocation11 + $0x74] sm:$0xf] }
 0x13f   : > { %1589 = vmatpush.bf16.msrb.mxu0 %v2720_v27  ;;  %1603 = vmatpush.bf16.msrb.mxu1 %v2848_v29  ;;  %v3601_v27 = vld [vmem:[#allocation8 + $0x30c] sm:$0xf]  ;;  %v3053_v29 = vld [vmem:[#allocation8 + $0x318] sm:$0xf0] }
 0x140   : > { %1613 = vmatpush.bf16.msrb.mxu2 %v3040_v32  ;;  %1627 = vmatpush.bf16.msrb.mxu3 %v3168_v33  ;;  %v3291_v32 = vld [vmem:[#allocation11 + $0xf0] sm:$0xf]  ;;  %v3228_v33 = vor.u32 %v3647_v31, %v3227_v30 }
 0x141   : > { %1565 = vmatmul.bf16.vlgmr.msra.gmra.mxu2 %v4416_v28  ;;  %1579 = vmatmul.bf16.vlgmr.msra.gmra.mxu3 %v4418_v52  ;;  %v3292_v37 = vor.u32 %v3663_v34, %v3291_v32  ;;  %v3642_v32 = vld [vmem:[#allocation11 + $0x54] sm:$0xf] }
 0x142   : > { %v3658_v34 = vld [vmem:[#allocation11 + $0xd4] sm:$0xf] }
 0x143   : > { %1590 = vmatpush.bf16.msrb.mxu0 %v2704_v40  ;;  %1604 = vmatpush.bf16.msrb.mxu1 %v2832_v41  ;;  %v3220_v40 = vor.u32 %v3645_v36, %v3219_v35  ;;  %v3284_v41 = vor.u32 %v3661_v39, %v3283_v38  ;;  %v3277_v36 = vld [vmem:[#allocation11 + $0xd8] sm:$0xf0]  ;;  %v3640_v38 = vld [vmem:[#allocation11 + $0x44] sm:$0xf]  ;;  %v3205_v39 = vld [vmem:[#allocation11 + $0x48] sm:$0xf0] }
 0x144   : > { %1614 = vmatpush.bf16.msrb.mxu2 %v3024_v44  ;;  %1628 = vmatpush.bf16.msrb.mxu3 %v3152_v45  ;;  %v3659_v44 = vld [vmem:[#allocation11 + $0xd4] sm:$0xf0]  ;;  %v3203_v45 = vld [vmem:[#allocation11 + $0x40] sm:$0xf] }
 0x145   : > { %v3276_v47 = vor.u32 %v3659_v44, %v3275_v43  ;;  %v3204_v50 = vor.u32 %v3641_v46, %v3203_v45  ;;  %v3355_v44 = vld [vmem:[#allocation11 + $0x170] sm:$0xf]  ;;  %v3679_v45 = vld [vmem:[#allocation11 + $0x174] sm:$0xf0] }
 0x146   : > { %v3419_v46 = vld [vmem:[#allocation11 + $0x1f0] sm:$0xf] }
 0x147   : > { %1591 = vmatpush.bf16.msrb.mxu0 %v2688_v53  ;;  %1605 = vmatpush.bf16.msrb.mxu1 %v2816_v54  ;;  %v3195_v53 = vld [vmem:[#allocation11 + $0x30] sm:$0xf]  ;;  %v3639_v54 = vld [vmem:[#allocation11 + $0x34] sm:$0xf0] }
 0x148   : > { %1615 = vmatpush.bf16.msrb.mxu2 %v3008_v57  ;;  %1629 = vmatpush.bf16.msrb.mxu3 %v3136_v58  ;;  %v3196_v56 = vor.u32 %v3639_v54, %v3195_v53  ;;  %v3655_v57 = vld [vmem:[#allocation11 + $0xb4] sm:$0xf0]  ;;  %v3187_v58 = vld [vmem:[#allocation11 + $0x20] sm:$0xf]  ;;  %v3654_v54 = vld [vmem:[#allocation11 + $0xb4] sm:$0xf] }
 0x149   : > { %v3260_v60 = vor.u32 %v3655_v57, %v3259_v55  ;;  %v3188_v63 = vor.u32 %v3637_v59, %v3187_v58  ;;  %v3261_v55 = vld [vmem:[#allocation11 + $0xb8] sm:$0xf0]  ;;  %v3347_v59 = vld [vmem:[#allocation11 + $0x160] sm:$0xf] }
 0x14a   : > { %v3264_v58 = vor.u32 %v3654_v54, %v3261_v55  ;;  %v3387_v54 = vld [vmem:[#allocation11 + $0x1b0] sm:$0xf]  ;;  %v3687_v55 = vld [vmem:[#allocation11 + $0x1b4] sm:$0xf0] }
 0x14b   : > { %1592 = vmatpush.bf16.msrb.mxu0 %v2672_v1  ;;  %1606 = vmatpush.bf16.msrb.mxu1 %v2800_v2  ;;  %v3179_v1 = vld [vmem:[#allocation11 + $0x10] sm:$0xf]  ;;  %v3635_v2 = vld [vmem:[#allocation11 + $0x14] sm:$0xf0] }
 0x14c   : > { %1616 = vmatpush.bf16.msrb.mxu2 %v2992_v3  ;;  %1630 = vmatpush.bf16.msrb.mxu3 %v3120_v6  ;;  %v3243_v3 = vld [vmem:[#allocation11 + $0x90] sm:$0xf]  ;;  %v3180_v6 = vor.u32 %v3635_v2, %v3179_v1  ;;  %v3189_v1 = vld [vmem:[#allocation11 + $0x28] sm:$0xf0] }
 0x14d   : > { %v3244_v8 = vor.u32 %v3651_v7, %v3243_v3  ;;  %v3253_v7 = vld [vmem:[#allocation11 + $0xa8] sm:$0xf0] }
 0x14e   : > { %1593 = vmatmul.bf16.vlgmr.msrb.gmra.mxu0 %v4410_v4  ;;  %1607 = vmatmul.bf16.vlgmr.msrb.gmra.mxu1 %v4412_v5  ;;  %v2928_v4 = vor.u32 %v3569_v25, %v2925_v26  ;;  %v3056_v5 = vor.u32 %v3601_v27, %v3053_v29  ;;  %v3660_v25 = vld [vmem:[#allocation11 + $0xe4] sm:$0xf]  ;;  %v3285_v27 = vld [vmem:[#allocation11 + $0xe8] sm:$0xf0] }
 0x14f   : > { %2092 = vmatpush.bf16.msra.mxu0 %v3228_v33  ;;  %2106 = vmatpush.bf16.msra.mxu1 %v3292_v37  ;;  %v3288_v29 = vor.u32 %v3660_v25, %v3285_v27  ;;  %v3213_v33 = vld [vmem:[#allocation11 + $0x58] sm:$0xf0]  ;;  %v3280_v37 = vor.u32 %v3658_v34, %v3277_v36  ;;  %v3650_v27 = vld [vmem:[#allocation11 + $0x94] sm:$0xf]  ;;  %v3689_v36 = vld [vmem:[#allocation11 + $0x1c4] sm:$0xf0] }
 0x150   : > { %1617 = vmatpush.bf16.msrb.mxu2 %v2976_v11  ;;  %1631 = vmatpush.bf16.msrb.mxu3 %v3104_v12  ;;  %v3171_v11 = vld [vmem:[#allocation11] sm:$0xf]  ;;  %v3633_v12 = vld [vmem:[#allocation11 + $0x4] sm:$0xf0]  ;;  %v3216_v35 = vor.u32 %v3642_v32, %v3213_v33 }
 0x151   : > { %v3172_v14 = vor.u32 %v3633_v12, %v3171_v11  ;;  %v1648_v11 = vld [vmem:[#allocation1] sm:$0xff]  ;;  %v1649_v12 = vld [vmem:[#allocation1 + $0x9] sm:$0xff] }
 0x152   : > { %v3331_v32 = vld [vmem:[#allocation11 + $0x140] sm:$0xf]  ;;  %v1655_v33 = vpack.i.b16 %v1649_v12, %v1649_v12 }
 0x153   : > { %2093 = vmatpush.bf16.msra.mxu0 %v3220_v40  ;;  %2107 = vmatpush.bf16.msra.mxu1 %v3284_v41  ;;  %v3656_v40 = vld [vmem:[#allocation11 + $0xc4] sm:$0xf]  ;;  %v3208_v41 = vor.u32 %v3640_v38, %v3205_v39 }
 0x154   : > { %1618 = vmatpush.bf16.msrb.mxu2 %v2960_v17  ;;  %1632 = vmatpush.bf16.msrb.mxu3 %v3088_v18  ;;  %v3236_v17 = vor.u32 %v3649_v15, %v3235_v13  ;;  %v3229_v18 = vld [vmem:[#allocation11 + $0x78] sm:$0xf0]  ;;  %v3339_v15 = vld [vmem:[#allocation11 + $0x150] sm:$0xf] }
 0x155   : > { %v3232_v21 = vor.u32 %v3646_v16, %v3229_v18  ;;  %v3675_v16 = vld [vmem:[#allocation11 + $0x154] sm:$0xf0] }
 0x157   : > { %2108 = vmatpush.bf16.msra.mxu1 %v3276_v47  ;;  %v3356_v47 = vor.u32 %v3679_v45, %v3355_v44 }
 0x158   : > { %1619 = vmatpush.bf16.msrb.mxu2 %v2944_v23  ;;  %1633 = vmatpush.bf16.msrb.mxu3 %v3072_v24  ;;  %v3644_v23 = vld [vmem:[#allocation11 + $0x64] sm:$0xf]  ;;  %v3221_v24 = vld [vmem:[#allocation11 + $0x68] sm:$0xf0] }
 0x159   : > { %v3224_v26 = vor.u32 %v3644_v23, %v3221_v24  ;;  %v3634_v23 = vld [vmem:[#allocation11 + $0x14] sm:$0xf]  ;;  %v3181_v24 = vld [vmem:[#allocation11 + $0x18] sm:$0xf0] }
 0x15b   : > { %2109 = vmatpush.bf16.msra.mxu1 %v3268_v51  ;;  %v3420_v51 = vor.u32 %v3695_v48, %v3419_v46  ;;  %v3323_v48 = vld [vmem:[#allocation11 + $0x130] sm:$0xf] }
 0x15c   : > { %1620 = vmatpush.bf16.msrb.mxu2 %v2928_v4  ;;  %1634 = vmatpush.bf16.msrb.mxu3 %v3056_v5 }
 0x15f   : > { %1621 = vmatmul.bf16.vlgmr.msrb.gmra.mxu2 %v4416_v28  ;;  %1635 = vmatmul.bf16.vlgmr.msrb.gmra.mxu3 %v4418_v52  ;;  %v3643_v28 = vld [vmem:[#allocation11 + $0x54] sm:$0xf0] }
 0x160   : > { %v3212_v52 = vor.u32 %v3643_v28, %v3211_v42  ;;  %2110 = vmatpush.bf16.msra.mxu1 %v3260_v60  ;;  %v3269_v42 = vld [vmem:[#allocation11 + $0xc8] sm:$0xf0]  ;;  %2120 = vmatpush.bf16.msra.mxu2 %v3356_v47  ;;  %v3677_v60 = vld [vmem:[#allocation11 + $0x164] sm:$0xf0] }
 0x161   : > { %v3272_v28 = vor.u32 %v3656_v40, %v3269_v42  ;;  %2134 = vmatpush.bf16.msra.mxu3 %v3420_v51  ;;  %v3348_v62 = vor.u32 %v3677_v60, %v3347_v59  ;;  %v3632_v40 = vld [vmem:[#allocation11 + $0x4] sm:$0xf]  ;;  %v3237_v47 = vld [vmem:[#allocation11 + $0x88] sm:$0xf0]  ;;  %v3388_v60 = vor.u32 %v3687_v55, %v3387_v54  ;;  %v3674_v55 = vld [vmem:[#allocation11 + $0x154] sm:$0xf] }
 0x162   : > { %2094 = vmatpush.bf16.msra.mxu0 %v3212_v52  ;;  %v3648_v42 = vld [vmem:[#allocation11 + $0x84] sm:$0xf] }
 0x164   : > { %2111 = vmatpush.bf16.msra.mxu1 %v3252_v0  ;;  %v3636_v0 = vld [vmem:[#allocation11 + $0x24] sm:$0xf]  ;;  %2121 = vmatpush.bf16.msra.mxu2 %v3348_v62  ;;  %v3669_v62 = vld [vmem:[#allocation11 + $0x124] sm:$0xf0] }
 0x165   : > { %v3192_v3 = vor.u32 %v3636_v0, %v3189_v1  ;;  %v3379_v0 = vld [vmem:[#allocation11 + $0x1a0] sm:$0xf] }
 0x166   : > { %2095 = vmatpush.bf16.msra.mxu0 %v3204_v50  ;;  %v3197_v50 = vld [vmem:[#allocation11 + $0x38] sm:$0xf0] }
 0x167   : > { %v3200_v53 = vor.u32 %v3638_v49, %v3197_v50  ;;  %v3671_v49 = vld [vmem:[#allocation11 + $0x134] sm:$0xf0] }
 0x168   : > { %2112 = vmatpush.bf16.msra.mxu1 %v3244_v8 }
 0x16a   : > { %2096 = vmatpush.bf16.msra.mxu0 %v3196_v56 }
 0x16c   : > { %2113 = vmatpush.bf16.msra.mxu1 %v3236_v17  ;;  %v3403_v17 = vld [vmem:[#allocation11 + $0x1d0] sm:$0xf] }
 0x16e   : > { %2097 = vmatpush.bf16.msra.mxu0 %v3188_v63  ;;  %v3693_v63 = vld [vmem:[#allocation11 + $0x1e4] sm:$0xf0] }
 0x16f   : > { %v3412_v2 = vor.u32 %v3693_v63, %v3411_v61  ;;  %v3315_v61 = vld [vmem:[#allocation11 + $0x120] sm:$0xf] }
 0x170   : > { %2162 = vmatpush.bf16.msrb.mxu1 %v3296_v22  ;;  %v3691_v22 = vld [vmem:[#allocation11 + $0x1d4] sm:$0xf0] }
 0x171   : > { %2135 = vmatpush.bf16.msra.mxu3 %v3412_v2  ;;  %v3404_v25 = vor.u32 %v3691_v22, %v3403_v17  ;;  %v3683_v22 = vld [vmem:[#allocation11 + $0x194] sm:$0xf0] }
 0x172   : > { %2098 = vmatpush.bf16.msra.mxu0 %v3180_v6  ;;  %v3652_v6 = vld [vmem:[#allocation11 + $0xa4] sm:$0xf] }
 0x173   : > { %v3256_v13 = vor.u32 %v3652_v6, %v3253_v7 }
 0x174   : > { %2163 = vmatpush.bf16.msrb.mxu1 %v3288_v29  ;;  %v3245_v29 = vld [vmem:[#allocation11 + $0x98] sm:$0xf0] }
 0x175   : > { %v3248_v34 = vor.u32 %v3650_v27, %v3245_v29  ;;  %2136 = vmatpush.bf16.msra.mxu3 %v3404_v25  ;;  %v3299_v27 = vld [vmem:[#allocation11 + $0x100] sm:$0xf]  ;;  %v3665_v29 = vld [vmem:[#allocation11 + $0x104] sm:$0xf0] }
 0x176   : > { %2099 = vmatpush.bf16.msra.mxu0 %v3172_v14 }
 0x178   : > { %2164 = vmatpush.bf16.msrb.mxu1 %v3280_v37 }
 0x17a   : > { %2148 = vmatpush.bf16.msrb.mxu0 %v3232_v21  ;;  %v3340_v21 = vor.u32 %v3675_v16, %v3339_v15 }
 0x17c   : > { %2165 = vmatpush.bf16.msrb.mxu1 %v3272_v28  ;;  %2122 = vmatpush.bf16.msra.mxu2 %v3340_v21 }
 0x17e   : > { %2149 = vmatpush.bf16.msrb.mxu0 %v3224_v26  ;;  %v3184_v26 = vor.u32 %v3634_v23, %v3181_v24 }
 0x180   : > { %2166 = vmatpush.bf16.msrb.mxu1 %v3264_v58  ;;  %v3324_v58 = vor.u32 %v3671_v49, %v3323_v48  ;;  %v3413_v49 = vld [vmem:[#allocation11 + $0x1e8] sm:$0xf0] }
 0x182   : > { %2150 = vmatpush.bf16.msrb.mxu0 %v3216_v35  ;;  %v3673_v35 = vld [vmem:[#allocation11 + $0x144] sm:$0xf0] }
 0x183   : > { %v3332_v38 = vor.u32 %v3673_v35, %v3331_v32  ;;  %v3300_v32 = vor.u32 %v3665_v29, %v3299_v27  ;;  %v3301_v27 = vld [vmem:[#allocation11 + $0x108] sm:$0xf0] }
 0x184   : > { %2167 = vmatpush.bf16.msrb.mxu1 %v3256_v13 }
 0x185   : > { %2123 = vmatpush.bf16.msra.mxu2 %v3332_v38  ;;  %v3357_v38 = vld [vmem:[#allocation11 + $0x178] sm:$0xf0] }
 0x186   : > { %2151 = vmatpush.bf16.msrb.mxu0 %v3208_v41  ;;  %v3173_v41 = vld [vmem:[#allocation11 + $0x8] sm:$0xf0] }
 0x187   : > { %v3176_v46 = vor.u32 %v3632_v40, %v3173_v41  ;;  %v3421_v41 = vld [vmem:[#allocation11 + $0x1f8] sm:$0xf0] }
 0x188   : > { %2168 = vmatpush.bf16.msrb.mxu1 %v3248_v34  ;;  %v3681_v34 = vld [vmem:[#allocation11 + $0x184] sm:$0xf0] }
 0x189   : > { %2124 = vmatpush.bf16.msra.mxu2 %v3324_v58 }
 0x18a   : > { %v4434_v9 = vpop.f32.mrf.mxu0  ;;  %v4436_v10 = vpop.f32.mrf.mxu1  ;;  %2152 = vmatpush.bf16.msrb.mxu0 %v3200_v53  ;;  %v3240_v53 = vor.u32 %v3648_v42, %v3237_v47  ;;  %v3692_v47 = vld [vmem:[#allocation11 + $0x1e4] sm:$0xf] }
 0x18b   : > { %v1441_v8 = vadd.f32 %v4436_v10, %v4434_v9  ;;  %v1652_v10 = vpack.i.b16 %v1648_v11, %v1648_v11  ;;  %v3416_v54 = vor.u32 %v3692_v47, %v3413_v49 }
 0x18c   : > { %2169 = vmatpush.bf16.msrb.mxu1 %v3240_v53  ;;  %v2206_v53 = vld [vmem:[%s4566_s6] sm:$0x3] }
 0x18d   : > { %v1654_v51 = vperm.slane %v1652_v10, 0 }
 0x18e   : > { %2153 = vmatpush.bf16.msrb.mxu0 %v3192_v3 }
 0x192   : > { %v4442_v30 = vpop.f32.mrf.mxu0  ;;  %v4444_v31 = vpop.f32.mrf.mxu1  ;;  %2154 = vmatpush.bf16.msrb.mxu0 %v3184_v26 }
 0x193   : > { %v1443_v50 = vadd.f32 %v4444_v31, %v4442_v30  ;;  %v3685_v30 = vld [vmem:[#allocation11 + $0x1a4] sm:$0xf0]  ;;  %v1672_v31 = vunpack.c.l.bf16 %v1654_v51 }
 0x194   : > { %v3380_v12 = vor.u32 %v3685_v30, %v3379_v0  ;;  %v4464_v51 = vld [vmem:[#allocation1 + $0x1b] sm:$0xff]  ;;  %v3688_v0 = vld [vmem:[#allocation11 + $0x1c4] sm:$0xf] }
 0x196   : > { %2155 = vmatpush.bf16.msrb.mxu0 %v3176_v46  ;;  %v3349_v46 = vld [vmem:[#allocation11 + $0x168] sm:$0xf0] }
 0x19b   : > { %v1482_v56 = vpop.f32.mrf.mxu0  ;;  %v1496_v57 = vpop.f32.mrf.mxu1 }
 0x19c   : > { %v1497_v14 = vadd.f32 %v1496_v57, %v1482_v56  ;;  %v1657_v57 = vperm.slane %v1655_v33, 0  ;;  %v3363_v33 = vld [vmem:[#allocation11 + $0x180] sm:$0xf] }
 0x19e   : > { %v1673_v6 = vunpack.c.l.bf16 %v1657_v57  ;;  %v3690_v57 = vld [vmem:[#allocation11 + $0x1d4] sm:$0xf] }
 0x1a0   : > { %v4438_v4 = vpop.f32.mrf.mxu2  ;;  %v4440_v5 = vpop.f32.mrf.mxu3 }
 0x1a1   : > { %v1455_v18 = vadd.f32 %v4438_v4, %v1441_v8  ;;  %v3395_v4 = vld [vmem:[#allocation11 + $0x1c0] sm:$0xf]  ;;  %v3316_v8 = vor.u32 %v3669_v62, %v3315_v61  ;;  %v3672_v62 = vld [vmem:[#allocation11 + $0x144] sm:$0xf] }
 0x1a2   : > { %v3396_v39 = vor.u32 %v3689_v36, %v3395_v4  ;;  %v3364_v36 = vor.u32 %v3681_v34, %v3363_v33  ;;  %v3680_v33 = vld [vmem:[#allocation11 + $0x184] sm:$0xf]  ;;  %v3365_v34 = vld [vmem:[#allocation11 + $0x188] sm:$0xf0] }
 0x1a3   : > { %v1469_v28 = vadd.f32 %v4440_v5, %v1455_v18  ;;  %v1484_v44 = vpop.f32.mrf.mxu0  ;;  %v1498_v45 = vpop.f32.mrf.mxu1  ;;  %2125 = vmatpush.bf16.msra.mxu2 %v3316_v8  ;;  %v3307_v18 = vld [vmem:[#allocation11 + $0x110] sm:$0xf]  ;;  %v3686_v8 = vld [vmem:[#allocation11 + $0x1b4] sm:$0xf] }
 0x1a4   : > { %v1499_v5 = vadd.f32 %v1498_v45, %v1484_v44  ;;  %2137 = vmatpush.bf16.msra.mxu3 %v3396_v39  ;;  %v3694_v39 = vld [vmem:[#allocation11 + $0x1f4] sm:$0xf]  ;;  %v3676_v45 = vld [vmem:[#allocation11 + $0x164] sm:$0xf] }
 0x1a5   : > { %v3424_v44 = vor.u32 %v3694_v39, %v3421_v41  ;;  %v3352_v48 = vor.u32 %v3676_v45, %v3349_v46  ;;  %v3368_v41 = vor.u32 %v3680_v33, %v3365_v34 }
 0x1a8   : > { %v4446_v43 = vpop.f32.mrf.mxu2  ;;  %v4448_v52 = vpop.f32.mrf.mxu3  ;;  %2138 = vmatpush.bf16.msra.mxu3 %v3388_v60  ;;  %v3405_v60 = vld [vmem:[#allocation11 + $0x1d8] sm:$0xf0] }
 0x1a9   : > { %v1457_v59 = vadd.f32 %v4446_v43, %v1443_v50  ;;  %v4462_v50 = vld [vmem:[#allocation1 + $0x12] sm:$0xff]  ;;  %v3408_v61 = vor.u32 %v3690_v57, %v3405_v60 }
 0x1aa   : > { %2208 = vst [vmem:[#allocation1] ss:$9 sm:$0xff] %v2206_v53  ;;  %v1658_v39 = vpack.i.b16 %v4462_v50, %v4462_v50 }
 0x1ab   : > { %v1471_v11 = vadd.f32 %v4448_v52, %v1457_v59  ;;  %v4458_v42 = vpop.f32.mrf.mxu0 }
 0x1ac   : > { %2139 = vmatpush.bf16.msra.mxu3 %v3380_v12  ;;  %v1660_v47 = vperm.slane %v1658_v39, 0 }
 0x1b0   : > { %v1510_v19 = vpop.f32.mrf.mxu2  ;;  %v1524_v20 = vpop.f32.mrf.mxu3 }
 0x1b1   : > { %v1511_v9 = vadd.f32 %v1510_v19, %v1497_v14  ;;  %v3667_v19 = vld [vmem:[#allocation11 + $0x114] sm:$0xf0] }
 0x1b2   : > { %v3308_v21 = vor.u32 %v3667_v19, %v3307_v18  ;;  %v3381_v18 = vld [vmem:[#allocation11 + $0x1a8] sm:$0xf0]  ;;  %v2210_v39 = vld [vmem:[#allocation1 + $0x9] sm:$0xff] }
 0x1b3   : > { %v1525_v37 = vadd.f32 %v1524_v20, %v1511_v9  ;;  %v3371_v20 = vld [vmem:[#allocation11 + $0x190] sm:$0xf]  ;;  %v1540_v30 = vpop.f32.mrf.mxu0 }
 0x1b4   : > { %v3372_v9 = vor.u32 %v3683_v22, %v3371_v20  ;;  %2126 = vmatpush.bf16.msra.mxu2 %v3308_v21 }
 0x1b5   : > { %v1641_v56 = vpack.c.bf16 %v1525_v37, %v1469_v28  ;;  %v3678_v37 = vld [vmem:[#allocation11 + $0x174] sm:$0xf]  ;;  %v4460_v28 = vpop.f32.mrf.mxu1 }
 0x1b6   : > { %2140 = vmatpush.bf16.msra.mxu3 %v3372_v9  ;;  %v3360_v40 = vor.u32 %v3678_v37, %v3357_v38  ;;  %v3682_v9 = vld [vmem:[#allocation11 + $0x194] sm:$0xf]  ;;  %v1553_v29 = vadd.f32 %v4460_v28, %v4458_v42 }
 0x1b7   : > { %v1664_v2 = vunpack.c.l.bf16 %v1641_v56  ;;  %v1665_v3 = vunpack.c.h.bf16 %v1641_v56  ;;  %v3341_v56 = vld [vmem:[#allocation11 + $0x158] sm:$0xf0] }
 0x1b8   : > { %v1512_v63 = vpop.f32.mrf.mxu2  ;;  %v1526_v7 = vpop.f32.mrf.mxu3  ;;  %2127 = vmatpush.bf16.msra.mxu2 %v3300_v32  ;;  %v3344_v59 = vor.u32 %v3674_v55, %v3341_v56  ;;  %v1674_v56 = vunpack.c.l.bf16 %v1660_v47 }
 0x1b9   : > { %v1513_v1 = vadd.f32 %v1512_v63, %v1499_v5  ;;  %v1676_v14 = vadd.f32 %v1672_v31, %v1664_v2  ;;  %v1677_v15 = vadd.f32 %v1673_v6, %v1665_v3  ;;  %v3333_v63 = vld [vmem:[#allocation11 + $0x148] sm:$0xf0] }
 0x1ba   : > { %2141 = vmatpush.bf16.msra.mxu3 %v3364_v36  ;;  %v3397_v2 = vld [vmem:[#allocation11 + $0x1c8] sm:$0xf0] }
 0x1bb   : > { %v1527_v43 = vadd.f32 %v1526_v7, %v1513_v1  ;;  %v1696_v10 = vmax.f32 %v1676_v14, 0.0  ;;  %v1697_v52 = vmax.f32 %v1677_v15, 0.0  ;;  %v3336_v1 = vor.u32 %v3672_v62, %v3333_v63  ;;  %v3325_v7 = vld [vmem:[#allocation11 + $0x138] sm:$0xf0]  ;;  %v3317_v14 = vld [vmem:[#allocation11 + $0x128] sm:$0xf0] }
 0x1bc   : > { %2176 = vmatpush.bf16.msrb.mxu2 %v3360_v40  ;;  %v3400_v3 = vor.u32 %v3688_v0, %v3397_v2  ;;  %v3684_v15 = vld [vmem:[#allocation11 + $0x1a4] sm:$0xf]  ;;  %v1661_v40 = vpack.i.b16 %v4464_v51, %v4464_v51 }
 0x1bd   : > { %v1643_v13 = vpack.c.bf16 %v1527_v43, %v1471_v11  ;;  %v3389_v43 = vld [vmem:[#allocation11 + $0x1b8] sm:$0xf0]  ;;  %v3384_v22 = vor.u32 %v3684_v15, %v3381_v18  ;;  %v3701_v15 = vld [vmem:[#allocation13 + $0x28] sm:$0xff]  ;;  %v3708_v18 = vld [vmem:[#allocation13 + $0x60] sm:$0xff] }
 0x1be   : > { %2190 = vmatpush.bf16.msrb.mxu3 %v3424_v44  ;;  %v3392_v12 = vor.u32 %v3686_v8, %v3389_v43  ;;  %v3703_v43 = vld [vmem:[#allocation13 + $0x38] sm:$0xff] }
 0x1bf   : > { %v1668_v16 = vunpack.c.l.bf16 %v1643_v13  ;;  %v1669_v17 = vunpack.c.h.bf16 %v1643_v13  ;;  %v3668_v13 = vld [vmem:[#allocation11 + $0x124] sm:$0xf] }
 0x1c0   : > { %2177 = vmatpush.bf16.msrb.mxu2 %v3352_v48  ;;  %v3320_v19 = vor.u32 %v3668_v13, %v3317_v14  ;;  %v1663_v48 = vperm.slane %v1661_v40, 0  ;;  %v3702_v13 = vld [vmem:[#allocation13 + $0x30] sm:$0xff] }
 0x1c1   : > { %v1680_v23 = vadd.f32 %v1672_v31, %v1668_v16  ;;  %v1681_v24 = vadd.f32 %v1673_v6, %v1669_v17  ;;  %v1554_v31 = vpop.f32.mrf.mxu1  ;;  %v3670_v6 = vld [vmem:[#allocation11 + $0x134] sm:$0xf] }
 0x1c2   : > { %2191 = vmatpush.bf16.msrb.mxu3 %v3416_v54  ;;  %v3328_v11 = vor.u32 %v3670_v6, %v3325_v7  ;;  %v1555_v28 = vadd.f32 %v1554_v31, %v1540_v30  ;;  %v1675_v57 = vunpack.c.l.bf16 %v1663_v48  ;;  %v3710_v14 = vld [vmem:[#allocation13 + $0x70] sm:$0xff] }
 0x1c3   : > { %v1700_v25 = vmax.f32 %v1680_v23, 0.0  ;;  %v1701_v26 = vmax.f32 %v1681_v24, 0.0  ;;  %v3666_v23 = vld [vmem:[#allocation11 + $0x114] sm:$0xf]  ;;  %v3309_v24 = vld [vmem:[#allocation11 + $0x118] sm:$0xf0] }
 0x1c4   : > { %v1566_v58 = vpop.f32.mrf.mxu2  ;;  %v4469_v5 = vpop.f32.mrf.mxu3  ;;  %2178 = vmatpush.bf16.msrb.mxu2 %v3344_v59 }
 0x1c5   : > { %v1704_v35 = vpack.c.bf16 %v1700_v25, %v1696_v10  ;;  %v1705_v4 = vpack.c.bf16 %v1701_v26, %v1697_v52  ;;  %v3373_v10 = vld [vmem:[#allocation11 + $0x198] sm:$0xf0]  ;;  %v3312_v52 = vor.u32 %v3666_v23, %v3309_v24  ;;  %v3664_v26 = vld [vmem:[#allocation11 + $0x104] sm:$0xf]  ;;  %v1567_v36 = vadd.f32 %v1566_v58, %v1553_v29  ;;  %v3698_v23 = vld [vmem:[#allocation13 + $0x10] sm:$0xff] }
 0x1c6   : > { %2192 = vmatpush.bf16.msrb.mxu3 %v3408_v61  ;;  %v3376_v25 = vor.u32 %v3682_v9, %v3373_v10  ;;  %v3304_v38 = vor.u32 %v3664_v26, %v3301_v27  ;;  %v3706_v24 = vld [vmem:[#allocation13 + $0x50] sm:$0xff]  ;;  %v3697_v9 = vld [vmem:[#allocation13 + $0x8] sm:$0xff]  ;;  %v3696_v29 = vld [vmem:[#allocation13] sm:$0xff] }
 0x1c7   : > { %2100 = vmatmul.bf16.vlgmr.msra.gmra.mxu0 %v1704_v35  ;;  %2114 = vmatmul.bf16.vlgmr.msra.gmra.mxu1 %v1705_v4  ;;  %v1581_v46 = vadd.f32 %v4469_v5, %v1567_v36  ;;  %v3705_v10 = vld [vmem:[#allocation13 + $0x48] sm:$0xff] }
 0x1c8   : > { %2179 = vmatpush.bf16.msrb.mxu2 %v3336_v1  ;;  %2371 = vmatpush.bf16.msra.mxu0 %v3703_v43 }
 0x1ca   : > { %2193 = vmatpush.bf16.msrb.mxu3 %v3400_v3 }
 0x1cb   : > { %v1594_v20 = vpop.f32.mrf.mxu0  ;;  %v1608_v21 = vpop.f32.mrf.mxu1 }
 0x1cc   : > { %v1568_v16 = vpop.f32.mrf.mxu2  ;;  %v1582_v17 = vpop.f32.mrf.mxu3  ;;  %2180 = vmatpush.bf16.msrb.mxu2 %v3328_v11  ;;  %v1609_v32 = vadd.f32 %v1608_v21, %v1594_v20  ;;  %2372 = vmatpush.bf16.msra.mxu0 %v3702_v13  ;;  %v3699_v21 = vld [vmem:[#allocation13 + $0x18] sm:$0xff] }
 0x1cd   : > { %v1569_v49 = vadd.f32 %v1568_v16, %v1555_v28  ;;  %v3709_v16 = vld [vmem:[#allocation13 + $0x68] sm:$0xff]  ;;  %v2214_v28 = vpack.i.b16 %v2210_v39, %v2210_v39 }
 0x1ce   : > { %2194 = vmatpush.bf16.msrb.mxu3 %v3392_v12  ;;  %v3711_v12 = vld [vmem:[#allocation13 + $0x78] sm:$0xff] }
 0x1cf   : > { %v1583_v58 = vadd.f32 %v1582_v17, %v1569_v49  ;;  %2385 = vmatpush.bf16.msra.mxu1 %v3711_v12  ;;  %v3700_v17 = vld [vmem:[#allocation13 + $0x20] sm:$0xff] }
 0x1d0   : > { %2181 = vmatpush.bf16.msrb.mxu2 %v3320_v19  ;;  %2373 = vmatpush.bf16.msra.mxu0 %v3701_v15  ;;  %v2399_v15 = vlaneseq }
 0x1d2   : > { %2195 = vmatpush.bf16.msrb.mxu3 %v3384_v22  ;;  %v3707_v22 = vld [vmem:[#allocation13 + $0x58] sm:$0xff] }
 0x1d3   : > { %v1596_v45 = vpop.f32.mrf.mxu0  ;;  %v1610_v42 = vpop.f32.mrf.mxu1  ;;  %2386 = vmatpush.bf16.msra.mxu1 %v3710_v14 }
 0x1d4   : > { %2182 = vmatpush.bf16.msrb.mxu2 %v3312_v52  ;;  %v1611_v53 = vadd.f32 %v1610_v42, %v1596_v45  ;;  %2374 = vmatpush.bf16.msra.mxu0 %v3700_v17  ;;  %v4481_v17 = vand.u32 127, %v2399_v15 }
 0x1d6   : > { %2196 = vmatpush.bf16.msrb.mxu3 %v3376_v25  ;;  %vm2401_vm2 = vcmp.lt.s32.totalorder %v4481_v17, 11  ;;  %vm2450_vm7 = vcmp.eq.s32.totalorder %v4481_v17, 11 }
 0x1d7   : > { %2156 = vmatmul.bf16.vlgmr.msrb.gmra.mxu0 %v1704_v35  ;;  %2170 = vmatmul.bf16.vlgmr.msrb.gmra.mxu1 %v1705_v4 }
 0x1d8   : > { %2183 = vmatpush.bf16.msrb.mxu2 %v3304_v38  ;;  %2387 = vmatpush.bf16.msra.mxu1 %v3709_v16  ;;  %v2209_v38 = vld [vmem:[#allocation1] sm:$0xff] }
 0x1d9   : > { %2375 = vmatpush.bf16.msra.mxu0 %v3699_v21  ;;  %v2211_v42 = vpack.i.b16 %v2209_v38, %v2209_v38  ;;  %v3823_v16 = vld [vmem:[%s4568_s8] ss:$0 sm:$0xff] }
 0x1da   : > { %2197 = vmatpush.bf16.msrb.mxu3 %v3368_v41 }
 0x1dc   : > { %2388 = vmatpush.bf16.msra.mxu1 %v3708_v18 }
 0x1dd   : > { %2376 = vmatpush.bf16.msra.mxu0 %v3698_v23 }
 0x1e0   : > { %2389 = vmatpush.bf16.msra.mxu1 %v3707_v22 }
 0x1e1   : > { %2377 = vmatpush.bf16.msra.mxu0 %v3697_v9 }
 0x1e2   : > { %v1622_v35 = vpop.f32.mrf.mxu2  ;;  %v1636_v4 = vpop.f32.mrf.mxu3 }
 0x1e3   : > { %v1623_v37 = vadd.f32 %v1622_v35, %v1609_v32  ;;  %v3704_v32 = vld [vmem:[#allocation13 + $0x40] sm:$0xff] }
 0x1e4   : > { %2390 = vmatpush.bf16.msra.mxu1 %v3706_v24 }
 0x1e5   : > { %v1637_v44 = vadd.f32 %v1636_v4, %v1623_v37  ;;  %2378 = vmatpush.bf16.msra.mxu0 %v3696_v29 }
 0x1e7   : > { %v1642_v54 = vpack.c.bf16 %v1637_v44, %v1581_v46 }
 0x1e8   : > { %2391 = vmatpush.bf16.msra.mxu1 %v3705_v10 }
 0x1e9   : > { %v1666_v59 = vunpack.c.l.bf16 %v1642_v54  ;;  %v1667_v60 = vunpack.c.h.bf16 %v1642_v54  ;;  %v2213_v54 = vperm.slane %v2211_v42, 0 }
 0x1ea   : > { %v1624_v55 = vpop.f32.mrf.mxu2  ;;  %v1638_v51 = vpop.f32.mrf.mxu3 }
 0x1eb   : > { %v1625_v50 = vadd.f32 %v1624_v55, %v1611_v53  ;;  %v1678_v63 = vadd.f32 %v1674_v56, %v1666_v59  ;;  %v1679_v0 = vadd.f32 %v1675_v57, %v1667_v60  ;;  %v2216_v55 = vperm.slane %v2214_v28, 0 }
 0x1ec   : > { %2392 = vmatpush.bf16.msra.mxu1 %v3704_v32  ;;  %v2221_v59 = vunpack.c.l.bf16 %v2213_v54 }
 0x1ed   : > { %v1639_v61 = vadd.f32 %v1638_v51, %v1625_v50  ;;  %v1698_v2 = vmax.f32 %v1678_v63, 0.0  ;;  %v1699_v3 = vmax.f32 %v1679_v0, 0.0  ;;  %v2222_v60 = vunpack.c.l.bf16 %v2216_v55 }
 0x1ef   : > { %v1644_v62 = vpack.c.bf16 %v1639_v61, %v1583_v58 }
 0x1f1   : > { %v1670_v5 = vunpack.c.l.bf16 %v1644_v62  ;;  %v1671_v30 = vunpack.c.h.bf16 %v1644_v62 }
 0x1f3   : > { %v1682_v31 = vadd.f32 %v1674_v56, %v1670_v5  ;;  %v1683_v1 = vadd.f32 %v1675_v57, %v1671_v30 }
 0x1f5   : > { %v1702_v6 = vmax.f32 %v1682_v31, 0.0  ;;  %v1703_v7 = vmax.f32 %v1683_v1, 0.0 }
 0x1f7   : > { %v1706_v8 = vpack.c.bf16 %v1702_v6, %v1698_v2  ;;  %v1707_v11 = vpack.c.bf16 %v1703_v7, %v1699_v3 }
 0x1f9   : > { %2128 = vmatmul.bf16.vlgmr.msra.gmra.mxu2 %v1706_v8  ;;  %2142 = vmatmul.bf16.vlgmr.msra.gmra.mxu3 %v1707_v11 }
 0x209   : > { %2184 = vmatmul.bf16.vlgmr.msrb.gmra.mxu2 %v1706_v8  ;;  %2198 = vmatmul.bf16.vlgmr.msrb.gmra.mxu3 %v1707_v11 }
 0x244   : > { %v2101_v19 = vpop.f32.mrf.mxu0  ;;  %v2115_v20 = vpop.f32.mrf.mxu1 }
 0x245   : > { %v2116_v36 = vadd.f32 %v2115_v20, %v2101_v19 }
 0x24c   : > { %v2103_v52 = vpop.f32.mrf.mxu0  ;;  %v2117_v25 = vpop.f32.mrf.mxu1 }
 0x24d   : > { %v2118_v49 = vadd.f32 %v2117_v25, %v2103_v52 }
 0x254   : > { %v2157_v35 = vpop.f32.mrf.mxu0  ;;  %v2171_v4 = vpop.f32.mrf.mxu1 }
 0x255   : > { %v2172_v37 = vadd.f32 %v2171_v4, %v2157_v35 }
 0x25c   : > { %v2159_v47 = vpop.f32.mrf.mxu0  ;;  %v2173_v48 = vpop.f32.mrf.mxu1 }
 0x25d   : > { %v2174_v50 = vadd.f32 %v2173_v48, %v2159_v47 }
 0x27c   : > { %v2129_v26 = vpop.f32.mrf.mxu2  ;;  %v2143_v27 = vpop.f32.mrf.mxu3 }
 0x27d   : > { %v2130_v44 = vadd.f32 %v2129_v26, %v2116_v36 }
 0x27f   : > { %v2144_v53 = vadd.f32 %v2143_v27, %v2130_v44 }
 0x284   : > { %v2131_v33 = vpop.f32.mrf.mxu2  ;;  %v2145_v34 = vpop.f32.mrf.mxu3 }
 0x285   : > { %v2132_v56 = vadd.f32 %v2131_v33, %v2118_v49 }
 0x287   : > { %v2146_v62 = vadd.f32 %v2145_v34, %v2132_v56 }
 0x28c   : > { %v2185_v40 = vpop.f32.mrf.mxu2  ;;  %v2199_v41 = vpop.f32.mrf.mxu3 }
 0x28d   : > { %v2186_v45 = vadd.f32 %v2185_v40, %v2172_v37 }
 0x28f   : > { %v2200_v46 = vadd.f32 %v2199_v41, %v2186_v45 }
 0x291   : > { %v2204_v57 = vpack.c.bf16 %v2200_v46, %v2144_v53 }
 0x293   : > { %v2217_v63 = vunpack.c.l.bf16 %v2204_v57  ;;  %v2218_v0 = vunpack.c.h.bf16 %v2204_v57 }
 0x294   : > { %v2187_v51 = vpop.f32.mrf.mxu2  ;;  %v2201_v61 = vpop.f32.mrf.mxu3 }
 0x295   : > { %v2188_v58 = vadd.f32 %v2187_v51, %v2174_v50  ;;  %v2223_v31 = vadd.f32 %v2221_v59, %v2217_v63  ;;  %v2224_v1 = vadd.f32 %v2222_v60, %v2218_v0 }
 0x297   : > { %v2202_v5 = vadd.f32 %v2201_v61, %v2188_v58  ;;  %v2233_v8 = vmax.f32 %v2223_v31, 0.0  ;;  %v2234_v11 = vmax.f32 %v2224_v1, 0.0 }
 0x299   : > { %v2205_v30 = vpack.c.bf16 %v2202_v5, %v2146_v62 }
 0x29b   : > { %v2219_v2 = vunpack.c.l.bf16 %v2205_v30  ;;  %v2220_v3 = vunpack.c.h.bf16 %v2205_v30 }
 0x29d   : > { %v2225_v6 = vadd.f32 %v2221_v59, %v2219_v2  ;;  %v2226_v7 = vadd.f32 %v2222_v60, %v2220_v3 }
 0x29f   : > { %v2235_v43 = vmax.f32 %v2225_v6, 0.0  ;;  %v2236_v12 = vmax.f32 %v2226_v7, 0.0 }
 0x2a1   : > { %v2237_v13 = vpack.c.bf16 %v2235_v43, %v2233_v8  ;;  %v2238_v14 = vpack.c.bf16 %v2236_v12, %v2234_v11 }
 0x2a3   : > { %2379 = vmatmul.bf16.vlgmr.msra.gmra.mxu0 %v2237_v13  ;;  %2393 = vmatmul.bf16.vlgmr.msra.gmra.mxu1 %v2238_v14 }
 0x320   : > { %v2380_v18 = vpop.f32.mrf.mxu0  ;;  %v2394_v19 = vpop.f32.mrf.mxu1 }
 0x321   : > { %v2381_v20 = vadd.f32 %v3823_v16, %v2380_v18 }
 0x323   : > { %v2395_v21 = vadd.f32 %v2394_v19, %v2381_v20 }
 0x325   : > { %v2402_v22 = vsel %vm2401_vm2, %v2395_v21, -1e+30 }
 0x326   : > { %2404 = vmax.xlane.f32.xlu0 %v2402_v22 }
 0x328   : > { %v2382_v23 = vpop.f32.mrf.mxu0  ;;  %v2396_v9 = vpop.f32.mrf.mxu1 }
 0x329   : > { %v2383_v24 = vadd.f32 %v3823_v16, %v2382_v23 }
 0x32b   : > { %v2397_v10 = vadd.f32 %v2396_v9, %v2383_v24 }
 0x32d   : > { %v2403_v52 = vsel %vm2401_vm2, %v2397_v10, -1e+30 }
 0x32e   : > { %2406 = vmax.xlane.f32.xlu0 %v2403_v52 }
 0x399   : > { %v2405_v25 = vpop.xlane.xlu0 %2404 }
 0x39a   : > { %v2408_v26 = vsub.f32 %v2402_v22, %v2405_v25 }
 0x39c   : > { %v2410_v27 = vmul.f32 1.442695, %v2408_v26 }
 0x39e   : > { %3824 = vpow2.f32 %v2410_v27 }
 0x3a1   : > { %v2407_v29 = vpop.xlane.xlu0 %2406 }
 0x3a2   : > { %v2409_v32 = vsub.f32 %v2403_v52, %v2407_v29 }
 0x3a4   : > { %v3825_v33 = vpop.eup %3824  ;;  %v2412_v34 = vmul.f32 1.442695, %v2409_v32 }
 0x3a5   : > { %v2414_v35 = vsel %vm2401_vm2, %v3825_v33, 0.0 }
 0x3a6   : > { %3826 = vpow2.f32 %v2412_v34  ;;  %2416 = vadd.xlane.f32.xlu1 %v2414_v35 }
 0x3ac   : > { %v3827_v4 = vpop.eup %3826 }
 0x3ad   : > { %v2415_v36 = vsel %vm2401_vm2, %v3827_v4, 0.0 }
 0x3ae   : > { %2418 = vadd.xlane.f32.xlu1 %v2415_v36 }
 0x419   : > { %v2417_v37 = vpop.xlane.xlu1 %2416 }
 0x41a   : > { %3828 = vrcp.f32 %v2417_v37  ;;  %v2431_v44 = vand.u32 2147483648, %v2417_v37  ;;  %v2429_v42 = vand.u32 2147483647, %v2417_v37  ;;  %vm2425_vm4 = vweird.f32 %v2417_v37 }
 0x41c   : > { %v2432_v47 = vor.u32 1.1754944e-38, %v2431_v44  ;;  %vm2430_vm6 = vcmp.eq.f32.partialorder %v2429_v42, 8.507059e+37 }
 0x420   : > { %v3829_v38 = vpop.eup %3828 }
 0x421   : > { %v2421_v39 = vmul.f32 %v3829_v38, %v2417_v37  ;;  %v2419_v40 = vpop.xlane.xlu1 %2418  ;;  %vm2426_vm3 = vweird.f32 %v3829_v38 }
 0x422   : > { %3830 = vrcp.f32 %v2419_v40  ;;  %vm2427_vm5 = vmor %vm2425_vm4, %vm2426_vm3  ;;  %v2446_v50 = vand.u32 2147483648, %v2419_v40  ;;  %v2444_v51 = vand.u32 2147483647, %v2419_v40  ;;  %vm2440_vm9 = vweird.f32 %v2419_v40 }
 0x423   : > { %v2422_v41 = vsub.f32 1.0, %v2421_v39 }
 0x424   : > { %v2447_v59 = vor.u32 1.1754944e-38, %v2446_v50  ;;  %vm2445_vm11 = vcmp.eq.f32.partialorder %v2444_v51, 8.507059e+37 }
 0x425   : > { %v2423_v45 = vmul.f32 %v3829_v38, %v2422_v41 }
 0x427   : > { %v2424_v28 = vadd.f32 %v3829_v38, %v2423_v45 }
 0x428   : > { %v3831_v46 = vpop.eup %3830 }
 0x429   : > { %v2428_v48 = vsel %vm2427_vm5, %v3829_v38, %v2424_v28  ;;  %v2436_v49 = vmul.f32 %v3831_v46, %v2419_v40  ;;  %vm2441_vm8 = vweird.f32 %v3831_v46 }
 0x42a   : > { %v2433_v53 = vsel %vm2430_vm6, %v2432_v47, %v2428_v48  ;;  %vm2442_vm10 = vmor %vm2440_vm9, %vm2441_vm8 }
 0x42b   : > { %v2434_v54 = vmul.f32 %v2433_v53, %v2414_v35  ;;  %v2437_v55 = vsub.f32 1.0, %v2436_v49 }
 0x42d   : > { %v2451_v56 = vsel %vm2450_vm7, %v2395_v21, %v2434_v54  ;;  %v2438_v57 = vmul.f32 %v3831_v46, %v2437_v55 }
 0x42e   : > { %2453 = vst [vmem:[%s454_s18] sm:$0xff] %v2451_v56 }
 0x42f   : > { %v2439_v58 = vadd.f32 %v3831_v46, %v2438_v57 }
 0x431   : > { %v2443_v60 = vsel %vm2442_vm10, %v3831_v46, %v2439_v58 }
 0x432   : > { %v2448_v61 = vsel %vm2445_vm11, %v2447_v59, %v2443_v60  ;;  %2462 = sbr.rel (!%p4262_p11) target bundleno = 1110 (0x456), region = 88 }
 0x433   : > { %v2449_v62 = vmul.f32 %v2448_v61, %v2415_v36 }
 0x435   : > { %v2452_v63 = vsel %vm2450_vm7, %v2397_v10, %v2449_v62 }
 0x436   : > { %2454 = vst [vmem:[%s454_s18 + $0x8] sm:$0xff] %v2452_v63 }
 0x437   : > { %s4615_s15 = smov (!%p2465_p6, %s2464_s15), 2 }
 0x438   : > { %s3491_s17 = sshll.u32 %s4615_s15, 3 }
 0x439   : > { %s2468_s24 = ssub.s32 16, %s3491_s17 }
 0x43a   : > { %s2469_s25 = sshll.u32 %s2468_s24, 4 }
 0x43b   : > { %2470 = vsyncadd %s2456_s14, %s2469_s25  ;;  %p4507_p10 = scmp.ne.s32.totalorder %s3491_s17, 0  ;;  %s3712_s21 = sshll.u32 %s4231_s13, 4 }
 0x43c   : > { %s4602_s9 = sld [smem:[#allocation27_spill]]  ;;  %s2475_s29 = sshll.u32 %s454_s18, 4  ;;  %s4515_s29 = int_to_ptr.vmem [resolvable:$true] %s2475_s29 }
 0x43d   : > { %s3495_s20 = sshll.u32 %s4615_s15, 7  ;;  %s4051_s23 = sshra.s32 %s4515_s29, 4  ;;  %s4052_s23 = int_to_ptr.vmem [resolvable:$true] %s4051_s23 }
 0x43e   : > { %s4053_s1 = sshrl.u32 %s3495_s20, 4  ;;  %s4157_s13 = smov [#allocation14]  }
 0x43f   : > { %s4058_s22 = scalar_lea.vmem %s4052_s23, %s4053_s1  ;;  %s4062_s19 = scalar_lea.vmem %s4157_s13, 32 }
 0x440   : > { %p4059_p11 = scmp.ne.s32.totalorder %s4052_s23, %s4058_s22  ;;  %p4064_p3 = scmp.lt.s32.totalorder %s4062_s19, %s4058_s22 }
 0x442   : > { %s2473_s28 = scalar_lea.hbm %s4602_s9, %s3712_s21  ;;  %p4060_p1 = pnand %p4059_p11, %p4507_p10 }
 0x443   : > { %s2477_s27 = sshll.u32 %s2473_s28, 4  ;;  %s4517_s27 = int_to_ptr.hbm [resolvable:$true] %s2477_s27 }
 0x444   : > { %p4061_p0 = pneg %p4060_p1 }
 0x446   : > { %p4066_p7 = pnand %p4064_p3, %p4061_p0 }
 0x448   : > { %4069 = shalt.err (!%p4066_p7)
}
 0x449   : > { %s4070_s18 = sshra.s32 %s4517_s27, 4  ;;  %s4081_s25 = scalar_lea.hbm %s4602_s9, 24  ;;  %s4071_s18 = int_to_ptr.hbm [resolvable:$true] %s4070_s18 }
 0x44a   : > { %s4077_s16 = scalar_lea.hbm %s4071_s18, %s4053_s1  ;;  %p4082_p13 = scmp.lt.s32.totalorder %s4071_s18, %s4602_s9 }
 0x44b   : > { %p4078_p8 = scmp.ne.s32.totalorder %s4071_s18, %s4077_s16  ;;  %p4083_p2 = scmp.lt.s32.totalorder %s4081_s25, %s4077_s16 }
 0x44d   : > { %p4079_p4 = pnand %p4078_p8, %p4507_p10  ;;  %p4084_p5 = por %p4083_p2, %p4082_p13 }
 0x44f   : > { %p4080_p12 = pneg %p4079_p4 }
 0x451   : > { %p4085_p9 = pnand %p4084_p5, %p4080_p12 }
 0x453   : > { %4088 = shalt.err (!%p4085_p9)
}
 0x454   : > { %s4158_s26 = smov 128   ;;  %s4159_s28 = smov 8  }
 0x455   : > { %2483 = dma.vmem_to_hbm [thread:$0]  (%p4507_p10), %s4515_s29, %s3495_s20, %s4517_s27, %s2456_s14, %s4158_s26, %s4158_s26, %s4159_s28  }
 0x456 PF: > { %s4603_s23 = sld [smem:[#allocation20_spill]]  ;;  %p4606_p11 = scmp.ge.s32.totalorder %s4140_s12, 2 }
 0x457   : > { %s4604_s1 = sld [smem:[#allocation23_spill]] }
 0x45c   : > { %s2492_s22 = sand.u32 1, %s4603_s23  }
 0x45d   : > { %p4605_p6 = scmp.ne.s32.totalorder %s4604_s1, 0  ;;  %s2493_s13 = scalar_lea.sflag [#allocation4], %s2492_s22 }
 0x45f   : > { %p3759_p1 = pnand %p4606_p11, %p4605_p6 }
 0x461   : > { %p3760_p0 = pneg %p3759_p1 }
 0x463   : > { %4123 = dma.done.wait (%p3760_p0), %s2493_s13, 256  }
 0x464   : > { %4125 = vsyncadd (%p3760_p0), %s2493_s13, 4294967040  ;;  %s4607_s12 = sld [smem:[#allocation21_spill]]  ;;  %s4609_s30 = smov %s4132_s10 }
 0x465   : > { %s4608_s3 = sld [smem:[#allocation22_spill]]  ;;  %s4610_s10 = smov %s4136_s11 }
 0x46a   : > { %p25_p3 = scmp.ge.s32.totalorder %s4607_s12, 4  }
 0x46b   : > { %s4611_s11 = smov %s4608_s3 }
 0x46c   :  { %27 = sbr.rel (!%p25_p3) target bundleno = 13 (0xd), region = 125 }
 0x471   :  { %2499 = vsyncpa [#allocation3], 1 }
 0x472   :  { %2501 = vsyncpa [#allocation3 + $0x1], 1 }
 0x473   :  { %2502 = vsyncpa [#allocation6], 1 }
 0x474   :  { %2503 = vsyncpa [#allocation9], 1 }
 0x475   :  { %2504 = vsyncpa [#allocation12], 1 }
 0x476   :  { %2505 = vsyncpa [#allocation4], 1 }
 0x477   :  { %2507 = vsyncpa [#allocation4 + $0x1], 1 }

// kernel: tpu_custom_call.1
= control target key start
LH: loop header
LB: loop body
LE: loop exit
PB: predicated region body
PF: predicated region fallthrough
CT: control target
= control target key end

     0   :  { %s4560_s0 = inlined_call_operand.hbm [shape: bf16[20,24], index: 0, kind: input, shape index: {}]   ;;  %s4561_s1 = inlined_call_operand.hbm [shape: bf16[24,512], index: 1, kind: input, shape index: {}]   ;;  %s4562_s2 = inlined_call_operand.hbm [shape: bf16[1,512], index: 2, kind: input, shape index: {}]   ;;  %s4563_s3 = inlined_call_operand.hbm [shape: bf16[512,512], index: 3, kind: input, shape index: {}]   ;;  %s4564_s4 = inlined_call_operand.hbm [shape: bf16[1,512], index: 4, kind: input, shape index: {}]   ;;  %s4565_s5 = inlined_call_operand.hbm [shape: bf16[512,256], index: 5, kind: input, shape index: {}]   ;;  %s4566_s6 = inlined_call_operand.vmem [shape: bf16[1,256], index: 6, kind: input, shape index: {}]   ;;  %s4567_s7 = inlined_call_operand.hbm [shape: bf16[256,128], index: 7, kind: input, shape index: {}]   ;;  %s4568_s8 = inlined_call_operand.vmem [shape: f32[1,128], index: 8, kind: input, shape index: {}]   ;;  %s4569_s9 = inlined_call_operand.hbm [shape: f32[20,128], index: 9, kind: output, shape index: {}]  }
   0x1   :  { %4577 = sst [smem:[#allocation24_spill]] %s4561_s1 }
   0x2   :  { %4578 = sst [smem:[#allocation25_spill]] %s4563_s3 }
   0x3   :  { %4579 = sst [smem:[#allocation26_spill]] %s4565_s5 }
   0x4   :  { %4580 = sst [smem:[#allocation27_spill]] %s4569_s9 }
   0x5   :  { %14 = vsyncpa [#allocation3], 0 }
   0x6   :  { %16 = vsyncpa [#allocation3 + $0x1], 0 }
   0x7   :  { %17 = vsyncpa [#allocation6], 0 }
   0x8   :  { %18 = vsyncpa [#allocation9], 0 }
   0x9   :  { %19 = vsyncpa [#allocation12], 0 }
   0xa   :  { %20 = vsyncpa [#allocation4], 0 }
   0xb   :  { %22 = vsyncpa [#allocation4 + $0x1], 0  ;;  %s4210_s30 = smov 0   ;;  %s4212_s10 = smov 0  }
   0xc   :  { %s4214_s11 = smov 0   ;;  %s4216_s12 = smov 0  }
   0xd LB: > { %4581 = sst [smem:[#allocation20_spill]] %s4128_s30  ;;  %s4231_s13 = sadd.s32 4294967295, %s4140_s12   ;;  %s4140_s12 = sphi %s4216_s12, %s4607_s12   ;;  %s4136_s11 = sphi %s4214_s11, %s4611_s11   ;;  %s4132_s10 = sphi %s4212_s10, %s4610_s10   ;;  %s4128_s30 = sphi %s4210_s30, %s4609_s30  }
   0xe   : > { %s2608_s14 = sadd.s32 4294967294, %s4140_s12   ;;  %s4235_s15 = sadd.s32 1, %s4140_s12  }
   0xf   : > { %4582 = sst [smem:[#allocation21_spill]] %s4235_s15  ;;  %s35_s16 = sadd.s32 1, %s4136_s11 }
  0x10   : > { %s32_s17 = ssub.s32 %s4140_s12, %s4235_s15  ;;  %p42_p0 = scmp.ne.s32.totalorder %s4136_s11, %s4132_s10 }
  0x11   : > { %p33_p1 = scmp.eq.s32.totalorder %s32_s17, 0  ;;  %p43_p2 = scmp.eq.s32.totalorder %s4140_s12, 0 }
  0x12   : > { %p48_p3 = scmp.ne.s32.totalorder %s4132_s10, %s4128_s30  ;;  %p4576_p4 = scmp.eq.s32.totalorder %s4231_s13, 0 }
  0x13   : > { %s4247_s18 = scalar_select %p33_p1, %s4136_s11, %s35_s16  }
  0x14   : > { %p4249_p5 = por %p43_p2, %p42_p0  ;;  %p4255_p6 = por %p4576_p4, %p48_p3 }
  0x15   : > { %4583 = sst [smem:[#allocation22_spill]] %s4247_s18  ;;  %p240_p7 = scmp.eq.s32.totalorder %s4231_s13, 1 }
  0x16   : > { %p246_p8 = scmp.eq.s32.totalorder %s2608_s14, 1  ;;  %p2609_p9 = scmp.ge.s32.totalorder %s4140_s12, 1 }
  0x17   : > { %p253_p10 = scmp.lt.s32.totalorder %s4140_s12, 3  ;;  %p4262_p11 = por %p240_p7, %p42_p0 }
  0x18   : > { %p4266_p12 = por %p246_p8, %p48_p3  ;;  %s4590_s1 = sld [smem:[#allocation24_spill]] }
  0x19   : > { %p4270_p13 = pnand %p2609_p9, %p253_p10  ;;  %s4142_s27 = smov [#allocation5]  }
  0x1a   : > { %s4587_s22 = scalar_select %p4266_p12, 1, 0 }
  0x1b   : > { %p3739_p1 = pneg %p4270_p13  ;;  %s266_s28 = sshll.u32 %s4142_s27, 4  ;;  %s267_s28 = int_to_ptr.vmem [resolvable:$true] %s266_s28 }
  0x1c   : > { %4588 = sst [smem:[#allocation23_spill]] %s4587_s22  ;;  %s4143_s24 = smov 256  }
  0x1d   : > { %p4281_p0 = pnand %p3739_p1, %p4576_p4  ;;  %s4592_s3 = sld [smem:[#allocation25_spill]] }
  0x1e   : > { %s264_s26 = sshll.u32 %s4590_s1, 4  ;;  %s4144_s25 = smov 16   ;;  %s265_s26 = int_to_ptr.hbm [resolvable:$true] %s264_s26 }
  0x1f   : > { %3742 = dma.hbm_to_vmem [thread:$0]  (!%p4281_p0), %s265_s26, 768, %s267_s28, [#allocation6], %s4143_s24, %s4143_s24, %s4144_s25  }
  0x20   : > { %s4593_s5 = sld [smem:[#allocation26_spill]]  ;;  %s4145_s15 = smov [#allocation8]  }
  0x21   : > { %s292_s22 = sshll.u32 %s4145_s15, 4  ;;  %s4146_s14 = smov [#allocation11]   ;;  %s293_s22 = int_to_ptr.vmem [resolvable:$true] %s292_s22 }
  0x22   : > { %s318_s16 = sshll.u32 %s4146_s14, 4  ;;  %s4148_s30 = smov 8   ;;  %s319_s16 = int_to_ptr.vmem [resolvable:$true] %s318_s16 }
  0x23   : > { %s290_s17 = sshll.u32 %s4592_s3, 4  ;;  %s4147_s3 = smov 128   ;;  %s291_s17 = int_to_ptr.hbm [resolvable:$true] %s290_s17 }
  0x24   : > { %3748 = dma.hbm_to_vmem [thread:$0]  (!%p4281_p0), %s291_s17, 16384, %s293_s22, [#allocation9], %s4143_s24, %s4143_s24, %s4144_s25  }
  0x25   : > { %s279_s1 = sshll.u32 %s4562_s2, 4  ;;  %s4149_s27 = smov [#allocation7]   ;;  %s280_s1 = int_to_ptr.hbm [resolvable:$true] %s279_s1 }
  0x26   : > { %s316_s18 = sshll.u32 %s4593_s5, 4  ;;  %s281_s15 = sshll.u32 %s4149_s27, 4  ;;  %s317_s18 = int_to_ptr.hbm [resolvable:$true] %s316_s18  ;;  %s282_s15 = int_to_ptr.vmem [resolvable:$true] %s281_s15 }
  0x27   : > { %3754 = dma.hbm_to_vmem [thread:$0]  (!%p4281_p0), %s317_s18, 8192, %s319_s16, [#allocation12], %s4147_s3, %s4147_s3, %s4148_s30  }
  0x28   : > { %s305_s22 = sshll.u32 %s4564_s4, 4  ;;  %s4150_s17 = smov [#allocation10]   ;;  %s306_s22 = int_to_ptr.hbm [resolvable:$true] %s305_s22 }
  0x29   : > { %3745 = dma.hbm_to_vmem [thread:$0]  (!%p4281_p0), %s280_s1, 64, %s282_s15, [#allocation6]  }
  0x2a   : > { %s307_s24 = sshll.u32 %s4150_s17, 4  ;;  %s333_s30 = sshll.u32 %s4567_s7, 4  ;;  %s308_s24 = int_to_ptr.vmem [resolvable:$true] %s307_s24  ;;  %s334_s30 = int_to_ptr.hbm [resolvable:$true] %s333_s30 }
  0x2b   : > { %3751 = dma.hbm_to_vmem [thread:$0]  (!%p4281_p0), %s306_s22, 64, %s308_s24, [#allocation9]  }
  0x2c   : > { %s4151_s18 = smov [#allocation13]   ;;  %s4152_s16 = smov 64  }
  0x2d   : > { %s335_s14 = sshll.u32 %s4151_s18, 4  ;;  %s4153_s26 = smov 4   ;;  %s336_s14 = int_to_ptr.vmem [resolvable:$true] %s335_s14 }
  0x2e   : > { %3757 = dma.hbm_to_vmem [thread:$0]  (!%p4281_p0), %s334_s30, 2048, %s336_s14, [#allocation12], %s4152_s16, %s4152_s16, %s4153_s26  }
  0x2f   : > { %p4575_p2 = scmp.ge.s32.totalorder %s4140_s12, 2 }
  0x31   : > { %348 = sbr.rel (%p4575_p2) target bundleno = 90 (0x5a), region = 48 }
  0x36   : > { %351 = sbr.rel (!%p4249_p5) target bundleno = 90 (0x5a), region = 52  ;;  %s352_s5 = sand.u32 (%p4249_p5), 1, %s4136_s11  }
  0x37   : > { %s2618_s9 = sshll.u32 (%p4249_p5), %s4140_s12, 1  ;;  %s2617_s28 = sshll.u32 (%p4249_p5), %s352_s5, 3 }
  0x38   : > { %s358_s1 = ssub.s32 (%p4249_p5), 3, %s2618_s9  ;;  %s4322_s22 = scalar_lea.sflag (%p4249_p5), [#allocation3], %s352_s5 }
  0x39   : > { %p359_p3 = scmp.lt.s32.totalorder (%p4249_p5), %s358_s1, 2  ;;  %s356_s17 = scalar_lea.vmem (%p4249_p5), [#allocation2], %s2617_s28 }
  0x3b   : > { %s4613_s1 = smov (!%p359_p3, %s358_s1), 2 }
  0x3c   : > { %s2619_s29 = sshll.u32 %s4613_s1, 2 }
  0x3d   : > { %s362_s27 = ssub.s32 8, %s2619_s29 }
  0x3e   : > { %s363_s15 = sshll.u32 %s362_s27, 4 }
  0x3f   : > { %364 = vsyncadd %s4322_s22, %s363_s15  ;;  %p4325_p5 = scmp.ne.s32.totalorder %s2619_s29, 0  ;;  %s3498_s24 = sshll.u32 %s4140_s12, 3 }
  0x40   : > { %s367_s30 = scalar_lea.hbm %s4560_s0, %s3498_s24  ;;  %s4333_s18 = sshll.u32 %s356_s17, 4  ;;  %s372_s18 = int_to_ptr.vmem [resolvable:$true] %s4333_s18 }
  0x41   : > { %s369_s14 = sshll.u32 %s367_s30, 4  ;;  %s2623_s16 = sshll.u32 %s4613_s1, 6  ;;  %s4336_s14 = int_to_ptr.hbm [resolvable:$true] %s369_s14 }
  0x42   : > { %s4012_s26 = sshra.s32 %s4336_s14, 4  ;;  %s4014_s5 = sshrl.u32 %s2623_s16, 4  ;;  %s4013_s26 = int_to_ptr.hbm [resolvable:$true] %s4012_s26 }
  0x43   : > { %s4019_s9 = scalar_lea.hbm %s4013_s26, %s4014_s5  ;;  %s4023_s27 = scalar_lea.hbm %s4560_s0, 12 }
  0x44   : > { %p4020_p7 = scmp.ne.s32.totalorder %s4013_s26, %s4019_s9  ;;  %p4024_p10 = scmp.lt.s32.totalorder %s4013_s26, %s4560_s0 }
  0x45   : > { %p4025_p1 = scmp.lt.s32.totalorder %s4023_s27, %s4019_s9 }
  0x46   : > { %p4021_p8 = pnand %p4020_p7, %p4325_p5 }
  0x47   : > { %p4026_p0 = por %p4025_p1, %p4024_p10 }
  0x48   : > { %p4022_p9 = pneg %p4021_p8 }
  0x4a   : > { %p4027_p3 = pnand %p4026_p0, %p4022_p9 }
  0x4c   : > { %4030 = shalt.err (!%p4027_p3)
}
  0x4d   : > { %s4031_s24 = sshra.s32 %s372_s18, 4  ;;  %s4154_s3 = smov [#allocation2]   ;;  %s4032_s24 = int_to_ptr.vmem [resolvable:$true] %s4031_s24 }
  0x4e   : > { %s4038_s25 = scalar_lea.vmem %s4032_s24, %s4014_s5  ;;  %s4042_s30 = scalar_lea.vmem %s4154_s3, 16 }
  0x4f   : > { %p4039_p7 = scmp.ne.s32.totalorder %s4032_s24, %s4038_s25  ;;  %p4044_p4 = scmp.lt.s32.totalorder %s4042_s30, %s4038_s25 }
  0x51   : > { %p4040_p8 = pnand %p4039_p7, %p4325_p5 }
  0x53   : > { %p4041_p2 = pneg %p4040_p8 }
  0x55   : > { %p4046_p12 = pnand %p4044_p4, %p4041_p2 }
  0x57   : > { %4049 = shalt.err (!%p4046_p12)
}
  0x58   : > { %s4155_s26 = smov 64   ;;  %s4156_s9 = smov 4  }
  0x59   : > { %377 = dma.hbm_to_vmem [thread:$0]  (%p4325_p5), %s4336_s14, %s2623_s16, %s372_s18, %s4322_s22, %s4155_s26, %s4155_s26, %s4156_s9  }
  0x5a PF: > { %383 = sbr.rel (%p4270_p13) target bundleno = 1110 (0x456), region = 56  ;;  %s4365_s5 = sand.u32 (!%p4270_p13), 1, %s4132_s10  }
  0x5b   : > { %s2625_s28 = sshll.u32 (!%p4270_p13), %s4365_s5, 3  ;;  %s386_s29 = scalar_lea.sflag (!%p4270_p13), [#allocation3], %s4365_s5 }
  0x5c   : > { %s4369_s27 = scalar_lea.vmem (!%p4270_p13), [#allocation2], %s2625_s28 }
  0x5f   : > { %4107 = dma.done.wait (%p4255_p6), %s386_s29, 128  }
  0x60   : > { %4109 = vsyncadd (%p4255_p6), %s386_s29, 4294967168  ;;  %p4595_p4 = scmp.eq.s32.totalorder %s4231_s13, 0 }
  0x62   : > { %4111 = dma.done.wait (%p4595_p4), [#allocation6], 832   ;;  %p4596_p12 = pmov %p4595_p4 }
  0x63   : > { %p4597_p13 = pmov %p4595_p4 }
  0x64   : > { %4113 = vsyncadd (%p4596_p12), [#allocation6], 4294966464 }
  0x65   : > { %4115 = dma.done.wait (%p4597_p13), [#allocation9], 16448   ;;  %p4598_p2 = pmov %p4595_p4 }
  0x67   : > { %4117 = vsyncadd (%p4598_p2), [#allocation9], 4294950848  ;;  %p4599_p5 = pmov %p4598_p2 }
  0x68   : > { %p4600_p9 = pmov %p4598_p2 }
  0x69   : > { %4119 = dma.done.wait (%p4599_p5), [#allocation12], 10240  }
  0x6a   : > { %4121 = vsyncadd (%p4600_p9), [#allocation12], 4294957056  ;;  %v472_v0 = vld [vmem:[#allocation5 + $0x20] sm:$0xff]  ;;  %v3502_v4 = vld [vmem:[#allocation5 + $0xc] sm:$0xf0]  ;;  %vm513_vm0 = vcmask 1043456  }
  0x6b   : > { %v493_v1 = vunpack.c.l.b16 %v472_v0  ;;  %v494_v2 = vunpack.c.h.b16 %v472_v0  ;;  %v2639_v3 = vld [vmem:[#allocation5] sm:$0xf]  ;;  %v473_v5 = vld [vmem:[#allocation5 + $0x28] sm:$0xff]  ;;  %v3500_v8 = vld [vmem:[#allocation5 + $0x4] sm:$0xf]  ;;  %vm509_vm1 = vcmask 195584  }
  0x6c   : > { %v2641_v9 = vld [vmem:[#allocation5 + $0x10] sm:$0xf0]  ;;  %v495_v10 = vunpack.c.l.b16 %v473_v5  ;;  %v496_v11 = vunpack.c.h.b16 %v473_v5  ;;  %v2640_v13 = vor.u32 %v3502_v4, %v2639_v3  ;;  %v3534_v14 = vld [vmem:[#allocation8 + $0xec] sm:$0xf0]  ;;  %v2647_v29 = vld [vmem:[#allocation5 + $0x8] sm:$0xf] }
  0x6d   : > { %v501_v6 = vpack.c.b16 %v493_v1, %v493_v1  ;;  %v502_v7 = vpack.c.b16 %v494_v2, %v494_v2  ;;  %v2771_v12 = vld [vmem:[#allocation8 + $0xe0] sm:$0xf]  ;;  %v3566_v16 = vld [vmem:[#allocation8 + $0x1ec] sm:$0xf0]  ;;  %v2644_v23 = vor.u32 %v3500_v8, %v2641_v9  ;;  %v3503_v30 = vld [vmem:[#allocation5 + $0x14] sm:$0xf0] }
  0x6e   : > { %v2899_v15 = vld [vmem:[#allocation8 + $0x1e0] sm:$0xf]  ;;  %v503_v19 = vpack.c.b16 %v495_v10, %v495_v10  ;;  %v504_v20 = vpack.c.b16 %v496_v11, %v496_v11  ;;  %v3530_v22 = vld [vmem:[#allocation8 + $0xcc] sm:$0xf0]  ;;  %v2772_v24 = vor.u32 %v3534_v14, %v2771_v12  ;;  %v3501_v31 = vld [vmem:[#allocation5 + $0xc] sm:$0xf]  ;;  %v2648_v41 = vor.u32 %v3503_v30, %v2647_v29 }
  0x6f   : > { %v515_v17 = vsel %vm513_vm0, %v501_v6, 0  ;;  %v518_v18 = vsel %vm513_vm0, %v502_v7, 0  ;;  %v2755_v21 = vld [vmem:[#allocation8 + $0xc0] sm:$0xf]  ;;  %v2900_v25 = vor.u32 %v3566_v16, %v2899_v15  ;;  %v3562_v27 = vld [vmem:[#allocation8 + $0x1cc] sm:$0xf0] }
  0x70   : > { %532 = vmatpush.bf16.msra.mxu2 %v515_v17  ;;  %546 = vmatpush.bf16.msra.mxu3 %v518_v18  ;;  %v2883_v26 = vld [vmem:[#allocation8 + $0x1c0] sm:$0xf]  ;;  %v521_v32 = vsel %vm513_vm0, %v503_v19, 0  ;;  %v524_v33 = vsel %vm513_vm0, %v504_v20, 0  ;;  %v2649_v34 = vld [vmem:[#allocation5 + $0x18] sm:$0xf0]  ;;  %v2756_v35 = vor.u32 %v3530_v22, %v2755_v21 }
  0x71   : > { %v4390_v28 = vld [vmem:[%s4369_s27] sm:$0xff]  ;;  %1417 = vmatpush.bf16.msra.mxu0 %v2772_v24  ;;  %1431 = vmatpush.bf16.msra.mxu1 %v2900_v25  ;;  %v2884_v36 = vor.u32 %v3562_v27, %v2883_v26  ;;  %v3526_v38 = vld [vmem:[#allocation8 + $0xac] sm:$0xf0]  ;;  %v2652_v42 = vor.u32 %v3501_v31, %v2649_v34  ;;  %s2632_s19 = sshll.u32 %s4365_s5, 4  ;;  %s2456_s14 = scalar_lea.sflag [#allocation4], %s4365_s5 }
  0x72   : > { %v2739_v37 = vld [vmem:[#allocation8 + $0xa0] sm:$0xf]  ;;  %v3558_v40 = vld [vmem:[#allocation8 + $0x1ac] sm:$0xf0]  ;;  %s454_s18 = scalar_lea.vmem [#allocation14], %s2632_s19  ;;  %s3490_s16 = sshll.u32 (%p4262_p11), %s4231_s13, 1 }
  0x73   : > { %v2867_v39 = vld [vmem:[#allocation8 + $0x1a0] sm:$0xf]  ;;  %v3598_v44 = vld [vmem:[#allocation8 + $0x2ec] sm:$0xf0]  ;;  %v2740_v46 = vor.u32 %v3526_v38, %v2739_v37  ;;  %v3532_v38 = vld [vmem:[#allocation8 + $0xe4] sm:$0xf] }
  0x74   : > { %533 = vmatpush.bf16.msra.mxu2 %v2640_v13  ;;  %547 = vmatpush.bf16.msra.mxu3 %v2644_v23  ;;  %v3027_v43 = vld [vmem:[#allocation8 + $0x2e0] sm:$0xf]  ;;  %v2868_v47 = vor.u32 %v3558_v40, %v2867_v39  ;;  %v3522_v49 = vld [vmem:[#allocation8 + $0x8c] sm:$0xf0]  ;;  %v2773_v39 = vld [vmem:[#allocation8 + $0xf0] sm:$0xf0] }
  0x75   : > { %v3155_v45 = vld [vmem:[#allocation8 + $0x3e0] sm:$0xf]  ;;  %1418 = vmatpush.bf16.msra.mxu0 %v2756_v35  ;;  %1432 = vmatpush.bf16.msra.mxu1 %v2884_v36  ;;  %v3630_v50 = vld [vmem:[#allocation8 + $0x3ec] sm:$0xf0]  ;;  %v3028_v53 = vor.u32 %v3598_v44, %v3027_v43  ;;  %v3564_v40 = vld [vmem:[#allocation8 + $0x1e4] sm:$0xf] }
  0x76   : > { %v2723_v48 = vld [vmem:[#allocation8 + $0x80] sm:$0xf]  ;;  %v3554_v52 = vld [vmem:[#allocation8 + $0x18c] sm:$0xf0]  ;;  %v3156_v54 = vor.u32 %v3630_v50, %v3155_v45  ;;  %v2776_v50 = vor.u32 %v3532_v38, %v2773_v39  ;;  %v3592_v38 = vld [vmem:[#allocation8 + $0x2c4] sm:$0xf] }
  0x77   : > { %2653 = vmatmul.msk.bf16.vlgmr.msra.gmra.mxu2 %vm509_vm1, %v4390_v28  ;;  %2654 = vmatmul.msk.bf16.vlgmr.msra.gmra.mxu3 %vm509_vm1, %v4390_v28  ;;  %v2851_v51 = vld [vmem:[#allocation8 + $0x180] sm:$0xf]  ;;  %v3594_v56 = vld [vmem:[#allocation8 + $0x2cc] sm:$0xf0]  ;;  %v2724_v59 = vor.u32 %v3522_v49, %v2723_v48  ;;  %v3013_v39 = vld [vmem:[#allocation8 + $0x2d0] sm:$0xf0] }
  0x78   : > { %560 = vmatpush.bf16.msrb.mxu2 %v521_v32  ;;  %574 = vmatpush.bf16.msrb.mxu3 %v524_v33  ;;  %v3011_v55 = vld [vmem:[#allocation8 + $0x2c0] sm:$0xf]  ;;  %v3626_v58 = vld [vmem:[#allocation8 + $0x3cc] sm:$0xf0]  ;;  %v2852_v60 = vor.u32 %v3554_v52, %v2851_v51  ;;  %v2757_v52 = vld [vmem:[#allocation8 + $0xd0] sm:$0xf0] }
  0x79   : > { %v3139_v57 = vld [vmem:[#allocation8 + $0x3c0] sm:$0xf]  ;;  %1419 = vmatpush.bf16.msra.mxu0 %v2740_v46  ;;  %1433 = vmatpush.bf16.msra.mxu1 %v2868_v47  ;;  %v3518_v62 = vld [vmem:[#allocation8 + $0x6c] sm:$0xf0]  ;;  %v3012_v1 = vor.u32 %v3594_v56, %v3011_v55  ;;  %s2464_s15 = ssub.s32 (%p4262_p11), 3, %s3490_s16 }
  0x7a   : > { %v2707_v61 = vld [vmem:[#allocation8 + $0x60] sm:$0xf]  ;;  %v3550_v0 = vld [vmem:[#allocation8 + $0x16c] sm:$0xf0]  ;;  %v3140_v2 = vor.u32 %v3626_v58, %v3139_v57  ;;  %p2465_p6 = scmp.lt.s32.totalorder (%p4262_p11), %s2464_s15, 2 }
  0x7b   : > { %v2835_v63 = vld [vmem:[#allocation8 + $0x160] sm:$0xf]  ;;  %v3590_v4 = vld [vmem:[#allocation8 + $0x2ac] sm:$0xf0]  ;;  %v2708_v7 = vor.u32 %v3518_v62, %v2707_v61  ;;  %v3556_v61 = vld [vmem:[#allocation8 + $0x1a4] sm:$0xf] }
  0x7c   : > { %561 = vmatpush.bf16.msrb.mxu2 %v2648_v41  ;;  %575 = vmatpush.bf16.msrb.mxu3 %v2652_v42  ;;  %v2995_v3 = vld [vmem:[#allocation8 + $0x2a0] sm:$0xf]  ;;  %v3622_v6 = vld [vmem:[#allocation8 + $0x3ac] sm:$0xf0]  ;;  %v2836_v8 = vor.u32 %v3550_v0, %v2835_v63  ;;  %v2901_v41 = vld [vmem:[#allocation8 + $0x1f0] sm:$0xf0] }
  0x7d   : > { %v3123_v5 = vld [vmem:[#allocation8 + $0x3a0] sm:$0xf]  ;;  %1420 = vmatpush.bf16.msra.mxu0 %v2724_v59  ;;  %1434 = vmatpush.bf16.msra.mxu1 %v2852_v60  ;;  %v3514_v10 = vld [vmem:[#allocation8 + $0x4c] sm:$0xf0]  ;;  %v2996_v13 = vor.u32 %v3590_v4, %v2995_v3  ;;  %v2904_v51 = vor.u32 %v3564_v40, %v2901_v41  ;;  %v3524_v59 = vld [vmem:[#allocation8 + $0xa4] sm:$0xf]  ;;  %v3016_v41 = vor.u32 %v3592_v38, %v3013_v39 }
  0x7e   : > { %v2691_v9 = vld [vmem:[#allocation8 + $0x40] sm:$0xf]  ;;  %v3546_v12 = vld [vmem:[#allocation8 + $0x14c] sm:$0xf0]  ;;  %v3124_v14 = vor.u32 %v3622_v6, %v3123_v5  ;;  %v2741_v60 = vld [vmem:[#allocation8 + $0xb0] sm:$0xf0] }
  0x7f   : > { %v2819_v11 = vld [vmem:[#allocation8 + $0x140] sm:$0xf]  ;;  %v3586_v16 = vld [vmem:[#allocation8 + $0x28c] sm:$0xf0]  ;;  %v2692_v19 = vor.u32 %v3514_v10, %v2691_v9  ;;  %v2869_v62 = vld [vmem:[#allocation8 + $0x1b0] sm:$0xf0]  ;;  %v2744_v63 = vor.u32 %v3524_v59, %v2741_v60 }
  0x80   : > { %1445 = vmatpush.bf16.msra.mxu2 %v3028_v53  ;;  %1459 = vmatpush.bf16.msra.mxu3 %v3156_v54  ;;  %v2979_v15 = vld [vmem:[#allocation8 + $0x280] sm:$0xf]  ;;  %v3618_v18 = vld [vmem:[#allocation8 + $0x38c] sm:$0xf0]  ;;  %v2820_v20 = vor.u32 %v3546_v12, %v2819_v11  ;;  %v3560_v53 = vld [vmem:[#allocation8 + $0x1c4] sm:$0xf]  ;;  %v2872_v0 = vor.u32 %v3556_v61, %v2869_v62 }
  0x81   : > { %v3107_v17 = vld [vmem:[#allocation8 + $0x380] sm:$0xf]  ;;  %1421 = vmatpush.bf16.msra.mxu0 %v2708_v7  ;;  %1435 = vmatpush.bf16.msra.mxu1 %v2836_v8  ;;  %v3510_v22 = vld [vmem:[#allocation8 + $0x2c] sm:$0xf0]  ;;  %v2980_v25 = vor.u32 %v3586_v16, %v2979_v15  ;;  %v2885_v54 = vld [vmem:[#allocation8 + $0x1d0] sm:$0xf0] }
  0x82   : > { %v2675_v21 = vld [vmem:[#allocation8 + $0x20] sm:$0xf]  ;;  %v3542_v24 = vld [vmem:[#allocation8 + $0x12c] sm:$0xf0]  ;;  %v3108_v26 = vor.u32 %v3618_v18, %v3107_v17  ;;  %v2888_v58 = vor.u32 %v3560_v53, %v2885_v54  ;;  %v3520_v8 = vld [vmem:[#allocation8 + $0x84] sm:$0xf] }
  0x83   : > { %v2803_v23 = vld [vmem:[#allocation8 + $0x120] sm:$0xf]  ;;  %v3582_v29 = vld [vmem:[#allocation8 + $0x26c] sm:$0xf0]  ;;  %v2676_v32 = vor.u32 %v3510_v22, %v2675_v21  ;;  %v2725_v9 = vld [vmem:[#allocation8 + $0x90] sm:$0xf0] }
  0x84   : > { %1446 = vmatpush.bf16.msra.mxu2 %v3012_v1  ;;  %1460 = vmatpush.bf16.msra.mxu3 %v3140_v2  ;;  %v2963_v27 = vld [vmem:[#allocation8 + $0x260] sm:$0xf]  ;;  %v3614_v31 = vld [vmem:[#allocation8 + $0x36c] sm:$0xf0]  ;;  %v2804_v33 = vor.u32 %v3542_v24, %v2803_v23  ;;  %v586_v1 = vld [vmem:[#allocation7] sm:$0xf]  ;;  %v2728_v11 = vor.u32 %v3520_v8, %v2725_v9 }
  0x85   : > { %v3091_v30 = vld [vmem:[#allocation8 + $0x360] sm:$0xf]  ;;  %1422 = vmatpush.bf16.msra.mxu0 %v2692_v19  ;;  %1436 = vmatpush.bf16.msra.mxu1 %v2820_v20  ;;  %v3506_v35 = vld [vmem:[#allocation8 + $0xc] sm:$0xf0]  ;;  %v2964_v42 = vor.u32 %v3582_v29, %v2963_v27  ;;  %588 = vst [vmem:[#allocation1] ss:$9 sm:$0xff] %v586_v1 }
  0x86   : > { %v2659_v34 = vld [vmem:[#allocation8] sm:$0xf]  ;;  %v3538_v37 = vld [vmem:[#allocation8 + $0x10c] sm:$0xf0]  ;;  %v3092_v43 = vor.u32 %v3614_v31, %v3091_v30  ;;  %v3552_v10 = vld [vmem:[#allocation8 + $0x184] sm:$0xf] }
  0x87   : > { %v2787_v36 = vld [vmem:[#allocation8 + $0x100] sm:$0xf]  ;;  %2655 = vmatmul.msk.bf16.vlgmr.msrb.gmra.mxu2 %vm509_vm1, %v4390_v28  ;;  %2656 = vmatmul.msk.bf16.vlgmr.msrb.gmra.mxu3 %vm509_vm1, %v4390_v28  ;;  %v3578_v45 = vld [vmem:[#allocation8 + $0x24c] sm:$0xf0]  ;;  %v2660_v48 = vor.u32 %v3506_v35, %v2659_v34  ;;  %v3528_v28 = vld [vmem:[#allocation8 + $0xc4] sm:$0xf] }
  0x88   : > { %1447 = vmatpush.bf16.msra.mxu2 %v2996_v13  ;;  %1461 = vmatpush.bf16.msra.mxu3 %v3124_v14  ;;  %v2947_v44 = vld [vmem:[#allocation8 + $0x240] sm:$0xf]  ;;  %v3610_v47 = vld [vmem:[#allocation8 + $0x34c] sm:$0xf0]  ;;  %v2788_v49 = vor.u32 %v3538_v37, %v2787_v36  ;;  %v2760_v57 = vor.u32 %v3528_v28, %v2757_v52  ;;  %v2853_v12 = vld [vmem:[#allocation8 + $0x190] sm:$0xf0] }
  0x89   : > { %v3075_v46 = vld [vmem:[#allocation8 + $0x340] sm:$0xf]  ;;  %1423 = vmatpush.bf16.msra.mxu0 %v2676_v32  ;;  %1437 = vmatpush.bf16.msra.mxu1 %v2804_v33  ;;  %v2948_v55 = vor.u32 %v3578_v45, %v2947_v44  ;;  %v3574_v3 = vld [vmem:[#allocation8 + $0x22c] sm:$0xf0]  ;;  %v2856_v13 = vor.u32 %v3552_v10, %v2853_v12  ;;  %v3516_v19 = vld [vmem:[#allocation8 + $0x64] sm:$0xf] }
  0x8a   : > { %v3076_v56 = vor.u32 %v3610_v47, %v3075_v46  ;;  %v2931_v2 = vld [vmem:[#allocation8 + $0x220] sm:$0xf]  ;;  %v3606_v5 = vld [vmem:[#allocation8 + $0x32c] sm:$0xf0]  ;;  %v2709_v20 = vld [vmem:[#allocation8 + $0x70] sm:$0xf0] }
  0x8b   : > { %v3059_v4 = vld [vmem:[#allocation8 + $0x320] sm:$0xf]  ;;  %v2932_v6 = vor.u32 %v3574_v3, %v2931_v2  ;;  %v3570_v15 = vld [vmem:[#allocation8 + $0x20c] sm:$0xf0]  ;;  %v2712_v22 = vor.u32 %v3516_v19, %v2709_v20  ;;  %v3548_v23 = vld [vmem:[#allocation8 + $0x164] sm:$0xf] }
  0x8c   : > { %1448 = vmatpush.bf16.msra.mxu2 %v2980_v25  ;;  %1462 = vmatpush.bf16.msra.mxu3 %v3108_v26  ;;  %v3060_v7 = vor.u32 %v3606_v5, %v3059_v4  ;;  %v2915_v14 = vld [vmem:[#allocation8 + $0x200] sm:$0xf]  ;;  %v3602_v18 = vld [vmem:[#allocation8 + $0x30c] sm:$0xf0]  ;;  %v2837_v24 = vld [vmem:[#allocation8 + $0x170] sm:$0xf0] }
  0x8d   : > { %1424 = vmatpush.bf16.msra.mxu0 %v2660_v48  ;;  %1438 = vmatpush.bf16.msra.mxu1 %v2788_v49  ;;  %v3043_v16 = vld [vmem:[#allocation8 + $0x300] sm:$0xf]  ;;  %v2916_v17 = vor.u32 %v3570_v15, %v2915_v14  ;;  %v3596_v25 = vld [vmem:[#allocation8 + $0x2e4] sm:$0xf]  ;;  %v2840_v26 = vor.u32 %v3548_v23, %v2837_v24  ;;  %v3029_v27 = vld [vmem:[#allocation8 + $0x2f0] sm:$0xf0] }
  0x8e   : > { %v3044_v21 = vor.u32 %v3602_v18, %v3043_v16  ;;  %v3628_v29 = vld [vmem:[#allocation8 + $0x3e4] sm:$0xf]  ;;  %v3157_v30 = vld [vmem:[#allocation8 + $0x3f0] sm:$0xf0]  ;;  %v3032_v31 = vor.u32 %v3596_v25, %v3029_v27  ;;  %v1645_v14 = vld [vmem:[#allocation10] sm:$0xf] }
  0x8f   : > { %v3160_v32 = vor.u32 %v3628_v29, %v3157_v30  ;;  %v3512_v33 = vld [vmem:[#allocation8 + $0x44] sm:$0xf]  ;;  %v2693_v34 = vld [vmem:[#allocation8 + $0x50] sm:$0xf0] }
  0x90   : > { %1449 = vmatpush.bf16.msra.mxu2 %v2964_v42  ;;  %1463 = vmatpush.bf16.msra.mxu3 %v3092_v43  ;;  %v3544_v35 = vld [vmem:[#allocation8 + $0x144] sm:$0xf]  ;;  %v2696_v36 = vor.u32 %v3512_v33, %v2693_v34  ;;  %v2821_v37 = vld [vmem:[#allocation8 + $0x150] sm:$0xf0] }
  0x91   : > { %1473 = vmatpush.bf16.msrb.mxu0 %v2776_v50  ;;  %1487 = vmatpush.bf16.msrb.mxu1 %v2904_v51  ;;  %v2824_v40 = vor.u32 %v3544_v35, %v2821_v37  ;;  %v3624_v42 = vld [vmem:[#allocation8 + $0x3c4] sm:$0xf]  ;;  %v3141_v43 = vld [vmem:[#allocation8 + $0x3d0] sm:$0xf0] }
  0x92   : > { %v3144_v44 = vor.u32 %v3624_v42, %v3141_v43  ;;  %v3508_v45 = vld [vmem:[#allocation8 + $0x24] sm:$0xf]  ;;  %v2677_v46 = vld [vmem:[#allocation8 + $0x30] sm:$0xf0] }
  0x93   : > { %v3540_v47 = vld [vmem:[#allocation8 + $0x124] sm:$0xf]  ;;  %v2680_v48 = vor.u32 %v3508_v45, %v2677_v46  ;;  %v2805_v49 = vld [vmem:[#allocation8 + $0x130] sm:$0xf0] }
  0x94   : > { %1450 = vmatpush.bf16.msra.mxu2 %v2948_v55  ;;  %1464 = vmatpush.bf16.msra.mxu3 %v3076_v56  ;;  %v3588_v50 = vld [vmem:[#allocation8 + $0x2a4] sm:$0xf]  ;;  %v2997_v51 = vld [vmem:[#allocation8 + $0x2b0] sm:$0xf0]  ;;  %v2808_v28 = vor.u32 %v3540_v47, %v2805_v49 }
  0x95   : > { %1474 = vmatpush.bf16.msrb.mxu0 %v2760_v57  ;;  %1488 = vmatpush.bf16.msrb.mxu1 %v2888_v58  ;;  %v3000_v52 = vor.u32 %v3588_v50, %v2997_v51  ;;  %v3620_v53 = vld [vmem:[#allocation8 + $0x3a4] sm:$0xf]  ;;  %v3125_v54 = vld [vmem:[#allocation8 + $0x3b0] sm:$0xf0] }
  0x96   : > { %v3128_v55 = vor.u32 %v3620_v53, %v3125_v54  ;;  %v3504_v56 = vld [vmem:[#allocation8 + $0x4] sm:$0xf]  ;;  %v2661_v57 = vld [vmem:[#allocation8 + $0x10] sm:$0xf0]  ;;  %v3535_v54 = vld [vmem:[#allocation8 + $0xf4] sm:$0xf0] }
  0x97   : > { %v3536_v58 = vld [vmem:[#allocation8 + $0x104] sm:$0xf]  ;;  %v2664_v59 = vor.u32 %v3504_v56, %v2661_v57  ;;  %v2789_v60 = vld [vmem:[#allocation8 + $0x110] sm:$0xf0]  ;;  %v3567_v56 = vld [vmem:[#allocation8 + $0x1f4] sm:$0xf0] }
  0x98   : > { %1451 = vmatpush.bf16.msra.mxu2 %v2932_v6  ;;  %1465 = vmatpush.bf16.msra.mxu3 %v3060_v7  ;;  %v3584_v61 = vld [vmem:[#allocation8 + $0x284] sm:$0xf]  ;;  %v2981_v62 = vld [vmem:[#allocation8 + $0x290] sm:$0xf0] }
  0x99   : > { %1475 = vmatpush.bf16.msrb.mxu0 %v2744_v63  ;;  %1489 = vmatpush.bf16.msrb.mxu1 %v2872_v0  ;;  %v2792_v63 = vor.u32 %v3536_v58, %v2789_v60  ;;  %v2984_v0 = vor.u32 %v3584_v61, %v2981_v62  ;;  %v3616_v1 = vld [vmem:[#allocation8 + $0x384] sm:$0xf]  ;;  %v3109_v2 = vld [vmem:[#allocation8 + $0x390] sm:$0xf0] }
  0x9a   : > { %v3112_v3 = vor.u32 %v3616_v1, %v3109_v2  ;;  %v3580_v4 = vld [vmem:[#allocation8 + $0x264] sm:$0xf]  ;;  %v2965_v5 = vld [vmem:[#allocation8 + $0x270] sm:$0xf0] }
  0x9b   : > { %v3612_v6 = vld [vmem:[#allocation8 + $0x364] sm:$0xf]  ;;  %v2968_v7 = vor.u32 %v3580_v4, %v2965_v5  ;;  %v3093_v8 = vld [vmem:[#allocation8 + $0x370] sm:$0xf0] }
  0x9c   : > { %1452 = vmatpush.bf16.msra.mxu2 %v2916_v17  ;;  %1466 = vmatpush.bf16.msra.mxu3 %v3044_v21  ;;  %v589_v9 = vld [vmem:[#allocation1] sm:$0xff]  ;;  %v590_v10 = vld [vmem:[#allocation1 + $0x9] sm:$0xff]  ;;  %v4402_v12 = vld [vmem:[#allocation1 + $0x12] sm:$0xff] }
  0x9d   : > { %1476 = vmatpush.bf16.msrb.mxu0 %v2728_v11  ;;  %1490 = vmatpush.bf16.msrb.mxu1 %v2856_v13  ;;  %v3096_v11 = vor.u32 %v3612_v6, %v3093_v8  ;;  %v4404_v13 = vld [vmem:[#allocation1 + $0x1b] sm:$0xff]  ;;  %v3576_v15 = vld [vmem:[#allocation8 + $0x244] sm:$0xf]  ;;  %v593_v27 = vpack.i.b16 %v589_v9, %v589_v9  ;;  %v596_v29 = vpack.i.b16 %v590_v10, %v590_v10  ;;  %v3531_v6 = vld [vmem:[#allocation8 + $0xd4] sm:$0xf0] }
  0x9e   : > { %1647 = vst [vmem:[#allocation1] ss:$9 sm:$0xff] %v1645_v14  ;;  %v2949_v16 = vld [vmem:[#allocation8 + $0x250] sm:$0xf0]  ;;  %v3608_v18 = vld [vmem:[#allocation8 + $0x344] sm:$0xf]  ;;  %v599_v57 = vpack.i.b16 %v4402_v12, %v4402_v12  ;;  %v602_v58 = vpack.i.b16 %v4404_v13, %v4404_v13 }
  0x9f   : > { %v2952_v17 = vor.u32 %v3576_v15, %v2949_v16  ;;  %v3077_v19 = vld [vmem:[#allocation8 + $0x350] sm:$0xf0]  ;;  %v3572_v21 = vld [vmem:[#allocation8 + $0x224] sm:$0xf]  ;;  %v595_v39 = vperm.slane %v593_v27, 0 }
  0xa0   : > { %1501 = vmatpush.bf16.msrb.mxu2 %v3032_v31  ;;  %1515 = vmatpush.bf16.msrb.mxu3 %v3160_v32  ;;  %v3080_v20 = vor.u32 %v3608_v18, %v3077_v19  ;;  %v3604_v23 = vld [vmem:[#allocation8 + $0x324] sm:$0xf]  ;;  %v3061_v25 = vld [vmem:[#allocation8 + $0x330] sm:$0xf0]  ;;  %v3563_v8 = vld [vmem:[#allocation8 + $0x1d4] sm:$0xf0] }
  0xa1   : > { %1477 = vmatpush.bf16.msrb.mxu0 %v2712_v22  ;;  %1491 = vmatpush.bf16.msrb.mxu1 %v2840_v26  ;;  %v2933_v22 = vld [vmem:[#allocation8 + $0x230] sm:$0xf0]  ;;  %v3064_v26 = vor.u32 %v3604_v23, %v3061_v25  ;;  %v3568_v32 = vld [vmem:[#allocation8 + $0x204] sm:$0xf]  ;;  %v613_v43 = vunpack.c.l.bf16 %v595_v39  ;;  %v601_v10 = vperm.slane %v599_v57, 0 }
  0xa2   : > { %v2936_v24 = vor.u32 %v3572_v21, %v2933_v22  ;;  %v2917_v33 = vld [vmem:[#allocation8 + $0x210] sm:$0xf0]  ;;  %v3600_v34 = vld [vmem:[#allocation8 + $0x304] sm:$0xf]  ;;  %v2747_v14 = vld [vmem:[#allocation8 + $0xa8] sm:$0xf] }
  0xa3   : > { %v2920_v35 = vor.u32 %v3568_v32, %v2917_v33  ;;  %v3527_v15 = vld [vmem:[#allocation8 + $0xb4] sm:$0xf0]  ;;  %v2875_v16 = vld [vmem:[#allocation8 + $0x1a8] sm:$0xf] }
  0xa4   : > { %1502 = vmatpush.bf16.msrb.mxu2 %v3016_v41  ;;  %1516 = vmatpush.bf16.msrb.mxu3 %v3144_v44 }
  0xa5   : > { %1478 = vmatpush.bf16.msrb.mxu0 %v2696_v36  ;;  %1492 = vmatpush.bf16.msrb.mxu1 %v2824_v40  ;;  %v3045_v36 = vld [vmem:[#allocation8 + $0x310] sm:$0xf0]  ;;  %v598_v40 = vperm.slane %v596_v29, 0  ;;  %v3523_v29 = vld [vmem:[#allocation8 + $0x94] sm:$0xf0] }
  0xa6   : > { %v3048_v37 = vor.u32 %v3600_v34, %v3045_v36 }
  0xa7   : > { %v614_v44 = vunpack.c.l.bf16 %v598_v40 }
  0xa8   : > { %1503 = vmatpush.bf16.msrb.mxu2 %v3000_v52  ;;  %1517 = vmatpush.bf16.msrb.mxu3 %v3128_v55  ;;  %v2907_v55 = vld [vmem:[#allocation8 + $0x1e8] sm:$0xf] }
  0xa9   : > { %1479 = vmatpush.bf16.msrb.mxu0 %v2680_v48  ;;  %1493 = vmatpush.bf16.msrb.mxu1 %v2808_v28  ;;  %v2779_v28 = vld [vmem:[#allocation8 + $0xe8] sm:$0xf]  ;;  %v2908_v2 = vor.u32 %v3567_v56, %v2907_v55  ;;  %v3515_v56 = vld [vmem:[#allocation8 + $0x54] sm:$0xf0] }
  0xaa   : > { %v2780_v1 = vor.u32 %v3535_v54, %v2779_v28  ;;  %v2699_v55 = vld [vmem:[#allocation8 + $0x48] sm:$0xf] }
  0xac   : > { %1504 = vmatpush.bf16.msrb.mxu2 %v2984_v0  ;;  %1518 = vmatpush.bf16.msrb.mxu3 %v3112_v3  ;;  %v2763_v3 = vld [vmem:[#allocation8 + $0xc8] sm:$0xf] }
  0xad   : > { %1480 = vmatpush.bf16.msrb.mxu0 %v2664_v59  ;;  %1494 = vmatpush.bf16.msrb.mxu1 %v2792_v63  ;;  %v2764_v12 = vor.u32 %v3531_v6, %v2763_v3  ;;  %v2683_v3 = vld [vmem:[#allocation8 + $0x28] sm:$0xf]  ;;  %v3511_v6 = vld [vmem:[#allocation8 + $0x34] sm:$0xf0] }
  0xb0   : > { %1505 = vmatpush.bf16.msrb.mxu2 %v2968_v7  ;;  %1519 = vmatpush.bf16.msrb.mxu3 %v3096_v11  ;;  %v2891_v7 = vld [vmem:[#allocation8 + $0x1c8] sm:$0xf]  ;;  %v604_v11 = vperm.slane %v602_v58, 0 }
  0xb1   : > { %v2892_v13 = vor.u32 %v3563_v8, %v2891_v7 }
  0xb2   : > { %v616_v21 = vunpack.c.l.bf16 %v604_v11  ;;  %v3003_v11 = vld [vmem:[#allocation8 + $0x2a8] sm:$0xf] }
  0xb4   : > { %1506 = vmatpush.bf16.msrb.mxu2 %v2952_v17  ;;  %1520 = vmatpush.bf16.msrb.mxu3 %v3080_v20  ;;  %v3559_v17 = vld [vmem:[#allocation8 + $0x1b4] sm:$0xf0]  ;;  %v615_v20 = vunpack.c.l.bf16 %v601_v10 }
  0xb5   : > { %v2876_v25 = vor.u32 %v3559_v17, %v2875_v16  ;;  %v3543_v10 = vld [vmem:[#allocation8 + $0x134] sm:$0xf0]  ;;  %v2667_v17 = vld [vmem:[#allocation8 + $0x8] sm:$0xf] }
  0xb8   : > { %1507 = vmatpush.bf16.msrb.mxu2 %v2936_v24  ;;  %1521 = vmatpush.bf16.msrb.mxu3 %v3064_v26  ;;  %v2748_v24 = vor.u32 %v3527_v15, %v2747_v14  ;;  %v2731_v26 = vld [vmem:[#allocation8 + $0x88] sm:$0xf]  ;;  %v3623_v14 = vld [vmem:[#allocation8 + $0x3b4] sm:$0xf0]  ;;  %v2684_v15 = vor.u32 %v3511_v6, %v2683_v3  ;;  %v3521_v3 = vld [vmem:[#allocation8 + $0x8c] sm:$0xf] }
  0xb9   : > { %v2732_v36 = vor.u32 %v3523_v29, %v2731_v26  ;;  %v3619_v26 = vld [vmem:[#allocation8 + $0x394] sm:$0xf0]  ;;  %v2781_v29 = vld [vmem:[#allocation8 + $0xf8] sm:$0xf0] }
  0xba   : > { %v2733_v6 = vld [vmem:[#allocation8 + $0x98] sm:$0xf0] }
  0xbc   : > { %1508 = vmatpush.bf16.msrb.mxu2 %v2920_v35  ;;  %1522 = vmatpush.bf16.msrb.mxu3 %v3048_v37 }
  0xfa   : > { %v535_v30 = vpop.f32.mrf.mxu2  ;;  %v549_v31 = vpop.f32.mrf.mxu3 }
  0xfb   : > { %v582_v38 = vpack.c.bf16 %v549_v31, %v535_v30  ;;  %v2859_v30 = vld [vmem:[#allocation8 + $0x188] sm:$0xf]  ;;  %v3555_v31 = vld [vmem:[#allocation8 + $0x194] sm:$0xf0] }
  0xfc   : > { %v2860_v37 = vor.u32 %v3555_v31, %v2859_v30  ;;  %v3565_v30 = vld [vmem:[#allocation8 + $0x1ec] sm:$0xf]  ;;  %v2909_v31 = vld [vmem:[#allocation8 + $0x1f8] sm:$0xf0] }
  0xfd   : > { %v605_v41 = vunpack.c.l.bf16 %v582_v38  ;;  %v606_v42 = vunpack.c.h.bf16 %v582_v38  ;;  %v2715_v38 = vld [vmem:[#allocation8 + $0x68] sm:$0xf] }
  0xff   : > { %v617_v48 = vadd.f32 %v613_v43, %v605_v41  ;;  %v618_v49 = vadd.f32 %v614_v44, %v606_v42  ;;  %v3519_v41 = vld [vmem:[#allocation8 + $0x74] sm:$0xf0]  ;;  %v2843_v42 = vld [vmem:[#allocation8 + $0x168] sm:$0xf] }
 0x101   : > { %v637_v59 = vmax.f32 %v617_v48, 0.0  ;;  %v638_v60 = vmax.f32 %v618_v49, 0.0 }
 0x102   : > { %v537_v45 = vpop.f32.mrf.mxu2  ;;  %v551_v46 = vpop.f32.mrf.mxu3 }
 0x103   : > { %v584_v47 = vpack.c.bf16 %v551_v46, %v537_v45  ;;  %v3599_v45 = vld [vmem:[#allocation8 + $0x2f4] sm:$0xf0]  ;;  %v3163_v46 = vld [vmem:[#allocation8 + $0x3e8] sm:$0xf] }
 0x105   : > { %v609_v50 = vunpack.c.l.bf16 %v584_v47  ;;  %v610_v51 = vunpack.c.h.bf16 %v584_v47 }
 0x107   : > { %v621_v52 = vadd.f32 %v613_v43, %v609_v50  ;;  %v622_v53 = vadd.f32 %v614_v44, %v610_v51  ;;  %v3551_v43 = vld [vmem:[#allocation8 + $0x174] sm:$0xf0]  ;;  %v3035_v44 = vld [vmem:[#allocation8 + $0x2e8] sm:$0xf] }
 0x108   : > { %v3631_v51 = vld [vmem:[#allocation8 + $0x3f4] sm:$0xf0]  ;;  %v2844_v54 = vor.u32 %v3551_v43, %v2843_v42  ;;  %v3036_v57 = vor.u32 %v3599_v45, %v3035_v44  ;;  %v3529_v42 = vld [vmem:[#allocation8 + $0xcc] sm:$0xf]  ;;  %v2765_v43 = vld [vmem:[#allocation8 + $0xd8] sm:$0xf0] }
 0x109   : > { %v641_v61 = vmax.f32 %v621_v52, 0.0  ;;  %v642_v62 = vmax.f32 %v622_v53, 0.0  ;;  %v2716_v53 = vor.u32 %v3519_v41, %v2715_v38  ;;  %v3164_v58 = vor.u32 %v3631_v51, %v3163_v46  ;;  %v3615_v41 = vld [vmem:[#allocation8 + $0x374] sm:$0xf0]  ;;  %v3561_v44 = vld [vmem:[#allocation8 + $0x1cc] sm:$0xf] }
 0x10a   : > { %v563_v63 = vpop.f32.mrf.mxu2  ;;  %v577_v0 = vpop.f32.mrf.mxu3  ;;  %v2893_v45 = vld [vmem:[#allocation8 + $0x1d8] sm:$0xf0] }
 0x10b   : > { %v4410_v4 = vpack.c.bf16 %v641_v61, %v637_v59  ;;  %v4412_v5 = vpack.c.bf16 %v642_v62, %v638_v60  ;;  %v583_v9 = vpack.c.bf16 %v577_v0, %v563_v63  ;;  %v2827_v59 = vld [vmem:[#allocation8 + $0x148] sm:$0xf]  ;;  %v3547_v60 = vld [vmem:[#allocation8 + $0x154] sm:$0xf0]  ;;  %v2896_v51 = vor.u32 %v3561_v44, %v2893_v45 }
 0x10c   : > { %v3019_v61 = vld [vmem:[#allocation8 + $0x2c8] sm:$0xf]  ;;  %v3595_v62 = vld [vmem:[#allocation8 + $0x2d4] sm:$0xf0] }
 0x10d   : > { %1425 = vmatmul.bf16.vlgmr.msra.gmra.mxu0 %v4410_v4  ;;  %1439 = vmatmul.bf16.vlgmr.msra.gmra.mxu1 %v4412_v5  ;;  %v607_v18 = vunpack.c.l.bf16 %v583_v9  ;;  %v608_v19 = vunpack.c.h.bf16 %v583_v9  ;;  %v3147_v63 = vld [vmem:[#allocation8 + $0x3c8] sm:$0xf]  ;;  %v3627_v0 = vld [vmem:[#allocation8 + $0x3d4] sm:$0xf0]  ;;  %v3020_v7 = vor.u32 %v3595_v62, %v3019_v61 }
 0x10e   : > { %1529 = vmatpush.bf16.msra.mxu0 %v2780_v1  ;;  %1543 = vmatpush.bf16.msra.mxu1 %v2908_v2  ;;  %v2700_v1 = vor.u32 %v3515_v56, %v2699_v55  ;;  %v2828_v2 = vor.u32 %v3547_v60, %v2827_v59  ;;  %v3148_v8 = vor.u32 %v3627_v0, %v3147_v63  ;;  %v2811_v9 = vld [vmem:[#allocation8 + $0x128] sm:$0xf]  ;;  %v3525_v55 = vld [vmem:[#allocation8 + $0xac] sm:$0xf]  ;;  %v2749_v56 = vld [vmem:[#allocation8 + $0xb8] sm:$0xf0] }
 0x10f   : > { %v619_v32 = vadd.f32 %v615_v20, %v607_v18  ;;  %v620_v33 = vadd.f32 %v616_v21, %v608_v19  ;;  %v2812_v16 = vor.u32 %v3543_v10, %v2811_v9  ;;  %v3507_v18 = vld [vmem:[#allocation8 + $0x14] sm:$0xf0]  ;;  %v2795_v19 = vld [vmem:[#allocation8 + $0x108] sm:$0xf]  ;;  %v2752_v63 = vor.u32 %v3525_v55, %v2749_v56  ;;  %v3505_v55 = vld [vmem:[#allocation8 + $0xc] sm:$0xf] }
 0x110   : > { %v2939_v61 = vld [vmem:[#allocation8 + $0x228] sm:$0xf]  ;;  %v3575_v62 = vld [vmem:[#allocation8 + $0x234] sm:$0xf0]  ;;  %v2669_v56 = vld [vmem:[#allocation8 + $0x18] sm:$0xf0] }
 0x111   : > { %v639_v47 = vmax.f32 %v619_v32, 0.0  ;;  %v640_v48 = vmax.f32 %v620_v33, 0.0  ;;  %v2668_v32 = vor.u32 %v3507_v18, %v2667_v17  ;;  %v2940_v9 = vor.u32 %v3575_v62, %v2939_v61  ;;  %v3517_v17 = vld [vmem:[#allocation8 + $0x6c] sm:$0xf]  ;;  %v2717_v18 = vld [vmem:[#allocation8 + $0x78] sm:$0xf0] }
 0x112   : > { %1530 = vmatpush.bf16.msra.mxu0 %v2764_v12  ;;  %1544 = vmatpush.bf16.msra.mxu1 %v2892_v13  ;;  %v565_v22 = vpop.f32.mrf.mxu2  ;;  %v579_v23 = vpop.f32.mrf.mxu3  ;;  %v3591_v12 = vld [vmem:[#allocation8 + $0x2b4] sm:$0xf0]  ;;  %v3131_v13 = vld [vmem:[#allocation8 + $0x3a8] sm:$0xf]  ;;  %v3585_v61 = vld [vmem:[#allocation8 + $0x28c] sm:$0xf] }
 0x113   : > { %v585_v27 = vpack.c.bf16 %v579_v23, %v565_v22  ;;  %v3539_v22 = vld [vmem:[#allocation8 + $0x114] sm:$0xf0]  ;;  %v2987_v23 = vld [vmem:[#allocation8 + $0x288] sm:$0xf]  ;;  %v2989_v62 = vld [vmem:[#allocation8 + $0x298] sm:$0xf0] }
 0x114   : > { %v2796_v33 = vor.u32 %v3539_v22, %v2795_v19  ;;  %v3549_v19 = vld [vmem:[#allocation8 + $0x16c] sm:$0xf]  ;;  %v3037_v22 = vld [vmem:[#allocation8 + $0x2f8] sm:$0xf0] }
 0x115   : > { %v611_v34 = vunpack.c.l.bf16 %v585_v27  ;;  %v612_v35 = vunpack.c.h.bf16 %v585_v27  ;;  %v3533_v27 = vld [vmem:[#allocation8 + $0xec] sm:$0xf] }
 0x116   : > { %1531 = vmatpush.bf16.msra.mxu0 %v2748_v24  ;;  %1545 = vmatpush.bf16.msra.mxu1 %v2876_v25  ;;  %v3587_v24 = vld [vmem:[#allocation8 + $0x294] sm:$0xf0]  ;;  %v3115_v25 = vld [vmem:[#allocation8 + $0x388] sm:$0xf]  ;;  %v2784_v38 = vor.u32 %v3533_v27, %v2781_v29  ;;  %v2720_v27 = vor.u32 %v3517_v17, %v2717_v18 }
 0x117   : > { %v623_v39 = vadd.f32 %v615_v20, %v611_v34  ;;  %v624_v40 = vadd.f32 %v616_v21, %v612_v35  ;;  %v3004_v20 = vor.u32 %v3591_v12, %v3003_v11  ;;  %v3132_v21 = vor.u32 %v3623_v14, %v3131_v13  ;;  %v2923_v11 = vld [vmem:[#allocation8 + $0x208] sm:$0xf]  ;;  %v3571_v12 = vld [vmem:[#allocation8 + $0x214] sm:$0xf0] }
 0x118   : > { %v2988_v34 = vor.u32 %v3587_v24, %v2987_v23  ;;  %v3116_v35 = vor.u32 %v3619_v26, %v3115_v25  ;;  %v3051_v13 = vld [vmem:[#allocation8 + $0x308] sm:$0xf]  ;;  %v2736_v14 = vor.u32 %v3521_v3, %v2733_v6  ;;  %v3629_v23 = vld [vmem:[#allocation8 + $0x3ec] sm:$0xf]  ;;  %v3165_v24 = vld [vmem:[#allocation8 + $0x3f8] sm:$0xf0]  ;;  %v2924_v25 = vor.u32 %v3571_v12, %v2923_v11 }
 0x119   : > { %v643_v49 = vmax.f32 %v623_v39, 0.0  ;;  %v644_v50 = vmax.f32 %v624_v40, 0.0  ;;  %v2912_v39 = vor.u32 %v3565_v30, %v2909_v31  ;;  %v3099_v40 = vld [vmem:[#allocation8 + $0x368] sm:$0xf]  ;;  %v3513_v30 = vld [vmem:[#allocation8 + $0x4c] sm:$0xf]  ;;  %v2992_v3 = vor.u32 %v3585_v61, %v2989_v62 }
 0x11a   : > { %1532 = vmatpush.bf16.msra.mxu0 %v2732_v36  ;;  %1546 = vmatpush.bf16.msra.mxu1 %v2860_v37  ;;  %v2971_v36 = vld [vmem:[#allocation8 + $0x268] sm:$0xf]  ;;  %v3583_v37 = vld [vmem:[#allocation8 + $0x274] sm:$0xf0]  ;;  %v2701_v31 = vld [vmem:[#allocation8 + $0x58] sm:$0xf0] }
 0x11b   : > { %v4416_v28 = vpack.c.bf16 %v643_v49, %v639_v47  ;;  %v4418_v52 = vpack.c.bf16 %v644_v50, %v640_v48  ;;  %v2972_v46 = vor.u32 %v3583_v37, %v2971_v36  ;;  %v3100_v47 = vor.u32 %v3615_v41, %v3099_v40  ;;  %v2955_v48 = vld [vmem:[#allocation8 + $0x248] sm:$0xf]  ;;  %v3579_v49 = vld [vmem:[#allocation8 + $0x254] sm:$0xf0]  ;;  %v3593_v36 = vld [vmem:[#allocation8 + $0x2cc] sm:$0xf] }
 0x11c   : > { %v2768_v50 = vor.u32 %v3529_v42, %v2765_v43  ;;  %v2956_v59 = vor.u32 %v3579_v49, %v2955_v48  ;;  %v3021_v37 = vld [vmem:[#allocation8 + $0x2d8] sm:$0xf0]  ;;  %v2704_v40 = vor.u32 %v3513_v30, %v2701_v31  ;;  %v3509_v42 = vld [vmem:[#allocation8 + $0x2c] sm:$0xf]  ;;  %v3227_v30 = vld [vmem:[#allocation11 + $0x70] sm:$0xf] }
 0x11d   : > { %1453 = vmatmul.bf16.vlgmr.msra.gmra.mxu2 %v4416_v28  ;;  %1467 = vmatmul.bf16.vlgmr.msra.gmra.mxu3 %v4418_v52  ;;  %v2685_v43 = vld [vmem:[#allocation8 + $0x38] sm:$0xf0]  ;;  %v3024_v44 = vor.u32 %v3593_v36, %v3021_v37  ;;  %v3589_v48 = vld [vmem:[#allocation8 + $0x2ac] sm:$0xf]  ;;  %v3251_v61 = vld [vmem:[#allocation11 + $0xa0] sm:$0xf] }
 0x11e   : > { %1481 = vmatmul.bf16.vlgmr.msrb.gmra.mxu0 %v4410_v4  ;;  %1495 = vmatmul.bf16.vlgmr.msrb.gmra.mxu1 %v4412_v5  ;;  %v3005_v49 = vld [vmem:[#allocation8 + $0x2b8] sm:$0xf0]  ;;  %v3645_v36 = vld [vmem:[#allocation11 + $0x64] sm:$0xf0] }
 0x11f   : > { %1533 = vmatpush.bf16.msra.mxu0 %v2716_v53  ;;  %1547 = vmatpush.bf16.msra.mxu1 %v2844_v54  ;;  %v3083_v53 = vld [vmem:[#allocation8 + $0x348] sm:$0xf]  ;;  %v3611_v54 = vld [vmem:[#allocation8 + $0x354] sm:$0xf0]  ;;  %v3647_v31 = vld [vmem:[#allocation11 + $0x74] sm:$0xf0] }
 0x120   : > { %1557 = vmatpush.bf16.msra.mxu2 %v3036_v57  ;;  %1571 = vmatpush.bf16.msra.mxu3 %v3164_v58  ;;  %v3557_v57 = vld [vmem:[#allocation8 + $0x1ac] sm:$0xf]  ;;  %v2877_v58 = vld [vmem:[#allocation8 + $0x1b8] sm:$0xf0]  ;;  %v3084_v60 = vor.u32 %v3611_v54, %v3083_v53  ;;  %v2688_v53 = vor.u32 %v3509_v42, %v2685_v43  ;;  %v3211_v42 = vld [vmem:[#allocation11 + $0x50] sm:$0xf] }
 0x121   : > { %v2880_v0 = vor.u32 %v3557_v57, %v2877_v58  ;;  %v3008_v57 = vor.u32 %v3589_v48, %v3005_v49  ;;  %v3275_v43 = vld [vmem:[#allocation11 + $0xd0] sm:$0xf]  ;;  %v3267_v48 = vld [vmem:[#allocation11 + $0xc0] sm:$0xf]  ;;  %v3657_v49 = vld [vmem:[#allocation11 + $0xc4] sm:$0xf0] }
 0x122   : > { %v3653_v62 = vld [vmem:[#allocation11 + $0xa4] sm:$0xf0] }
 0x123   : > { %1534 = vmatpush.bf16.msra.mxu0 %v2700_v1  ;;  %1548 = vmatpush.bf16.msra.mxu1 %v2828_v2  ;;  %v3067_v1 = vld [vmem:[#allocation8 + $0x328] sm:$0xf]  ;;  %v3607_v2 = vld [vmem:[#allocation8 + $0x334] sm:$0xf0] }
 0x124   : > { %1558 = vmatpush.bf16.msra.mxu2 %v3020_v7  ;;  %1572 = vmatpush.bf16.msra.mxu3 %v3148_v8  ;;  %v3553_v7 = vld [vmem:[#allocation8 + $0x18c] sm:$0xf]  ;;  %v2861_v8 = vld [vmem:[#allocation8 + $0x198] sm:$0xf0]  ;;  %v3068_v10 = vor.u32 %v3607_v2, %v3067_v1  ;;  %v2672_v1 = vor.u32 %v3505_v55, %v2669_v56  ;;  %v3259_v55 = vld [vmem:[#allocation11 + $0xb0] sm:$0xf] }
 0x127   : > { %1535 = vmatpush.bf16.msra.mxu0 %v2684_v15  ;;  %1549 = vmatpush.bf16.msra.mxu1 %v2812_v16  ;;  %v2864_v15 = vor.u32 %v3553_v7, %v2861_v8  ;;  %v3603_v16 = vld [vmem:[#allocation8 + $0x314] sm:$0xf0]  ;;  %v3581_v7 = vld [vmem:[#allocation8 + $0x26c] sm:$0xf]  ;;  %v2973_v8 = vld [vmem:[#allocation8 + $0x278] sm:$0xf0] }
 0x128   : > { %1559 = vmatpush.bf16.msra.mxu2 %v3004_v20  ;;  %1573 = vmatpush.bf16.msra.mxu3 %v3132_v21  ;;  %v2845_v20 = vld [vmem:[#allocation8 + $0x178] sm:$0xf0]  ;;  %v3597_v21 = vld [vmem:[#allocation8 + $0x2ec] sm:$0xf]  ;;  %v3052_v26 = vor.u32 %v3603_v16, %v3051_v13  ;;  %v2976_v11 = vor.u32 %v3581_v7, %v2973_v8 }
 0x129   : > { %v2848_v29 = vor.u32 %v3549_v19, %v2845_v20  ;;  %v3577_v13 = vld [vmem:[#allocation8 + $0x24c] sm:$0xf]  ;;  %v3085_v16 = vld [vmem:[#allocation8 + $0x358] sm:$0xf0] }
 0x12a   : > { %v3573_v19 = vld [vmem:[#allocation8 + $0x22c] sm:$0xf]  ;;  %v2941_v20 = vld [vmem:[#allocation8 + $0x238] sm:$0xf0] }
 0x12b   : > { %1536 = vmatpush.bf16.msra.mxu0 %v2668_v32  ;;  %1550 = vmatpush.bf16.msra.mxu1 %v2796_v33  ;;  %v3040_v32 = vor.u32 %v3597_v21, %v3037_v22  ;;  %v3168_v33 = vor.u32 %v3629_v23, %v3165_v24  ;;  %v3605_v21 = vld [vmem:[#allocation8 + $0x32c] sm:$0xf]  ;;  %v3069_v22 = vld [vmem:[#allocation8 + $0x338] sm:$0xf0]  ;;  %v2944_v23 = vor.u32 %v3573_v19, %v2941_v20  ;;  %v3662_v19 = vld [vmem:[#allocation11 + $0xf4] sm:$0xf] }
 0x12c   : > { %1560 = vmatpush.bf16.msra.mxu2 %v2988_v34  ;;  %1574 = vmatpush.bf16.msra.mxu3 %v3116_v35  ;;  %v3545_v34 = vld [vmem:[#allocation8 + $0x14c] sm:$0xf]  ;;  %v2829_v35 = vld [vmem:[#allocation8 + $0x158] sm:$0xf0]  ;;  %v3072_v24 = vor.u32 %v3605_v21, %v3069_v22  ;;  %v3293_v20 = vld [vmem:[#allocation11 + $0xf8] sm:$0xf0] }
 0x12d   : > { %1509 = vmatmul.bf16.vlgmr.msrb.gmra.mxu2 %v4416_v28  ;;  %1523 = vmatmul.bf16.vlgmr.msrb.gmra.mxu3 %v4418_v52  ;;  %v2832_v41 = vor.u32 %v3545_v34, %v2829_v35  ;;  %v3663_v34 = vld [vmem:[#allocation11 + $0xf4] sm:$0xf0]  ;;  %v3219_v35 = vld [vmem:[#allocation11 + $0x60] sm:$0xf]  ;;  %v3296_v22 = vor.u32 %v3662_v19, %v3293_v20 }
 0x12e   : > { %1537 = vmatmul.bf16.vlgmr.msra.gmra.mxu0 %v4410_v4  ;;  %1551 = vmatmul.bf16.vlgmr.msra.gmra.mxu1 %v4412_v5  ;;  %v3651_v7 = vld [vmem:[#allocation11 + $0x94] sm:$0xf0] }
 0x12f   : > { %1585 = vmatpush.bf16.msrb.mxu0 %v2784_v38  ;;  %1599 = vmatpush.bf16.msrb.mxu1 %v2912_v39  ;;  %v3625_v38 = vld [vmem:[#allocation8 + $0x3cc] sm:$0xf]  ;;  %v3149_v39 = vld [vmem:[#allocation8 + $0x3d8] sm:$0xf0] }
 0x130   : > { %1561 = vmatpush.bf16.msra.mxu2 %v2972_v46  ;;  %1575 = vmatpush.bf16.msra.mxu3 %v3100_v47  ;;  %v3152_v45 = vor.u32 %v3625_v38, %v3149_v39  ;;  %v3541_v46 = vld [vmem:[#allocation8 + $0x12c] sm:$0xf]  ;;  %v2813_v47 = vld [vmem:[#allocation8 + $0x138] sm:$0xf0]  ;;  %v3283_v38 = vld [vmem:[#allocation11 + $0xe0] sm:$0xf] }
 0x131   : > { %v2816_v54 = vor.u32 %v3541_v46, %v2813_v47  ;;  %v3661_v39 = vld [vmem:[#allocation11 + $0xe4] sm:$0xf0] }
 0x132   : > { %v3641_v46 = vld [vmem:[#allocation11 + $0x44] sm:$0xf0] }
 0x133   : > { %1586 = vmatpush.bf16.msrb.mxu0 %v2768_v50  ;;  %1600 = vmatpush.bf16.msrb.mxu1 %v2896_v51  ;;  %v3621_v50 = vld [vmem:[#allocation8 + $0x3ac] sm:$0xf]  ;;  %v3133_v51 = vld [vmem:[#allocation8 + $0x3b8] sm:$0xf0] }
 0x134   : > { %1562 = vmatpush.bf16.msra.mxu2 %v2956_v59  ;;  %1576 = vmatpush.bf16.msra.mxu3 %v3084_v60  ;;  %v3136_v58 = vor.u32 %v3621_v50, %v3133_v51  ;;  %v3537_v59 = vld [vmem:[#allocation8 + $0x10c] sm:$0xf]  ;;  %v2797_v60 = vld [vmem:[#allocation8 + $0x118] sm:$0xf0]  ;;  %v3268_v51 = vor.u32 %v3657_v49, %v3267_v48  ;;  %v3638_v49 = vld [vmem:[#allocation11 + $0x34] sm:$0xf] }
 0x135   : > { %v2800_v2 = vor.u32 %v3537_v59, %v2797_v60  ;;  %v3637_v59 = vld [vmem:[#allocation11 + $0x24] sm:$0xf0]  ;;  %v3695_v48 = vld [vmem:[#allocation11 + $0x1f4] sm:$0xf0] }
 0x137   : > { %1587 = vmatpush.bf16.msrb.mxu0 %v2752_v63  ;;  %1601 = vmatpush.bf16.msrb.mxu1 %v2880_v0  ;;  %v3617_v63 = vld [vmem:[#allocation8 + $0x38c] sm:$0xf]  ;;  %v3117_v0 = vld [vmem:[#allocation8 + $0x398] sm:$0xf0] }
 0x138   : > { %1563 = vmatpush.bf16.msra.mxu2 %v2940_v9  ;;  %1577 = vmatpush.bf16.msra.mxu3 %v3068_v10  ;;  %v3120_v6 = vor.u32 %v3617_v63, %v3117_v0  ;;  %v3613_v9 = vld [vmem:[#allocation8 + $0x36c] sm:$0xf]  ;;  %v3101_v10 = vld [vmem:[#allocation8 + $0x378] sm:$0xf0]  ;;  %v3252_v0 = vor.u32 %v3653_v62, %v3251_v61  ;;  %v3411_v61 = vld [vmem:[#allocation11 + $0x1e0] sm:$0xf] }
 0x139   : > { %v3104_v12 = vor.u32 %v3613_v9, %v3101_v10 }
 0x13b   : > { %1588 = vmatpush.bf16.msrb.mxu0 %v2736_v14  ;;  %1602 = vmatpush.bf16.msrb.mxu1 %v2864_v15  ;;  %v2957_v14 = vld [vmem:[#allocation8 + $0x258] sm:$0xf0]  ;;  %v3609_v15 = vld [vmem:[#allocation8 + $0x34c] sm:$0xf] }
 0x13c   : > { %1564 = vmatpush.bf16.msra.mxu2 %v2924_v25  ;;  %1578 = vmatpush.bf16.msra.mxu3 %v3052_v26  ;;  %v2960_v17 = vor.u32 %v3577_v13, %v2957_v14  ;;  %v3088_v18 = vor.u32 %v3609_v15, %v3085_v16  ;;  %v3569_v25 = vld [vmem:[#allocation8 + $0x20c] sm:$0xf]  ;;  %v2925_v26 = vld [vmem:[#allocation8 + $0x218] sm:$0xf0]  ;;  %v3235_v13 = vld [vmem:[#allocation11 + $0x80] sm:$0xf] }
 0x13d   : > { %v3649_v15 = vld [vmem:[#allocation11 + $0x84] sm:$0xf0]  ;;  %v3646_v16 = vld [vmem:[#allocation11 + $0x74] sm:$0xf] }
 0x13f   : > { %1589 = vmatpush.bf16.msrb.mxu0 %v2720_v27  ;;  %1603 = vmatpush.bf16.msrb.mxu1 %v2848_v29  ;;  %v3601_v27 = vld [vmem:[#allocation8 + $0x30c] sm:$0xf]  ;;  %v3053_v29 = vld [vmem:[#allocation8 + $0x318] sm:$0xf0] }
 0x140   : > { %1613 = vmatpush.bf16.msrb.mxu2 %v3040_v32  ;;  %1627 = vmatpush.bf16.msrb.mxu3 %v3168_v33  ;;  %v3291_v32 = vld [vmem:[#allocation11 + $0xf0] sm:$0xf]  ;;  %v3228_v33 = vor.u32 %v3647_v31, %v3227_v30 }
 0x141   : > { %1565 = vmatmul.bf16.vlgmr.msra.gmra.mxu2 %v4416_v28  ;;  %1579 = vmatmul.bf16.vlgmr.msra.gmra.mxu3 %v4418_v52  ;;  %v3292_v37 = vor.u32 %v3663_v34, %v3291_v32  ;;  %v3642_v32 = vld [vmem:[#allocation11 + $0x54] sm:$0xf] }
 0x142   : > { %v3658_v34 = vld [vmem:[#allocation11 + $0xd4] sm:$0xf] }
 0x143   : > { %1590 = vmatpush.bf16.msrb.mxu0 %v2704_v40  ;;  %1604 = vmatpush.bf16.msrb.mxu1 %v2832_v41  ;;  %v3220_v40 = vor.u32 %v3645_v36, %v3219_v35  ;;  %v3284_v41 = vor.u32 %v3661_v39, %v3283_v38  ;;  %v3277_v36 = vld [vmem:[#allocation11 + $0xd8] sm:$0xf0]  ;;  %v3640_v38 = vld [vmem:[#allocation11 + $0x44] sm:$0xf]  ;;  %v3205_v39 = vld [vmem:[#allocation11 + $0x48] sm:$0xf0] }
 0x144   : > { %1614 = vmatpush.bf16.msrb.mxu2 %v3024_v44  ;;  %1628 = vmatpush.bf16.msrb.mxu3 %v3152_v45  ;;  %v3659_v44 = vld [vmem:[#allocation11 + $0xd4] sm:$0xf0]  ;;  %v3203_v45 = vld [vmem:[#allocation11 + $0x40] sm:$0xf] }
 0x145   : > { %v3276_v47 = vor.u32 %v3659_v44, %v3275_v43  ;;  %v3204_v50 = vor.u32 %v3641_v46, %v3203_v45  ;;  %v3355_v44 = vld [vmem:[#allocation11 + $0x170] sm:$0xf]  ;;  %v3679_v45 = vld [vmem:[#allocation11 + $0x174] sm:$0xf0] }
 0x146   : > { %v3419_v46 = vld [vmem:[#allocation11 + $0x1f0] sm:$0xf] }
 0x147   : > { %1591 = vmatpush.bf16.msrb.mxu0 %v2688_v53  ;;  %1605 = vmatpush.bf16.msrb.mxu1 %v2816_v54  ;;  %v3195_v53 = vld [vmem:[#allocation11 + $0x30] sm:$0xf]  ;;  %v3639_v54 = vld [vmem:[#allocation11 + $0x34] sm:$0xf0] }
 0x148   : > { %1615 = vmatpush.bf16.msrb.mxu2 %v3008_v57  ;;  %1629 = vmatpush.bf16.msrb.mxu3 %v3136_v58  ;;  %v3196_v56 = vor.u32 %v3639_v54, %v3195_v53  ;;  %v3655_v57 = vld [vmem:[#allocation11 + $0xb4] sm:$0xf0]  ;;  %v3187_v58 = vld [vmem:[#allocation11 + $0x20] sm:$0xf]  ;;  %v3654_v54 = vld [vmem:[#allocation11 + $0xb4] sm:$0xf] }
 0x149   : > { %v3260_v60 = vor.u32 %v3655_v57, %v3259_v55  ;;  %v3188_v63 = vor.u32 %v3637_v59, %v3187_v58  ;;  %v3261_v55 = vld [vmem:[#allocation11 + $0xb8] sm:$0xf0]  ;;  %v3347_v59 = vld [vmem:[#allocation11 + $0x160] sm:$0xf] }
 0x14a   : > { %v3264_v58 = vor.u32 %v3654_v54, %v3261_v55  ;;  %v3387_v54 = vld [vmem:[#allocation11 + $0x1b0] sm:$0xf]  ;;  %v3687_v55 = vld [vmem:[#allocation11 + $0x1b4] sm:$0xf0] }
 0x14b   : > { %1592 = vmatpush.bf16.msrb.mxu0 %v2672_v1  ;;  %1606 = vmatpush.bf16.msrb.mxu1 %v2800_v2  ;;  %v3179_v1 = vld [vmem:[#allocation11 + $0x10] sm:$0xf]  ;;  %v3635_v2 = vld [vmem:[#allocation11 + $0x14] sm:$0xf0] }
 0x14c   : > { %1616 = vmatpush.bf16.msrb.mxu2 %v2992_v3  ;;  %1630 = vmatpush.bf16.msrb.mxu3 %v3120_v6  ;;  %v3243_v3 = vld [vmem:[#allocation11 + $0x90] sm:$0xf]  ;;  %v3180_v6 = vor.u32 %v3635_v2, %v3179_v1  ;;  %v3189_v1 = vld [vmem:[#allocation11 + $0x28] sm:$0xf0] }
 0x14d   : > { %v3244_v8 = vor.u32 %v3651_v7, %v3243_v3  ;;  %v3253_v7 = vld [vmem:[#allocation11 + $0xa8] sm:$0xf0] }
 0x14e   : > { %1593 = vmatmul.bf16.vlgmr.msrb.gmra.mxu0 %v4410_v4  ;;  %1607 = vmatmul.bf16.vlgmr.msrb.gmra.mxu1 %v4412_v5  ;;  %v2928_v4 = vor.u32 %v3569_v25, %v2925_v26  ;;  %v3056_v5 = vor.u32 %v3601_v27, %v3053_v29  ;;  %v3660_v25 = vld [vmem:[#allocation11 + $0xe4] sm:$0xf]  ;;  %v3285_v27 = vld [vmem:[#allocation11 + $0xe8] sm:$0xf0] }
 0x14f   : > { %2092 = vmatpush.bf16.msra.mxu0 %v3228_v33  ;;  %2106 = vmatpush.bf16.msra.mxu1 %v3292_v37  ;;  %v3288_v29 = vor.u32 %v3660_v25, %v3285_v27  ;;  %v3213_v33 = vld [vmem:[#allocation11 + $0x58] sm:$0xf0]  ;;  %v3280_v37 = vor.u32 %v3658_v34, %v3277_v36  ;;  %v3650_v27 = vld [vmem:[#allocation11 + $0x94] sm:$0xf]  ;;  %v3689_v36 = vld [vmem:[#allocation11 + $0x1c4] sm:$0xf0] }
 0x150   : > { %1617 = vmatpush.bf16.msrb.mxu2 %v2976_v11  ;;  %1631 = vmatpush.bf16.msrb.mxu3 %v3104_v12  ;;  %v3171_v11 = vld [vmem:[#allocation11] sm:$0xf]  ;;  %v3633_v12 = vld [vmem:[#allocation11 + $0x4] sm:$0xf0]  ;;  %v3216_v35 = vor.u32 %v3642_v32, %v3213_v33 }
 0x151   : > { %v3172_v14 = vor.u32 %v3633_v12, %v3171_v11  ;;  %v1648_v11 = vld [vmem:[#allocation1] sm:$0xff]  ;;  %v1649_v12 = vld [vmem:[#allocation1 + $0x9] sm:$0xff] }
 0x152   : > { %v3331_v32 = vld [vmem:[#allocation11 + $0x140] sm:$0xf]  ;;  %v1655_v33 = vpack.i.b16 %v1649_v12, %v1649_v12 }
 0x153   : > { %2093 = vmatpush.bf16.msra.mxu0 %v3220_v40  ;;  %2107 = vmatpush.bf16.msra.mxu1 %v3284_v41  ;;  %v3656_v40 = vld [vmem:[#allocation11 + $0xc4] sm:$0xf]  ;;  %v3208_v41 = vor.u32 %v3640_v38, %v3205_v39 }
 0x154   : > { %1618 = vmatpush.bf16.msrb.mxu2 %v2960_v17  ;;  %1632 = vmatpush.bf16.msrb.mxu3 %v3088_v18  ;;  %v3236_v17 = vor.u32 %v3649_v15, %v3235_v13  ;;  %v3229_v18 = vld [vmem:[#allocation11 + $0x78] sm:$0xf0]  ;;  %v3339_v15 = vld [vmem:[#allocation11 + $0x150] sm:$0xf] }
 0x155   : > { %v3232_v21 = vor.u32 %v3646_v16, %v3229_v18  ;;  %v3675_v16 = vld [vmem:[#allocation11 + $0x154] sm:$0xf0] }
 0x157   : > { %2108 = vmatpush.bf16.msra.mxu1 %v3276_v47  ;;  %v3356_v47 = vor.u32 %v3679_v45, %v3355_v44 }
 0x158   : > { %1619 = vmatpush.bf16.msrb.mxu2 %v2944_v23  ;;  %1633 = vmatpush.bf16.msrb.mxu3 %v3072_v24  ;;  %v3644_v23 = vld [vmem:[#allocation11 + $0x64] sm:$0xf]  ;;  %v3221_v24 = vld [vmem:[#allocation11 + $0x68] sm:$0xf0] }
 0x159   : > { %v3224_v26 = vor.u32 %v3644_v23, %v3221_v24  ;;  %v3634_v23 = vld [vmem:[#allocation11 + $0x14] sm:$0xf]  ;;  %v3181_v24 = vld [vmem:[#allocation11 + $0x18] sm:$0xf0] }
 0x15b   : > { %2109 = vmatpush.bf16.msra.mxu1 %v3268_v51  ;;  %v3420_v51 = vor.u32 %v3695_v48, %v3419_v46  ;;  %v3323_v48 = vld [vmem:[#allocation11 + $0x130] sm:$0xf] }
 0x15c   : > { %1620 = vmatpush.bf16.msrb.mxu2 %v2928_v4  ;;  %1634 = vmatpush.bf16.msrb.mxu3 %v3056_v5 }
 0x15f   : > { %1621 = vmatmul.bf16.vlgmr.msrb.gmra.mxu2 %v4416_v28  ;;  %1635 = vmatmul.bf16.vlgmr.msrb.gmra.mxu3 %v4418_v52  ;;  %v3643_v28 = vld [vmem:[#allocation11 + $0x54] sm:$0xf0] }
 0x160   : > { %v3212_v52 = vor.u32 %v3643_v28, %v3211_v42  ;;  %2110 = vmatpush.bf16.msra.mxu1 %v3260_v60  ;;  %v3269_v42 = vld [vmem:[#allocation11 + $0xc8] sm:$0xf0]  ;;  %2120 = vmatpush.bf16.msra.mxu2 %v3356_v47  ;;  %v3677_v60 = vld [vmem:[#allocation11 + $0x164] sm:$0xf0] }
 0x161   : > { %v3272_v28 = vor.u32 %v3656_v40, %v3269_v42  ;;  %2134 = vmatpush.bf16.msra.mxu3 %v3420_v51  ;;  %v3348_v62 = vor.u32 %v3677_v60, %v3347_v59  ;;  %v3632_v40 = vld [vmem:[#allocation11 + $0x4] sm:$0xf]  ;;  %v3237_v47 = vld [vmem:[#allocation11 + $0x88] sm:$0xf0]  ;;  %v3388_v60 = vor.u32 %v3687_v55, %v3387_v54  ;;  %v3674_v55 = vld [vmem:[#allocation11 + $0x154] sm:$0xf] }
 0x162   : > { %2094 = vmatpush.bf16.msra.mxu0 %v3212_v52  ;;  %v3648_v42 = vld [vmem:[#allocation11 + $0x84] sm:$0xf] }
 0x164   : > { %2111 = vmatpush.bf16.msra.mxu1 %v3252_v0  ;;  %v3636_v0 = vld [vmem:[#allocation11 + $0x24] sm:$0xf]  ;;  %2121 = vmatpush.bf16.msra.mxu2 %v3348_v62  ;;  %v3669_v62 = vld [vmem:[#allocation11 + $0x124] sm:$0xf0] }
 0x165   : > { %v3192_v3 = vor.u32 %v3636_v0, %v3189_v1  ;;  %v3379_v0 = vld [vmem:[#allocation11 + $0x1a0] sm:$0xf] }
 0x166   : > { %2095 = vmatpush.bf16.msra.mxu0 %v3204_v50  ;;  %v3197_v50 = vld [vmem:[#allocation11 + $0x38] sm:$0xf0] }
 0x167   : > { %v3200_v53 = vor.u32 %v3638_v49, %v3197_v50  ;;  %v3671_v49 = vld [vmem:[#allocation11 + $0x134] sm:$0xf0] }
 0x168   : > { %2112 = vmatpush.bf16.msra.mxu1 %v3244_v8 }
 0x16a   : > { %2096 = vmatpush.bf16.msra.mxu0 %v3196_v56 }
 0x16c   : > { %2113 = vmatpush.bf16.msra.mxu1 %v3236_v17  ;;  %v3403_v17 = vld [vmem:[#allocation11 + $0x1d0] sm:$0xf] }
 0x16e   : > { %2097 = vmatpush.bf16.msra.mxu0 %v3188_v63  ;;  %v3693_v63 = vld [vmem:[#allocation11 + $0x1e4] sm:$0xf0] }
 0x16f   : > { %v3412_v2 = vor.u32 %v3693_v63, %v3411_v61  ;;  %v3315_v61 = vld [vmem:[#allocation11 + $0x120] sm:$0xf] }
 0x170   : > { %2162 = vmatpush.bf16.msrb.mxu1 %v3296_v22  ;;  %v3691_v22 = vld [vmem:[#allocation11 + $0x1d4] sm:$0xf0] }
 0x171   : > { %2135 = vmatpush.bf16.msra.mxu3 %v3412_v2  ;;  %v3404_v25 = vor.u32 %v3691_v22, %v3403_v17  ;;  %v3683_v22 = vld [vmem:[#allocation11 + $0x194] sm:$0xf0] }
 0x172   : > { %2098 = vmatpush.bf16.msra.mxu0 %v3180_v6  ;;  %v3652_v6 = vld [vmem:[#allocation11 + $0xa4] sm:$0xf] }
 0x173   : > { %v3256_v13 = vor.u32 %v3652_v6, %v3253_v7 }
 0x174   : > { %2163 = vmatpush.bf16.msrb.mxu1 %v3288_v29  ;;  %v3245_v29 = vld [vmem:[#allocation11 + $0x98] sm:$0xf0] }
 0x175   : > { %v3248_v34 = vor.u32 %v3650_v27, %v3245_v29  ;;  %2136 = vmatpush.bf16.msra.mxu3 %v3404_v25  ;;  %v3299_v27 = vld [vmem:[#allocation11 + $0x100] sm:$0xf]  ;;  %v3665_v29 = vld [vmem:[#allocation11 + $0x104] sm:$0xf0] }
 0x176   : > { %2099 = vmatpush.bf16.msra.mxu0 %v3172_v14 }
 0x178   : > { %2164 = vmatpush.bf16.msrb.mxu1 %v3280_v37 }
 0x17a   : > { %2148 = vmatpush.bf16.msrb.mxu0 %v3232_v21  ;;  %v3340_v21 = vor.u32 %v3675_v16, %v3339_v15 }
 0x17c   : > { %2165 = vmatpush.bf16.msrb.mxu1 %v3272_v28  ;;  %2122 = vmatpush.bf16.msra.mxu2 %v3340_v21 }
 0x17e   : > { %2149 = vmatpush.bf16.msrb.mxu0 %v3224_v26  ;;  %v3184_v26 = vor.u32 %v3634_v23, %v3181_v24 }
 0x180   : > { %2166 = vmatpush.bf16.msrb.mxu1 %v3264_v58  ;;  %v3324_v58 = vor.u32 %v3671_v49, %v3323_v48  ;;  %v3413_v49 = vld [vmem:[#allocation11 + $0x1e8] sm:$0xf0] }
 0x182   : > { %2150 = vmatpush.bf16.msrb.mxu0 %v3216_v35  ;;  %v3673_v35 = vld [vmem:[#allocation11 + $0x144] sm:$0xf0] }
 0x183   : > { %v3332_v38 = vor.u32 %v3673_v35, %v3331_v32  ;;  %v3300_v32 = vor.u32 %v3665_v29, %v3299_v27  ;;  %v3301_v27 = vld [vmem:[#allocation11 + $0x108] sm:$0xf0] }
 0x184   : > { %2167 = vmatpush.bf16.msrb.mxu1 %v3256_v13 }
 0x185   : > { %2123 = vmatpush.bf16.msra.mxu2 %v3332_v38  ;;  %v3357_v38 = vld [vmem:[#allocation11 + $0x178] sm:$0xf0] }
 0x186   : > { %2151 = vmatpush.bf16.msrb.mxu0 %v3208_v41  ;;  %v3173_v41 = vld [vmem:[#allocation11 + $0x8] sm:$0xf0] }
 0x187   : > { %v3176_v46 = vor.u32 %v3632_v40, %v3173_v41  ;;  %v3421_v41 = vld [vmem:[#allocation11 + $0x1f8] sm:$0xf0] }
 0x188   : > { %2168 = vmatpush.bf16.msrb.mxu1 %v3248_v34  ;;  %v3681_v34 = vld [vmem:[#allocation11 + $0x184] sm:$0xf0] }
 0x189   : > { %2124 = vmatpush.bf16.msra.mxu2 %v3324_v58 }
 0x18a   : > { %v4434_v9 = vpop.f32.mrf.mxu0  ;;  %v4436_v10 = vpop.f32.mrf.mxu1  ;;  %2152 = vmatpush.bf16.msrb.mxu0 %v3200_v53  ;;  %v3240_v53 = vor.u32 %v3648_v42, %v3237_v47  ;;  %v3692_v47 = vld [vmem:[#allocation11 + $0x1e4] sm:$0xf] }
 0x18b   : > { %v1441_v8 = vadd.f32 %v4436_v10, %v4434_v9  ;;  %v1652_v10 = vpack.i.b16 %v1648_v11, %v1648_v11  ;;  %v3416_v54 = vor.u32 %v3692_v47, %v3413_v49 }
 0x18c   : > { %2169 = vmatpush.bf16.msrb.mxu1 %v3240_v53  ;;  %v2206_v53 = vld [vmem:[%s4566_s6] sm:$0x3] }
 0x18d   : > { %v1654_v51 = vperm.slane %v1652_v10, 0 }
 0x18e   : > { %2153 = vmatpush.bf16.msrb.mxu0 %v3192_v3 }
 0x192   : > { %v4442_v30 = vpop.f32.mrf.mxu0  ;;  %v4444_v31 = vpop.f32.mrf.mxu1  ;;  %2154 = vmatpush.bf16.msrb.mxu0 %v3184_v26 }
 0x193   : > { %v1443_v50 = vadd.f32 %v4444_v31, %v4442_v30  ;;  %v3685_v30 = vld [vmem:[#allocation11 + $0x1a4] sm:$0xf0]  ;;  %v1672_v31 = vunpack.c.l.bf16 %v1654_v51 }
 0x194   : > { %v3380_v12 = vor.u32 %v3685_v30, %v3379_v0  ;;  %v4464_v51 = vld [vmem:[#allocation1 + $0x1b] sm:$0xff]  ;;  %v3688_v0 = vld [vmem:[#allocation11 + $0x1c4] sm:$0xf] }
 0x196   : > { %2155 = vmatpush.bf16.msrb.mxu0 %v3176_v46  ;;  %v3349_v46 = vld [vmem:[#allocation11 + $0x168] sm:$0xf0] }
 0x19b   : > { %v1482_v56 = vpop.f32.mrf.mxu0  ;;  %v1496_v57 = vpop.f32.mrf.mxu1 }
 0x19c   : > { %v1497_v14 = vadd.f32 %v1496_v57, %v1482_v56  ;;  %v1657_v57 = vperm.slane %v1655_v33, 0  ;;  %v3363_v33 = vld [vmem:[#allocation11 + $0x180] sm:$0xf] }
 0x19e   : > { %v1673_v6 = vunpack.c.l.bf16 %v1657_v57  ;;  %v3690_v57 = vld [vmem:[#allocation11 + $0x1d4] sm:$0xf] }
 0x1a0   : > { %v4438_v4 = vpop.f32.mrf.mxu2  ;;  %v4440_v5 = vpop.f32.mrf.mxu3 }
 0x1a1   : > { %v1455_v18 = vadd.f32 %v4438_v4, %v1441_v8  ;;  %v3395_v4 = vld [vmem:[#allocation11 + $0x1c0] sm:$0xf]  ;;  %v3316_v8 = vor.u32 %v3669_v62, %v3315_v61  ;;  %v3672_v62 = vld [vmem:[#allocation11 + $0x144] sm:$0xf] }
 0x1a2   : > { %v3396_v39 = vor.u32 %v3689_v36, %v3395_v4  ;;  %v3364_v36 = vor.u32 %v3681_v34, %v3363_v33  ;;  %v3680_v33 = vld [vmem:[#allocation11 + $0x184] sm:$0xf]  ;;  %v3365_v34 = vld [vmem:[#allocation11 + $0x188] sm:$0xf0] }
 0x1a3   : > { %v1469_v28 = vadd.f32 %v4440_v5, %v1455_v18  ;;  %v1484_v44 = vpop.f32.mrf.mxu0  ;;  %v1498_v45 = vpop.f32.mrf.mxu1  ;;  %2125 = vmatpush.bf16.msra.mxu2 %v3316_v8  ;;  %v3307_v18 = vld [vmem:[#allocation11 + $0x110] sm:$0xf]  ;;  %v3686_v8 = vld [vmem:[#allocation11 + $0x1b4] sm:$0xf] }
 0x1a4   : > { %v1499_v5 = vadd.f32 %v1498_v45, %v1484_v44  ;;  %2137 = vmatpush.bf16.msra.mxu3 %v3396_v39  ;;  %v3694_v39 = vld [vmem:[#allocation11 + $0x1f4] sm:$0xf]  ;;  %v3676_v45 = vld [vmem:[#allocation11 + $0x164] sm:$0xf] }
 0x1a5   : > { %v3424_v44 = vor.u32 %v3694_v39, %v3421_v41  ;;  %v3352_v48 = vor.u32 %v3676_v45, %v3349_v46  ;;  %v3368_v41 = vor.u32 %v3680_v33, %v3365_v34 }
 0x1a8   : > { %v4446_v43 = vpop.f32.mrf.mxu2  ;;  %v4448_v52 = vpop.f32.mrf.mxu3  ;;  %2138 = vmatpush.bf16.msra.mxu3 %v3388_v60  ;;  %v3405_v60 = vld [vmem:[#allocation11 + $0x1d8] sm:$0xf0] }
 0x1a9   : > { %v1457_v59 = vadd.f32 %v4446_v43, %v1443_v50  ;;  %v4462_v50 = vld [vmem:[#allocation1 + $0x12] sm:$0xff]  ;;  %v3408_v61 = vor.u32 %v3690_v57, %v3405_v60 }
 0x1aa   : > { %2208 = vst [vmem:[#allocation1] ss:$9 sm:$0xff] %v2206_v53  ;;  %v1658_v39 = vpack.i.b16 %v4462_v50, %v4462_v50 }
 0x1ab   : > { %v1471_v11 = vadd.f32 %v4448_v52, %v1457_v59  ;;  %v4458_v42 = vpop.f32.mrf.mxu0 }
 0x1ac   : > { %2139 = vmatpush.bf16.msra.mxu3 %v3380_v12  ;;  %v1660_v47 = vperm.slane %v1658_v39, 0 }
 0x1b0   : > { %v1510_v19 = vpop.f32.mrf.mxu2  ;;  %v1524_v20 = vpop.f32.mrf.mxu3 }
 0x1b1   : > { %v1511_v9 = vadd.f32 %v1510_v19, %v1497_v14  ;;  %v3667_v19 = vld [vmem:[#allocation11 + $0x114] sm:$0xf0] }
 0x1b2   : > { %v3308_v21 = vor.u32 %v3667_v19, %v3307_v18  ;;  %v3381_v18 = vld [vmem:[#allocation11 + $0x1a8] sm:$0xf0]  ;;  %v2210_v39 = vld [vmem:[#allocation1 + $0x9] sm:$0xff] }
 0x1b3   : > { %v1525_v37 = vadd.f32 %v1524_v20, %v1511_v9  ;;  %v3371_v20 = vld [vmem:[#allocation11 + $0x190] sm:$0xf]  ;;  %v1540_v30 = vpop.f32.mrf.mxu0 }
 0x1b4   : > { %v3372_v9 = vor.u32 %v3683_v22, %v3371_v20  ;;  %2126 = vmatpush.bf16.msra.mxu2 %v3308_v21 }
 0x1b5   : > { %v1641_v56 = vpack.c.bf16 %v1525_v37, %v1469_v28  ;;  %v3678_v37 = vld [vmem:[#allocation11 + $0x174] sm:$0xf]  ;;  %v4460_v28 = vpop.f32.mrf.mxu1 }
 0x1b6   : > { %2140 = vmatpush.bf16.msra.mxu3 %v3372_v9  ;;  %v3360_v40 = vor.u32 %v3678_v37, %v3357_v38  ;;  %v3682_v9 = vld [vmem:[#allocation11 + $0x194] sm:$0xf]  ;;  %v1553_v29 = vadd.f32 %v4460_v28, %v4458_v42 }
 0x1b7   : > { %v1664_v2 = vunpack.c.l.bf16 %v1641_v56  ;;  %v1665_v3 = vunpack.c.h.bf16 %v1641_v56  ;;  %v3341_v56 = vld [vmem:[#allocation11 + $0x158] sm:$0xf0] }
 0x1b8   : > { %v1512_v63 = vpop.f32.mrf.mxu2  ;;  %v1526_v7 = vpop.f32.mrf.mxu3  ;;  %2127 = vmatpush.bf16.msra.mxu2 %v3300_v32  ;;  %v3344_v59 = vor.u32 %v3674_v55, %v3341_v56  ;;  %v1674_v56 = vunpack.c.l.bf16 %v1660_v47 }
 0x1b9   : > { %v1513_v1 = vadd.f32 %v1512_v63, %v1499_v5  ;;  %v1676_v14 = vadd.f32 %v1672_v31, %v1664_v2  ;;  %v1677_v15 = vadd.f32 %v1673_v6, %v1665_v3  ;;  %v3333_v63 = vld [vmem:[#allocation11 + $0x148] sm:$0xf0] }
 0x1ba   : > { %2141 = vmatpush.bf16.msra.mxu3 %v3364_v36  ;;  %v3397_v2 = vld [vmem:[#allocation11 + $0x1c8] sm:$0xf0] }
 0x1bb   : > { %v1527_v43 = vadd.f32 %v1526_v7, %v1513_v1  ;;  %v1696_v10 = vmax.f32 %v1676_v14, 0.0  ;;  %v1697_v52 = vmax.f32 %v1677_v15, 0.0  ;;  %v3336_v1 = vor.u32 %v3672_v62, %v3333_v63  ;;  %v3325_v7 = vld [vmem:[#allocation11 + $0x138] sm:$0xf0]  ;;  %v3317_v14 = vld [vmem:[#allocation11 + $0x128] sm:$0xf0] }
 0x1bc   : > { %2176 = vmatpush.bf16.msrb.mxu2 %v3360_v40  ;;  %v3400_v3 = vor.u32 %v3688_v0, %v3397_v2  ;;  %v3684_v15 = vld [vmem:[#allocation11 + $0x1a4] sm:$0xf]  ;;  %v1661_v40 = vpack.i.b16 %v4464_v51, %v4464_v51 }
 0x1bd   : > { %v1643_v13 = vpack.c.bf16 %v1527_v43, %v1471_v11  ;;  %v3389_v43 = vld [vmem:[#allocation11 + $0x1b8] sm:$0xf0]  ;;  %v3384_v22 = vor.u32 %v3684_v15, %v3381_v18  ;;  %v3701_v15 = vld [vmem:[#allocation13 + $0x28] sm:$0xff]  ;;  %v3708_v18 = vld [vmem:[#allocation13 + $0x60] sm:$0xff] }
 0x1be   : > { %2190 = vmatpush.bf16.msrb.mxu3 %v3424_v44  ;;  %v3392_v12 = vor.u32 %v3686_v8, %v3389_v43  ;;  %v3703_v43 = vld [vmem:[#allocation13 + $0x38] sm:$0xff] }
 0x1bf   : > { %v1668_v16 = vunpack.c.l.bf16 %v1643_v13  ;;  %v1669_v17 = vunpack.c.h.bf16 %v1643_v13  ;;  %v3668_v13 = vld [vmem:[#allocation11 + $0x124] sm:$0xf] }
 0x1c0   : > { %2177 = vmatpush.bf16.msrb.mxu2 %v3352_v48  ;;  %v3320_v19 = vor.u32 %v3668_v13, %v3317_v14  ;;  %v1663_v48 = vperm.slane %v1661_v40, 0  ;;  %v3702_v13 = vld [vmem:[#allocation13 + $0x30] sm:$0xff] }
 0x1c1   : > { %v1680_v23 = vadd.f32 %v1672_v31, %v1668_v16  ;;  %v1681_v24 = vadd.f32 %v1673_v6, %v1669_v17  ;;  %v1554_v31 = vpop.f32.mrf.mxu1  ;;  %v3670_v6 = vld [vmem:[#allocation11 + $0x134] sm:$0xf] }
 0x1c2   : > { %2191 = vmatpush.bf16.msrb.mxu3 %v3416_v54  ;;  %v3328_v11 = vor.u32 %v3670_v6, %v3325_v7  ;;  %v1555_v28 = vadd.f32 %v1554_v31, %v1540_v30  ;;  %v1675_v57 = vunpack.c.l.bf16 %v1663_v48  ;;  %v3710_v14 = vld [vmem:[#allocation13 + $0x70] sm:$0xff] }
 0x1c3   : > { %v1700_v25 = vmax.f32 %v1680_v23, 0.0  ;;  %v1701_v26 = vmax.f32 %v1681_v24, 0.0  ;;  %v3666_v23 = vld [vmem:[#allocation11 + $0x114] sm:$0xf]  ;;  %v3309_v24 = vld [vmem:[#allocation11 + $0x118] sm:$0xf0] }
 0x1c4   : > { %v1566_v58 = vpop.f32.mrf.mxu2  ;;  %v4469_v5 = vpop.f32.mrf.mxu3  ;;  %2178 = vmatpush.bf16.msrb.mxu2 %v3344_v59 }
 0x1c5   : > { %v1704_v35 = vpack.c.bf16 %v1700_v25, %v1696_v10  ;;  %v1705_v4 = vpack.c.bf16 %v1701_v26, %v1697_v52  ;;  %v3373_v10 = vld [vmem:[#allocation11 + $0x198] sm:$0xf0]  ;;  %v3312_v52 = vor.u32 %v3666_v23, %v3309_v24  ;;  %v3664_v26 = vld [vmem:[#allocation11 + $0x104] sm:$0xf]  ;;  %v1567_v36 = vadd.f32 %v1566_v58, %v1553_v29  ;;  %v3698_v23 = vld [vmem:[#allocation13 + $0x10] sm:$0xff] }
 0x1c6   : > { %2192 = vmatpush.bf16.msrb.mxu3 %v3408_v61  ;;  %v3376_v25 = vor.u32 %v3682_v9, %v3373_v10  ;;  %v3304_v38 = vor.u32 %v3664_v26, %v3301_v27  ;;  %v3706_v24 = vld [vmem:[#allocation13 + $0x50] sm:$0xff]  ;;  %v3697_v9 = vld [vmem:[#allocation13 + $0x8] sm:$0xff]  ;;  %v3696_v29 = vld [vmem:[#allocation13] sm:$0xff] }
 0x1c7   : > { %2100 = vmatmul.bf16.vlgmr.msra.gmra.mxu0 %v1704_v35  ;;  %2114 = vmatmul.bf16.vlgmr.msra.gmra.mxu1 %v1705_v4  ;;  %v1581_v46 = vadd.f32 %v4469_v5, %v1567_v36  ;;  %v3705_v10 = vld [vmem:[#allocation13 + $0x48] sm:$0xff] }
 0x1c8   : > { %2179 = vmatpush.bf16.msrb.mxu2 %v3336_v1  ;;  %2371 = vmatpush.bf16.msra.mxu0 %v3703_v43 }
 0x1ca   : > { %2193 = vmatpush.bf16.msrb.mxu3 %v3400_v3 }
 0x1cb   : > { %v1594_v20 = vpop.f32.mrf.mxu0  ;;  %v1608_v21 = vpop.f32.mrf.mxu1 }
 0x1cc   : > { %v1568_v16 = vpop.f32.mrf.mxu2  ;;  %v1582_v17 = vpop.f32.mrf.mxu3  ;;  %2180 = vmatpush.bf16.msrb.mxu2 %v3328_v11  ;;  %v1609_v32 = vadd.f32 %v1608_v21, %v1594_v20  ;;  %2372 = vmatpush.bf16.msra.mxu0 %v3702_v13  ;;  %v3699_v21 = vld [vmem:[#allocation13 + $0x18] sm:$0xff] }
 0x1cd   : > { %v1569_v49 = vadd.f32 %v1568_v16, %v1555_v28  ;;  %v3709_v16 = vld [vmem:[#allocation13 + $0x68] sm:$0xff]  ;;  %v2214_v28 = vpack.i.b16 %v2210_v39, %v2210_v39 }
 0x1ce   : > { %2194 = vmatpush.bf16.msrb.mxu3 %v3392_v12  ;;  %v3711_v12 = vld [vmem:[#allocation13 + $0x78] sm:$0xff] }
 0x1cf   : > { %v1583_v58 = vadd.f32 %v1582_v17, %v1569_v49  ;;  %2385 = vmatpush.bf16.msra.mxu1 %v3711_v12  ;;  %v3700_v17 = vld [vmem:[#allocation13 + $0x20] sm:$0xff] }
 0x1d0   : > { %2181 = vmatpush.bf16.msrb.mxu2 %v3320_v19  ;;  %2373 = vmatpush.bf16.msra.mxu0 %v3701_v15  ;;  %v2399_v15 = vlaneseq }
 0x1d2   : > { %2195 = vmatpush.bf16.msrb.mxu3 %v3384_v22  ;;  %v3707_v22 = vld [vmem:[#allocation13 + $0x58] sm:$0xff] }
 0x1d3   : > { %v1596_v45 = vpop.f32.mrf.mxu0  ;;  %v1610_v42 = vpop.f32.mrf.mxu1  ;;  %2386 = vmatpush.bf16.msra.mxu1 %v3710_v14 }
 0x1d4   : > { %2182 = vmatpush.bf16.msrb.mxu2 %v3312_v52  ;;  %v1611_v53 = vadd.f32 %v1610_v42, %v1596_v45  ;;  %2374 = vmatpush.bf16.msra.mxu0 %v3700_v17  ;;  %v4481_v17 = vand.u32 127, %v2399_v15 }
 0x1d6   : > { %2196 = vmatpush.bf16.msrb.mxu3 %v3376_v25  ;;  %vm2401_vm2 = vcmp.lt.s32.totalorder %v4481_v17, 11  ;;  %vm2450_vm7 = vcmp.eq.s32.totalorder %v4481_v17, 11 }
 0x1d7   : > { %2156 = vmatmul.bf16.vlgmr.msrb.gmra.mxu0 %v1704_v35  ;;  %2170 = vmatmul.bf16.vlgmr.msrb.gmra.mxu1 %v1705_v4 }
 0x1d8   : > { %2183 = vmatpush.bf16.msrb.mxu2 %v3304_v38  ;;  %2387 = vmatpush.bf16.msra.mxu1 %v3709_v16  ;;  %v2209_v38 = vld [vmem:[#allocation1] sm:$0xff] }
 0x1d9   : > { %2375 = vmatpush.bf16.msra.mxu0 %v3699_v21  ;;  %v2211_v42 = vpack.i.b16 %v2209_v38, %v2209_v38  ;;  %v3823_v16 = vld [vmem:[%s4568_s8] ss:$0 sm:$0xff] }
 0x1da   : > { %2197 = vmatpush.bf16.msrb.mxu3 %v3368_v41 }
 0x1dc   : > { %2388 = vmatpush.bf16.msra.mxu1 %v3708_v18 }
 0x1dd   : > { %2376 = vmatpush.bf16.msra.mxu0 %v3698_v23 }
 0x1e0   : > { %2389 = vmatpush.bf16.msra.mxu1 %v3707_v22 }
 0x1e1   : > { %2377 = vmatpush.bf16.msra.mxu0 %v3697_v9 }
 0x1e2   : > { %v1622_v35 = vpop.f32.mrf.mxu2  ;;  %v1636_v4 = vpop.f32.mrf.mxu3 }
 0x1e3   : > { %v1623_v37 = vadd.f32 %v1622_v35, %v1609_v32  ;;  %v3704_v32 = vld [vmem:[#allocation13 + $0x40] sm:$0xff] }
 0x1e4   : > { %2390 = vmatpush.bf16.msra.mxu1 %v3706_v24 }
 0x1e5   : > { %v1637_v44 = vadd.f32 %v1636_v4, %v1623_v37  ;;  %2378 = vmatpush.bf16.msra.mxu0 %v3696_v29 }
 0x1e7   : > { %v1642_v54 = vpack.c.bf16 %v1637_v44, %v1581_v46 }
 0x1e8   : > { %2391 = vmatpush.bf16.msra.mxu1 %v3705_v10 }
 0x1e9   : > { %v1666_v59 = vunpack.c.l.bf16 %v1642_v54  ;;  %v1667_v60 = vunpack.c.h.bf16 %v1642_v54  ;;  %v2213_v54 = vperm.slane %v2211_v42, 0 }
 0x1ea   : > { %v1624_v55 = vpop.f32.mrf.mxu2  ;;  %v1638_v51 = vpop.f32.mrf.mxu3 }
 0x1eb   : > { %v1625_v50 = vadd.f32 %v1624_v55, %v1611_v53  ;;  %v1678_v63 = vadd.f32 %v1674_v56, %v1666_v59  ;;  %v1679_v0 = vadd.f32 %v1675_v57, %v1667_v60  ;;  %v2216_v55 = vperm.slane %v2214_v28, 0 }
 0x1ec   : > { %2392 = vmatpush.bf16.msra.mxu1 %v3704_v32  ;;  %v2221_v59 = vunpack.c.l.bf16 %v2213_v54 }
 0x1ed   : > { %v1639_v61 = vadd.f32 %v1638_v51, %v1625_v50  ;;  %v1698_v2 = vmax.f32 %v1678_v63, 0.0  ;;  %v1699_v3 = vmax.f32 %v1679_v0, 0.0  ;;  %v2222_v60 = vunpack.c.l.bf16 %v2216_v55 }
 0x1ef   : > { %v1644_v62 = vpack.c.bf16 %v1639_v61, %v1583_v58 }
 0x1f1   : > { %v1670_v5 = vunpack.c.l.bf16 %v1644_v62  ;;  %v1671_v30 = vunpack.c.h.bf16 %v1644_v62 }
 0x1f3   : > { %v1682_v31 = vadd.f32 %v1674_v56, %v1670_v5  ;;  %v1683_v1 = vadd.f32 %v1675_v57, %v1671_v30 }
 0x1f5   : > { %v1702_v6 = vmax.f32 %v1682_v31, 0.0  ;;  %v1703_v7 = vmax.f32 %v1683_v1, 0.0 }
 0x1f7   : > { %v1706_v8 = vpack.c.bf16 %v1702_v6, %v1698_v2  ;;  %v1707_v11 = vpack.c.bf16 %v1703_v7, %v1699_v3 }
 0x1f9   : > { %2128 = vmatmul.bf16.vlgmr.msra.gmra.mxu2 %v1706_v8  ;;  %2142 = vmatmul.bf16.vlgmr.msra.gmra.mxu3 %v1707_v11 }
 0x209   : > { %2184 = vmatmul.bf16.vlgmr.msrb.gmra.mxu2 %v1706_v8  ;;  %2198 = vmatmul.bf16.vlgmr.msrb.gmra.mxu3 %v1707_v11 }
 0x244   : > { %v2101_v19 = vpop.f32.mrf.mxu0  ;;  %v2115_v20 = vpop.f32.mrf.mxu1 }
 0x245   : > { %v2116_v36 = vadd.f32 %v2115_v20, %v2101_v19 }
 0x24c   : > { %v2103_v52 = vpop.f32.mrf.mxu0  ;;  %v2117_v25 = vpop.f32.mrf.mxu1 }
 0x24d   : > { %v2118_v49 = vadd.f32 %v2117_v25, %v2103_v52 }
 0x254   : > { %v2157_v35 = vpop.f32.mrf.mxu0  ;;  %v2171_v4 = vpop.f32.mrf.mxu1 }
 0x255   : > { %v2172_v37 = vadd.f32 %v2171_v4, %v2157_v35 }
 0x25c   : > { %v2159_v47 = vpop.f32.mrf.mxu0  ;;  %v2173_v48 = vpop.f32.mrf.mxu1 }
 0x25d   : > { %v2174_v50 = vadd.f32 %v2173_v48, %v2159_v47 }
 0x27c   : > { %v2129_v26 = vpop.f32.mrf.mxu2  ;;  %v2143_v27 = vpop.f32.mrf.mxu3 }
 0x27d   : > { %v2130_v44 = vadd.f32 %v2129_v26, %v2116_v36 }
 0x27f   : > { %v2144_v53 = vadd.f32 %v2143_v27, %v2130_v44 }
 0x284   : > { %v2131_v33 = vpop.f32.mrf.mxu2  ;;  %v2145_v34 = vpop.f32.mrf.mxu3 }
 0x285   : > { %v2132_v56 = vadd.f32 %v2131_v33, %v2118_v49 }
 0x287   : > { %v2146_v62 = vadd.f32 %v2145_v34, %v2132_v56 }
 0x28c   : > { %v2185_v40 = vpop.f32.mrf.mxu2  ;;  %v2199_v41 = vpop.f32.mrf.mxu3 }
 0x28d   : > { %v2186_v45 = vadd.f32 %v2185_v40, %v2172_v37 }
 0x28f   : > { %v2200_v46 = vadd.f32 %v2199_v41, %v2186_v45 }
 0x291   : > { %v2204_v57 = vpack.c.bf16 %v2200_v46, %v2144_v53 }
 0x293   : > { %v2217_v63 = vunpack.c.l.bf16 %v2204_v57  ;;  %v2218_v0 = vunpack.c.h.bf16 %v2204_v57 }
 0x294   : > { %v2187_v51 = vpop.f32.mrf.mxu2  ;;  %v2201_v61 = vpop.f32.mrf.mxu3 }
 0x295   : > { %v2188_v58 = vadd.f32 %v2187_v51, %v2174_v50  ;;  %v2223_v31 = vadd.f32 %v2221_v59, %v2217_v63  ;;  %v2224_v1 = vadd.f32 %v2222_v60, %v2218_v0 }
 0x297   : > { %v2202_v5 = vadd.f32 %v2201_v61, %v2188_v58  ;;  %v2233_v8 = vmax.f32 %v2223_v31, 0.0  ;;  %v2234_v11 = vmax.f32 %v2224_v1, 0.0 }
 0x299   : > { %v2205_v30 = vpack.c.bf16 %v2202_v5, %v2146_v62 }
 0x29b   : > { %v2219_v2 = vunpack.c.l.bf16 %v2205_v30  ;;  %v2220_v3 = vunpack.c.h.bf16 %v2205_v30 }
 0x29d   : > { %v2225_v6 = vadd.f32 %v2221_v59, %v2219_v2  ;;  %v2226_v7 = vadd.f32 %v2222_v60, %v2220_v3 }
 0x29f   : > { %v2235_v43 = vmax.f32 %v2225_v6, 0.0  ;;  %v2236_v12 = vmax.f32 %v2226_v7, 0.0 }
 0x2a1   : > { %v2237_v13 = vpack.c.bf16 %v2235_v43, %v2233_v8  ;;  %v2238_v14 = vpack.c.bf16 %v2236_v12, %v2234_v11 }
 0x2a3   : > { %2379 = vmatmul.bf16.vlgmr.msra.gmra.mxu0 %v2237_v13  ;;  %2393 = vmatmul.bf16.vlgmr.msra.gmra.mxu1 %v2238_v14 }
 0x320   : > { %v2380_v18 = vpop.f32.mrf.mxu0  ;;  %v2394_v19 = vpop.f32.mrf.mxu1 }
 0x321   : > { %v2381_v20 = vadd.f32 %v3823_v16, %v2380_v18 }
 0x323   : > { %v2395_v21 = vadd.f32 %v2394_v19, %v2381_v20 }
 0x325   : > { %v2402_v22 = vsel %vm2401_vm2, %v2395_v21, -1e+30 }
 0x326   : > { %2404 = vmax.xlane.f32.xlu0 %v2402_v22 }
 0x328   : > { %v2382_v23 = vpop.f32.mrf.mxu0  ;;  %v2396_v9 = vpop.f32.mrf.mxu1 }
 0x329   : > { %v2383_v24 = vadd.f32 %v3823_v16, %v2382_v23 }
 0x32b   : > { %v2397_v10 = vadd.f32 %v2396_v9, %v2383_v24 }
 0x32d   : > { %v2403_v52 = vsel %vm2401_vm2, %v2397_v10, -1e+30 }
 0x32e   : > { %2406 = vmax.xlane.f32.xlu0 %v2403_v52 }
 0x399   : > { %v2405_v25 = vpop.xlane.xlu0 %2404 }
 0x39a   : > { %v2408_v26 = vsub.f32 %v2402_v22, %v2405_v25 }
 0x39c   : > { %v2410_v27 = vmul.f32 1.442695, %v2408_v26 }
 0x39e   : > { %3824 = vpow2.f32 %v2410_v27 }
 0x3a1   : > { %v2407_v29 = vpop.xlane.xlu0 %2406 }
 0x3a2   : > { %v2409_v32 = vsub.f32 %v2403_v52, %v2407_v29 }
 0x3a4   : > { %v3825_v33 = vpop.eup %3824  ;;  %v2412_v34 = vmul.f32 1.442695, %v2409_v32 }
 0x3a5   : > { %v2414_v35 = vsel %vm2401_vm2, %v3825_v33, 0.0 }
 0x3a6   : > { %3826 = vpow2.f32 %v2412_v34  ;;  %2416 = vadd.xlane.f32.xlu1 %v2414_v35 }
 0x3ac   : > { %v3827_v4 = vpop.eup %3826 }
 0x3ad   : > { %v2415_v36 = vsel %vm2401_vm2, %v3827_v4, 0.0 }
 0x3ae   : > { %2418 = vadd.xlane.f32.xlu1 %v2415_v36 }
 0x419   : > { %v2417_v37 = vpop.xlane.xlu1 %2416 }
 0x41a   : > { %3828 = vrcp.f32 %v2417_v37  ;;  %v2431_v44 = vand.u32 2147483648, %v2417_v37  ;;  %v2429_v42 = vand.u32 2147483647, %v2417_v37  ;;  %vm2425_vm4 = vweird.f32 %v2417_v37 }
 0x41c   : > { %v2432_v47 = vor.u32 1.1754944e-38, %v2431_v44  ;;  %vm2430_vm6 = vcmp.eq.f32.partialorder %v2429_v42, 8.507059e+37 }
 0x420   : > { %v3829_v38 = vpop.eup %3828 }
 0x421   : > { %v2421_v39 = vmul.f32 %v3829_v38, %v2417_v37  ;;  %v2419_v40 = vpop.xlane.xlu1 %2418  ;;  %vm2426_vm3 = vweird.f32 %v3829_v38 }
 0x422   : > { %3830 = vrcp.f32 %v2419_v40  ;;  %vm2427_vm5 = vmor %vm2425_vm4, %vm2426_vm3  ;;  %v2446_v50 = vand.u32 2147483648, %v2419_v40  ;;  %v2444_v51 = vand.u32 2147483647, %v2419_v40  ;;  %vm2440_vm9 = vweird.f32 %v2419_v40 }
 0x423   : > { %v2422_v41 = vsub.f32 1.0, %v2421_v39 }
 0x424   : > { %v2447_v59 = vor.u32 1.1754944e-38, %v2446_v50  ;;  %vm2445_vm11 = vcmp.eq.f32.partialorder %v2444_v51, 8.507059e+37 }
 0x425   : > { %v2423_v45 = vmul.f32 %v3829_v38, %v2422_v41 }
 0x427   : > { %v2424_v28 = vadd.f32 %v3829_v38, %v2423_v45 }
 0x428   : > { %v3831_v46 = vpop.eup %3830 }
 0x429   : > { %v2428_v48 = vsel %vm2427_vm5, %v3829_v38, %v2424_v28  ;;  %v2436_v49 = vmul.f32 %v3831_v46, %v2419_v40  ;;  %vm2441_vm8 = vweird.f32 %v3831_v46 }
 0x42a   : > { %v2433_v53 = vsel %vm2430_vm6, %v2432_v47, %v2428_v48  ;;  %vm2442_vm10 = vmor %vm2440_vm9, %vm2441_vm8 }
 0x42b   : > { %v2434_v54 = vmul.f32 %v2433_v53, %v2414_v35  ;;  %v2437_v55 = vsub.f32 1.0, %v2436_v49 }
 0x42d   : > { %v2451_v56 = vsel %vm2450_vm7, %v2395_v21, %v2434_v54  ;;  %v2438_v57 = vmul.f32 %v3831_v46, %v2437_v55 }
 0x42e   : > { %2453 = vst [vmem:[%s454_s18] sm:$0xff] %v2451_v56 }
 0x42f   : > { %v2439_v58 = vadd.f32 %v3831_v46, %v2438_v57 }
 0x431   : > { %v2443_v60 = vsel %vm2442_vm10, %v3831_v46, %v2439_v58 }
 0x432   : > { %v2448_v61 = vsel %vm2445_vm11, %v2447_v59, %v2443_v60  ;;  %2462 = sbr.rel (!%p4262_p11) target bundleno = 1110 (0x456), region = 88 }
 0x433   : > { %v2449_v62 = vmul.f32 %v2448_v61, %v2415_v36 }
 0x435   : > { %v2452_v63 = vsel %vm2450_vm7, %v2397_v10, %v2449_v62 }
 0x436   : > { %2454 = vst [vmem:[%s454_s18 + $0x8] sm:$0xff] %v2452_v63 }
 0x437   : > { %s4615_s15 = smov (!%p2465_p6, %s2464_s15), 2 }
 0x438   : > { %s3491_s17 = sshll.u32 %s4615_s15, 3 }
 0x439   : > { %s2468_s24 = ssub.s32 16, %s3491_s17 }
 0x43a   : > { %s2469_s25 = sshll.u32 %s2468_s24, 4 }
 0x43b   : > { %2470 = vsyncadd %s2456_s14, %s2469_s25  ;;  %p4507_p10 = scmp.ne.s32.totalorder %s3491_s17, 0  ;;  %s3712_s21 = sshll.u32 %s4231_s13, 4 }
 0x43c   : > { %s4602_s9 = sld [smem:[#allocation27_spill]]  ;;  %s2475_s29 = sshll.u32 %s454_s18, 4  ;;  %s4515_s29 = int_to_ptr.vmem [resolvable:$true] %s2475_s29 }
 0x43d   : > { %s3495_s20 = sshll.u32 %s4615_s15, 7  ;;  %s4051_s23 = sshra.s32 %s4515_s29, 4  ;;  %s4052_s23 = int_to_ptr.vmem [resolvable:$true] %s4051_s23 }
 0x43e   : > { %s4053_s1 = sshrl.u32 %s3495_s20, 4  ;;  %s4157_s13 = smov [#allocation14]  }
 0x43f   : > { %s4058_s22 = scalar_lea.vmem %s4052_s23, %s4053_s1  ;;  %s4062_s19 = scalar_lea.vmem %s4157_s13, 32 }
 0x440   : > { %p4059_p11 = scmp.ne.s32.totalorder %s4052_s23, %s4058_s22  ;;  %p4064_p3 = scmp.lt.s32.totalorder %s4062_s19, %s4058_s22 }
 0x442   : > { %s2473_s28 = scalar_lea.hbm %s4602_s9, %s3712_s21  ;;  %p4060_p1 = pnand %p4059_p11, %p4507_p10 }
 0x443   : > { %s2477_s27 = sshll.u32 %s2473_s28, 4  ;;  %s4517_s27 = int_to_ptr.hbm [resolvable:$true] %s2477_s27 }
 0x444   : > { %p4061_p0 = pneg %p4060_p1 }
 0x446   : > { %p4066_p7 = pnand %p4064_p3, %p4061_p0 }
 0x448   : > { %4069 = shalt.err (!%p4066_p7)
}
 0x449   : > { %s4070_s18 = sshra.s32 %s4517_s27, 4  ;;  %s4081_s25 = scalar_lea.hbm %s4602_s9, 24  ;;  %s4071_s18 = int_to_ptr.hbm [resolvable:$true] %s4070_s18 }
 0x44a   : > { %s4077_s16 = scalar_lea.hbm %s4071_s18, %s4053_s1  ;;  %p4082_p13 = scmp.lt.s32.totalorder %s4071_s18, %s4602_s9 }
 0x44b   : > { %p4078_p8 = scmp.ne.s32.totalorder %s4071_s18, %s4077_s16  ;;  %p4083_p2 = scmp.lt.s32.totalorder %s4081_s25, %s4077_s16 }
 0x44d   : > { %p4079_p4 = pnand %p4078_p8, %p4507_p10  ;;  %p4084_p5 = por %p4083_p2, %p4082_p13 }
 0x44f   : > { %p4080_p12 = pneg %p4079_p4 }
 0x451   : > { %p4085_p9 = pnand %p4084_p5, %p4080_p12 }
 0x453   : > { %4088 = shalt.err (!%p4085_p9)
}
 0x454   : > { %s4158_s26 = smov 128   ;;  %s4159_s28 = smov 8  }
 0x455   : > { %2483 = dma.vmem_to_hbm [thread:$0]  (%p4507_p10), %s4515_s29, %s3495_s20, %s4517_s27, %s2456_s14, %s4158_s26, %s4158_s26, %s4159_s28  }
 0x456 PF: > { %s4603_s23 = sld [smem:[#allocation20_spill]]  ;;  %p4606_p11 = scmp.ge.s32.totalorder %s4140_s12, 2 }
 0x457   : > { %s4604_s1 = sld [smem:[#allocation23_spill]] }
 0x45c   : > { %s2492_s22 = sand.u32 1, %s4603_s23  }
 0x45d   : > { %p4605_p6 = scmp.ne.s32.totalorder %s4604_s1, 0  ;;  %s2493_s13 = scalar_lea.sflag [#allocation4], %s2492_s22 }
 0x45f   : > { %p3759_p1 = pnand %p4606_p11, %p4605_p6 }
 0x461   : > { %p3760_p0 = pneg %p3759_p1 }
 0x463   : > { %4123 = dma.done.wait (%p3760_p0), %s2493_s13, 256  }
 0x464   : > { %4125 = vsyncadd (%p3760_p0), %s2493_s13, 4294967040  ;;  %s4607_s12 = sld [smem:[#allocation21_spill]]  ;;  %s4609_s30 = smov %s4132_s10 }
 0x465   : > { %s4608_s3 = sld [smem:[#allocation22_spill]]  ;;  %s4610_s10 = smov %s4136_s11 }
 0x46a   : > { %p25_p3 = scmp.ge.s32.totalorder %s4607_s12, 4  }
 0x46b   : > { %s4611_s11 = smov %s4608_s3 }
 0x46c   :  { %27 = sbr.rel (!%p25_p3) target bundleno = 13 (0xd), region = 125 }
 0x471   :  { %2499 = vsyncpa [#allocation3], 1 }
 0x472   :  { %2501 = vsyncpa [#allocation3 + $0x1], 1 }
 0x473   :  { %2502 = vsyncpa [#allocation6], 1 }
 0x474   :  { %2503 = vsyncpa [#allocation9], 1 }
 0x475   :  { %2504 = vsyncpa [#allocation12], 1 }
 0x476   :  { %2505 = vsyncpa [#allocation4], 1 }
 0x477   :  { %2507 = vsyncpa [#allocation4 + $0x1], 1 }

</bundles_post_ra>
